<compile_context>
chip_gen: v6e
topology: v6e:2x2x1
jax: 0.10.0
libtpu: 0.0.40
codegen_flags: <defaults>
</compile_context>

<pallas_src>
import math
from functools import partial

import jax
import jax.numpy as jnp
from jax.experimental import pallas as pl
from jax.experimental.pallas import tpu as pltpu


def _round_up(v, m):
    return ((v + m - 1) // m) * m


# ----------------------------------------------------------------------------
# in-kernel helpers (f32 math)
# ----------------------------------------------------------------------------
def _layernorm(x, g, b, eps=1e-5):
    mu = jnp.mean(x, axis=-1, keepdims=True)
    xc = x - mu
    var = jnp.mean(xc * xc, axis=-1, keepdims=True)
    return xc * jax.lax.rsqrt(var + eps) * g + b


def _gelu(x):
    c = 0.7978845608028654  # sqrt(2/pi)
    return 0.5 * x * (1.0 + jnp.tanh(c * (x + 0.044715 * x * x * x)))


# ----------------------------------------------------------------------------
# fused kernel: embedding (layer 0) + transformer block (every layer) + head
# (last layer).  Grid = (bn_tile, layer); layer is the fastest ("arbitrary") axis.
# ----------------------------------------------------------------------------
def _bert_kernel(num_heads, t_mid,
                 x_ref, kbias_ref, we_ref, be_ref, pos_ref,
                 ln1g_ref, ln1b_ref, wqkv_ref, bqkv_ref, wo_ref, bo_ref,
                 ln2g_ref, ln2b_ref, w1_ref, b1_ref, w2_ref, b2_ref,
                 wh_ref, bh_ref,
                 o_ref, h_ref):
    layer = pl.program_id(1)
    n_layers = pl.num_programs(1)

    TBN, T, H = h_ref.shape
    dh = H // num_heads
    scale = 1.0 / math.sqrt(dh)

    # ---- embedding projection + positional embedding, fused into layer 0 ----
    # K = C is tiny (4), so it is C broadcast multiply-adds on the VPU; the
    # accumulator starts at be + pos (no trailing add), we load hoisted.
    @pl.when(layer == 0)
    def _():
        xx = x_ref[...]                                   # (TBN, T, C) f32
        we = we_ref[...]                                  # (C, H) f32, hoisted
        acc = be_ref[...] + pos_ref[...]                  # (T, H)
        for c in range(xx.shape[-1]):
            acc = acc + xx[:, :, c:c + 1] * we[c:c + 1, :]
        h_ref[...] = acc                                  # (TBN, T, H)

    x = h_ref[...]                                        # (TBN, T, H) f32

    # ---- multi-head self-attention sublayer (pre-norm, residual) ----
    xn = _layernorm(x, ln1g_ref[...], ln1b_ref[...])
    xf = xn.reshape(TBN * T, H).astype(jnp.bfloat16)

    # fused QKV projection: one matmul, output lanes [q | k | v | pad] (128 wide)
    qkv = (jnp.dot(xf, wqkv_ref[...], preferred_element_type=jnp.float32)
           + bqkv_ref[...])                               # (TBN*T, QKVP) f32
    qkv = qkv.reshape(TBN, T, -1).astype(jnp.bfloat16)    # single hoisted cast

    kbias = kbias_ref[...][None]                          # (1, 1, T) pad-key mask
    wo = wo_ref[...]                                      # (H, H) f32

    # Per-head static loop; no split/concat.  Each head's context is folded
    # straight into the output projection via a sublane slice of Wo.
    attn = jnp.zeros((TBN * T, H), jnp.float32)
    for hh in range(num_heads):
        lo = hh * dh
        q_h = qkv[:, :, lo:lo + dh]                       # (TBN, T, dh) bf16
        k_h = qkv[:, :, H + lo:H + lo + dh]
        v_h = qkv[:, :, 2 * H + lo:2 * H + lo + dh]

        s = jnp.einsum('btd,bsd->bts', q_h, k_h,
                       preferred_element_type=jnp.float32) * scale + kbias
        s = s - jnp.max(s, axis=-1, keepdims=True)
        p = jnp.exp(s)
        p = p * pl.reciprocal(jnp.sum(p, axis=-1, keepdims=True), approx=True)
        ctx = jnp.einsum('bts,bsd->btd', p.astype(jnp.bfloat16), v_h,
                         preferred_element_type=jnp.float32)  # (TBN, T, dh)

        attn = attn + jnp.dot(
            ctx.reshape(TBN * T, dh).astype(jnp.bfloat16),
            wo[lo:lo + dh, :].astype(jnp.bfloat16),
            preferred_element_type=jnp.float32)

    x = x + attn.reshape(TBN, T, H) + bo_ref[...]

    # ---- feed-forward sublayer (pre-norm, tanh-GELU, residual) ----
    xn2 = _layernorm(x, ln2g_ref[...], ln2b_ref[...])
    hm = (jnp.dot(xn2.reshape(TBN * T, H).astype(jnp.bfloat16), w1_ref[...],
                  preferred_element_type=jnp.float32) + b1_ref[...])
    hm = _gelu(hm)                                        # pad lanes stay 0
    ff = jnp.dot(hm.astype(jnp.bfloat16), w2_ref[...],
                 preferred_element_type=jnp.float32)
    h_new = x + ff.reshape(TBN, T, H) + b2_ref[...]
    h_ref[...] = h_new                                    # carried to next layer

    # ---- head (middle-frame 1x1 conv), fused into the last layer ----
    @pl.when(layer == n_layers - 1)
    def _():
        mid = h_new[:, t_mid:t_mid + 1, :].reshape(TBN, H).astype(jnp.bfloat16)
        o_ref[...] = (jnp.dot(mid, wh_ref[...],
                              preferred_element_type=jnp.float32) + bh_ref[...])


# ----------------------------------------------------------------------------
# parameter init (deterministic, in-script); weights stored stacked per layer.
# QKV is fused and lane-padded to 128; FFN hidden lane-padded to 128.
# ----------------------------------------------------------------------------
def init_params(key, in_ch, hidden, n_layers, num_heads, T, num_joints,
                lane_pad=128):
    ff = hidden * 2                        # feed_forward_hidden = hidden * 2
    j3 = num_joints * 3
    jp = _round_up(j3, lane_pad)           # lane-dense head output
    t_pad = _round_up(T, 8)                # sublane-aligned frames
    qkvp = _round_up(3 * hidden, lane_pad) # fused QKV output lanes
    ffp = _round_up(ff, lane_pad)          # FFN hidden lanes

    kit = iter(jax.random.split(key, 16))

    def nrm(shape, scale=0.02):
        return scale * jax.random.normal(next(kit), shape, dtype=jnp.float32)

    pos = jnp.pad(nrm((T, hidden)), ((0, t_pad - T), (0, 0)))
    w_head = jnp.pad(nrm((hidden, j3)),
                     ((0, 0), (0, jp - j3))).astype(jnp.bfloat16)

    wqkv = jnp.pad(nrm((n_layers, hidden, 3 * hidden)),
                   ((0, 0), (0, 0), (0, qkvp - 3 * hidden))).astype(jnp.bfloat16)
    w1 = jnp.pad(nrm((n_layers, hidden, ff)),
                 ((0, 0), (0, 0), (0, ffp - ff))).astype(jnp.bfloat16)
    w2 = jnp.pad(nrm((n_layers, ff, hidden)),
                 ((0, 0), (0, ffp - ff), (0, 0))).astype(jnp.bfloat16)
    wo = nrm((n_layers, hidden, hidden))   # kept f32: tiny, sliced per head

    zeros_h = lambda: jnp.zeros((n_layers, 1, hidden), jnp.float32)
    return {
        'embed': {'w': nrm((in_ch, hidden)),
                  'b': jnp.zeros((1, hidden), jnp.float32),
                  'pos': pos},
        'layers': {
            'ln1_g': jnp.ones((n_layers, 1, hidden), jnp.float32),
            'ln1_b': zeros_h(),
            'wqkv': wqkv,
            'bqkv': jnp.zeros((n_layers, 1, qkvp), jnp.float32),
            'wo': wo, 'bo': zeros_h(),
            'ln2_g': jnp.ones((n_layers, 1, hidden), jnp.float32),
            'ln2_b': zeros_h(),
            'w1': w1, 'b1': jnp.zeros((n_layers, 1, ffp), jnp.float32),
            'w2': w2, 'b2': zeros_h(),
        },
        'head': {'w': w_head, 'b': jnp.zeros((1, jp), jnp.float32)},
    }


def _pick_row_tile(bn, target=512):
    """Largest divisor of bn that is a multiple of 8, <= target, and leaves at
    least 2 blocks on the bn axis when bn >= 16 (keeps v7x's 2nd core busy)."""
    if bn < 16:
        return bn
    cap = max(8, bn // 2)
    goal = min(target, cap)
    for t in range(goal, 7, -1):
        if bn % t == 0 and t % 8 == 0:
            return t
    return bn  # fallback: single block (bn not a multiple of 8)


def _vmem_limit_bytes(tbn, t_pad, c, h, qkvp, ffp, jp):
    # double-buffered per-layer weights + resident input/activation + temporaries
    w_layer = 2 * (h * qkvp + h * h + h * ffp + ffp * h) \
        + 4 * (qkvp + ffp + 6 * h)
    resident = 4 * tbn * t_pad * (c + h)              # input tile + carried act
    temps = 4 * tbn * t_pad * (qkvp + ffp + 6 * h)    # qkv / hm / LN temporaries
    out = 4 * tbn * jp
    est = 2 * w_layer + 2 * resident + temps + 2 * out + (4 << 20)
    return int(min(32 << 20, max(8 << 20, est)))


# ----------------------------------------------------------------------------
# full forward (mirrors BERT.forward + Head.forward)
# ----------------------------------------------------------------------------
def bert_forward(x, params, num_heads, num_joints):
    B, C, T, N = x.shape
    BN = B * N
    e, lp, hd = params['embed'], params['layers'], params['head']
    T_pad, H = e['pos'].shape
    L = lp['wqkv'].shape[0]
    QKVP = lp['wqkv'].shape[2]
    FFP = lp['w1'].shape[2]
    JP = hd['w'].shape[1]
    assert H % num_heads == 0

    # permute(0,3,2,1).view(B*N, T, C), pad T to the sublane multiple
    seq = jnp.transpose(x, (0, 3, 2, 1)).reshape(BN, T, C)
    if T_pad > T:
        seq = jnp.pad(seq, ((0, 0), (0, T_pad - T), (0, 0)))
    kbias = jnp.where(jnp.arange(T_pad) < T, 0.0, -1e9).astype(jnp.float32)
    kbias = kbias.reshape(1, T_pad)

    tbn = _pick_row_tile(BN)
    grid = (BN // tbn, L)

    def rep(arr):           # whole-array resident, not grid-indexed
        return pl.BlockSpec(arr.shape, lambda i, l: (0,) * arr.ndim)

    def per_layer(arr):     # per-layer stacked (L, ...): pipeline over layer axis
        tail = arr.shape[1:]
        zeros = (0,) * len(tail)
        return pl.BlockSpec((None,) + tail, lambda i, l: (l,) + zeros)

    in_specs = [
        pl.BlockSpec((tbn, T_pad, C), lambda i, l: (i, 0, 0)),     # seq tile
        rep(kbias), rep(e['w']), rep(e['b']), rep(e['pos']),
        per_layer(lp['ln1_g']), per_layer(lp['ln1_b']),
        per_layer(lp['wqkv']), per_layer(lp['bqkv']),
        per_layer(lp['wo']), per_layer(lp['bo']),
        per_layer(lp['ln2_g']), per_layer(lp['ln2_b']),
        per_layer(lp['w1']), per_layer(lp['b1']),
        per_layer(lp['w2']), per_layer(lp['b2']),
        rep(hd['w']), rep(hd['b']),
    ]

    grid_spec = pltpu.PrefetchScalarGridSpec(
        num_scalar_prefetch=0,
        grid=grid,
        in_specs=in_specs,
        out_specs=pl.BlockSpec((tbn, JP), lambda i, l: (i, 0)),
        scratch_shapes=[pltpu.VMEM((tbn, T_pad, H), jnp.float32)],
    )

    out_p = pl.pallas_call(
        partial(_bert_kernel, num_heads, T // 2),
        out_shape=jax.ShapeDtypeStruct((BN, JP), jnp.float32),
        grid_spec=grid_spec,
        compiler_params=pltpu.CompilerParams(
            dimension_semantics=("parallel", "arbitrary"),
            vmem_limit_bytes=_vmem_limit_bytes(tbn, T_pad, C, H, QKVP, FFP, JP)),
    )(seq, kbias, e['w'], e['b'], e['pos'],
      lp['ln1_g'], lp['ln1_b'], lp['wqkv'], lp['bqkv'],
      lp['wo'], lp['bo'], lp['ln2_g'], lp['ln2_b'],
      lp['w1'], lp['b1'], lp['w2'], lp['b2'],
      hd['w'], hd['b'])

    # slice off lane padding; view(BN,1,J,3) -> view(B,N,1,J,3) -> permute(0,2,3,4,1)
    j3 = num_joints * 3
    out = out_p[:, :j3].reshape(B, N, 1, num_joints, 3)
    return jnp.transpose(out, (0, 2, 3, 4, 1))


# ----------------------------------------------------------------------------
if __name__ == "__main__":
    # small, module-consistent shapes
    B, C, T, N = 2, 4, 7, 8            # C = cfg.NETWORK.NUM_CHANNELS, T frames, N columns
    HIDDEN, LAYERS, HEADS = 32, 2, 4   # cfg.NETWORK.T_FORMER.{NUM_CHANNELS,NUM_LAYERS,NUM_HEADS}
    JOINTS = 17

    key = jax.random.PRNGKey(0)
    kx, kp = jax.random.split(key)
    x = jax.random.normal(kx, (B, C, T, N), dtype=jnp.float32)
    params = init_params(kp, C, HIDDEN, LAYERS, HEADS, T, JOINTS)

    fwd = jax.jit(partial(bert_forward, num_heads=HEADS, num_joints=JOINTS))
    out = fwd(x, params)
    out = jax.block_until_ready(out)

    assert out.shape == (B, 1, JOINTS, 3, N), out.shape
    assert out.dtype == jnp.float32
    assert bool(jnp.all(jnp.isfinite(out)))
    print("KERNEL_OK")
</pallas_src>

<mosaic_0001>
module attributes {stable_mosaic.version = 11 : i64} {
  func.func @_bert_kernel(%arg0: i32, %arg1: i32, %arg2: memref<8x8x4xf32, #tpu.memory_space<vmem>>, %arg3: memref<1x8xf32, #tpu.memory_space<vmem>>, %arg4: memref<4x32xf32, #tpu.memory_space<vmem>>, %arg5: memref<1x32xf32, #tpu.memory_space<vmem>>, %arg6: memref<8x32xf32, #tpu.memory_space<vmem>>, %arg7: memref<1x1x32xf32, #tpu.memory_space<vmem>>, %arg8: memref<1x1x32xf32, #tpu.memory_space<vmem>>, %arg9: memref<1x32x128xbf16, #tpu.memory_space<vmem>>, %arg10: memref<1x1x128xf32, #tpu.memory_space<vmem>>, %arg11: memref<1x32x32xf32, #tpu.memory_space<vmem>>, %arg12: memref<1x1x32xf32, #tpu.memory_space<vmem>>, %arg13: memref<1x1x32xf32, #tpu.memory_space<vmem>>, %arg14: memref<1x1x32xf32, #tpu.memory_space<vmem>>, %arg15: memref<1x32x128xbf16, #tpu.memory_space<vmem>>, %arg16: memref<1x1x128xf32, #tpu.memory_space<vmem>>, %arg17: memref<1x128x32xbf16, #tpu.memory_space<vmem>>, %arg18: memref<1x1x32xf32, #tpu.memory_space<vmem>>, %arg19: memref<32x128xbf16, #tpu.memory_space<vmem>>, %arg20: memref<1x128xf32, #tpu.memory_space<vmem>>, %arg21: memref<8x128xf32, #tpu.memory_space<vmem>>, %arg22: memref<8x8x32xf32, #tpu.memory_space<vmem>>) attributes {dimension_semantics = [#tpu.dimension_semantics<parallel>, #tpu.dimension_semantics<arbitrary>], iteration_bounds = array<i64: 2, 2>, scalar_prefetch = 0 : i64, scratch_operands = 1 : i64, tpu.core_type = #tpu.core_type<tc>, window_params = [{transform_indices = @transform_0, window_bounds = array<i64: 8, 8, 4>}, {pipeline_mode = #tpu.pipeline_mode<synchronous>, transform_indices = @transform_1, window_bounds = array<i64: 1, 8>}, {pipeline_mode = #tpu.pipeline_mode<synchronous>, transform_indices = @transform_2, window_bounds = array<i64: 4, 32>}, {pipeline_mode = #tpu.pipeline_mode<synchronous>, transform_indices = @transform_3, window_bounds = array<i64: 1, 32>}, {pipeline_mode = #tpu.pipeline_mode<synchronous>, transform_indices = @transform_4, window_bounds = array<i64: 8, 32>}, {transform_indices = @transform_5, window_bounds = array<i64: 1, 1, 32>}, {transform_indices = @transform_6, window_bounds = array<i64: 1, 1, 32>}, {transform_indices = @transform_7, window_bounds = array<i64: 1, 32, 128>}, {transform_indices = @transform_8, window_bounds = array<i64: 1, 1, 128>}, {transform_indices = @transform_9, window_bounds = array<i64: 1, 32, 32>}, {transform_indices = @transform_10, window_bounds = array<i64: 1, 1, 32>}, {transform_indices = @transform_11, window_bounds = array<i64: 1, 1, 32>}, {transform_indices = @transform_12, window_bounds = array<i64: 1, 1, 32>}, {transform_indices = @transform_13, window_bounds = array<i64: 1, 32, 128>}, {transform_indices = @transform_14, window_bounds = array<i64: 1, 1, 128>}, {transform_indices = @transform_15, window_bounds = array<i64: 1, 128, 32>}, {transform_indices = @transform_16, window_bounds = array<i64: 1, 1, 32>}, {pipeline_mode = #tpu.pipeline_mode<synchronous>, transform_indices = @transform_17, window_bounds = array<i64: 32, 128>}, {pipeline_mode = #tpu.pipeline_mode<synchronous>, transform_indices = @transform_18, window_bounds = array<i64: 1, 128>}, {transform_indices = @transform_19, window_bounds = array<i64: 8, 128>}]} {
    %c0_i32 = arith.constant 0 : i32
    %0 = arith.cmpi eq, %arg1, %c0_i32 : i32
    %1 = arith.extui %0 : i1 to i32
    %c0_i32_0 = arith.constant 0 : i32
    %2 = arith.cmpi ne, %1, %c0_i32_0 : i32
    scf.if %2 {
      %c0_86 = arith.constant 0 : index
      %c0_87 = arith.constant 0 : index
      %c0_88 = arith.constant 0 : index
      %220 = vector.load %arg2[%c0_86, %c0_87, %c0_88] : memref<8x8x4xf32, #tpu.memory_space<vmem>>, vector<8x8x4xf32>
      %c0_89 = arith.constant 0 : index
      %c0_90 = arith.constant 0 : index
      %221 = vector.load %arg4[%c0_89, %c0_90] : memref<4x32xf32, #tpu.memory_space<vmem>>, vector<4x32xf32>
      %c0_91 = arith.constant 0 : index
      %c0_92 = arith.constant 0 : index
      %222 = vector.load %arg5[%c0_91, %c0_92] : memref<1x32xf32, #tpu.memory_space<vmem>>, vector<1x32xf32>
      %c0_93 = arith.constant 0 : index
      %c0_94 = arith.constant 0 : index
      %223 = vector.load %arg6[%c0_93, %c0_94] : memref<8x32xf32, #tpu.memory_space<vmem>>, vector<8x32xf32>
      %224 = vector.broadcast %222 : vector<1x32xf32> to vector<8x32xf32>
      %225 = arith.addf %224, %223 : vector<8x32xf32>
      %226 = vector.extract_strided_slice %220 {offsets = [0, 0, 0], sizes = [8, 8, 1], strides = [1, 1, 1]} : vector<8x8x4xf32> to vector<8x8x1xf32>
      %227 = vector.extract_strided_slice %221 {offsets = [0, 0], sizes = [1, 32], strides = [1, 1]} : vector<4x32xf32> to vector<1x32xf32>
      %228 = vector.shape_cast %227 : vector<1x32xf32> to vector<1x1x32xf32>
      %229 = vector.broadcast %226 : vector<8x8x1xf32> to vector<8x8x32xf32>
      %230 = vector.broadcast %228 : vector<1x1x32xf32> to vector<8x8x32xf32>
      %231 = arith.mulf %229, %230 : vector<8x8x32xf32>
      %232 = vector.shape_cast %225 : vector<8x32xf32> to vector<1x8x32xf32>
      %233 = vector.broadcast %232 : vector<1x8x32xf32> to vector<8x8x32xf32>
      %234 = arith.addf %233, %231 : vector<8x8x32xf32>
      %235 = vector.extract_strided_slice %220 {offsets = [0, 0, 1], sizes = [8, 8, 1], strides = [1, 1, 1]} : vector<8x8x4xf32> to vector<8x8x1xf32>
      %236 = vector.extract_strided_slice %221 {offsets = [1, 0], sizes = [1, 32], strides = [1, 1]} : vector<4x32xf32> to vector<1x32xf32>
      %237 = vector.shape_cast %236 : vector<1x32xf32> to vector<1x1x32xf32>
      %238 = vector.broadcast %235 : vector<8x8x1xf32> to vector<8x8x32xf32>
      %239 = vector.broadcast %237 : vector<1x1x32xf32> to vector<8x8x32xf32>
      %240 = arith.mulf %238, %239 : vector<8x8x32xf32>
      %241 = arith.addf %234, %240 : vector<8x8x32xf32>
      %242 = vector.extract_strided_slice %220 {offsets = [0, 0, 2], sizes = [8, 8, 1], strides = [1, 1, 1]} : vector<8x8x4xf32> to vector<8x8x1xf32>
      %243 = vector.extract_strided_slice %221 {offsets = [2, 0], sizes = [1, 32], strides = [1, 1]} : vector<4x32xf32> to vector<1x32xf32>
      %244 = vector.shape_cast %243 : vector<1x32xf32> to vector<1x1x32xf32>
      %245 = vector.broadcast %242 : vector<8x8x1xf32> to vector<8x8x32xf32>
      %246 = vector.broadcast %244 : vector<1x1x32xf32> to vector<8x8x32xf32>
      %247 = arith.mulf %245, %246 : vector<8x8x32xf32>
      %248 = arith.addf %241, %247 : vector<8x8x32xf32>
      %249 = vector.extract_strided_slice %220 {offsets = [0, 0, 3], sizes = [8, 8, 1], strides = [1, 1, 1]} : vector<8x8x4xf32> to vector<8x8x1xf32>
      %250 = vector.extract_strided_slice %221 {offsets = [3, 0], sizes = [1, 32], strides = [1, 1]} : vector<4x32xf32> to vector<1x32xf32>
      %251 = vector.shape_cast %250 : vector<1x32xf32> to vector<1x1x32xf32>
      %252 = vector.broadcast %249 : vector<8x8x1xf32> to vector<8x8x32xf32>
      %253 = vector.broadcast %251 : vector<1x1x32xf32> to vector<8x8x32xf32>
      %254 = arith.mulf %252, %253 : vector<8x8x32xf32>
      %255 = arith.addf %248, %254 : vector<8x8x32xf32>
      %c0_95 = arith.constant 0 : index
      %c0_96 = arith.constant 0 : index
      %c0_97 = arith.constant 0 : index
      %256 = vector.load %arg22[%c0_95, %c0_96, %c0_97] : memref<8x8x32xf32, #tpu.memory_space<vmem>>, vector<8x8x32xf32>
      tpu.vector_store %arg22[%c0_95, %c0_96, %c0_97], %255 {strides = array<i32>} : memref<8x8x32xf32, #tpu.memory_space<vmem>>, vector<8x8x32xf32>,
    } else {
    }
    %c0 = arith.constant 0 : index
    %c0_1 = arith.constant 0 : index
    %c0_2 = arith.constant 0 : index
    %3 = vector.load %arg22[%c0, %c0_1, %c0_2] : memref<8x8x32xf32, #tpu.memory_space<vmem>>, vector<8x8x32xf32>
    %c0_3 = arith.constant 0 : index
    %c0_4 = arith.constant 0 : index
    %c0_5 = arith.constant 0 : index
    %4 = vector.load %arg7[%c0_3, %c0_4, %c0_5] : memref<1x1x32xf32, #tpu.memory_space<vmem>>, vector<1x1x32xf32>
    %5 = vector.shape_cast %4 : vector<1x1x32xf32> to vector<1x32xf32>
    %c0_6 = arith.constant 0 : index
    %c0_7 = arith.constant 0 : index
    %c0_8 = arith.constant 0 : index
    %6 = vector.load %arg8[%c0_6, %c0_7, %c0_8] : memref<1x1x32xf32, #tpu.memory_space<vmem>>, vector<1x1x32xf32>
    %7 = vector.shape_cast %6 : vector<1x1x32xf32> to vector<1x32xf32>
    %cst = arith.constant dense<0.000000e+00> : vector<8x8xf32>
    %8 = vector.multi_reduction <add>, %3, %cst [2] : vector<8x8x32xf32> to vector<8x8xf32>
    %9 = vector.shape_cast %8 : vector<8x8xf32> to vector<8x8x1xf32>
    %cst_9 = arith.constant 3.200000e+01 : f32
    %10 = vector.broadcast %cst_9 : f32 to vector<8x8x1xf32>
    %11 = arith.divf %9, %10 : vector<8x8x1xf32>
    %12 = vector.broadcast %11 : vector<8x8x1xf32> to vector<8x8x32xf32>
    %13 = arith.subf %3, %12 : vector<8x8x32xf32>
    %14 = arith.mulf %13, %13 : vector<8x8x32xf32>
    %cst_10 = arith.constant dense<0.000000e+00> : vector<8x8xf32>
    %15 = vector.multi_reduction <add>, %14, %cst_10 [2] : vector<8x8x32xf32> to vector<8x8xf32>
    %16 = vector.shape_cast %15 : vector<8x8xf32> to vector<8x8x1xf32>
    %cst_11 = arith.constant 3.200000e+01 : f32
    %17 = vector.broadcast %cst_11 : f32 to vector<8x8x1xf32>
    %18 = arith.divf %16, %17 : vector<8x8x1xf32>
    %cst_12 = arith.constant 9.99999974E-6 : f32
    %19 = vector.broadcast %cst_12 : f32 to vector<8x8x1xf32>
    %20 = arith.addf %18, %19 : vector<8x8x1xf32>
    %21 = math.rsqrt %20 : vector<8x8x1xf32>
    %22 = vector.broadcast %21 : vector<8x8x1xf32> to vector<8x8x32xf32>
    %23 = arith.mulf %13, %22 : vector<8x8x32xf32>
    %24 = vector.shape_cast %5 : vector<1x32xf32> to vector<1x1x32xf32>
    %25 = vector.broadcast %24 : vector<1x1x32xf32> to vector<8x8x32xf32>
    %26 = arith.mulf %23, %25 : vector<8x8x32xf32>
    %27 = vector.shape_cast %7 : vector<1x32xf32> to vector<1x1x32xf32>
    %28 = vector.broadcast %27 : vector<1x1x32xf32> to vector<8x8x32xf32>
    %29 = arith.addf %26, %28 : vector<8x8x32xf32>
    %30 = vector.shape_cast %29 : vector<8x8x32xf32> to vector<64x32xf32>
    %31 = arith.truncf %30 : vector<64x32xf32> to vector<64x32xbf16>
    %c0_13 = arith.constant 0 : index
    %c0_14 = arith.constant 0 : index
    %c0_15 = arith.constant 0 : index
    %32 = vector.load %arg9[%c0_13, %c0_14, %c0_15] : memref<1x32x128xbf16, #tpu.memory_space<vmem>>, vector<1x32x128xbf16>
    %33 = vector.shape_cast %32 : vector<1x32x128xbf16> to vector<32x128xbf16>
    %cst_16 = arith.constant dense<0.000000e+00> : vector<64x128xf32>
    %34 = tpu.matmul %31, %33, %cst_16 {dimension_numbers = #tpu.dot_dimension_numbers<[1], [0], [0], [1], [0, 0, 1, 1], [], []>} : vector<64x32xbf16>, vector<32x128xbf16>, vector<64x128xf32> -> vector<64x128xf32>
    %c0_17 = arith.constant 0 : index
    %c0_18 = arith.constant 0 : index
    %c0_19 = arith.constant 0 : index
    %35 = vector.load %arg10[%c0_17, %c0_18, %c0_19] : memref<1x1x128xf32, #tpu.memory_space<vmem>>, vector<1x1x128xf32>
    %36 = vector.shape_cast %35 : vector<1x1x128xf32> to vector<1x128xf32>
    %37 = vector.broadcast %36 : vector<1x128xf32> to vector<64x128xf32>
    %38 = arith.addf %34, %37 : vector<64x128xf32>
    %39 = vector.shape_cast %38 : vector<64x128xf32> to vector<8x8x128xf32>
    %40 = arith.truncf %39 : vector<8x8x128xf32> to vector<8x8x128xbf16>
    %c0_20 = arith.constant 0 : index
    %c0_21 = arith.constant 0 : index
    %41 = vector.load %arg3[%c0_20, %c0_21] : memref<1x8xf32, #tpu.memory_space<vmem>>, vector<1x8xf32>
    %42 = vector.shape_cast %41 : vector<1x8xf32> to vector<1x1x8xf32>
    %c0_22 = arith.constant 0 : index
    %c0_23 = arith.constant 0 : index
    %c0_24 = arith.constant 0 : index
    %43 = vector.load %arg11[%c0_22, %c0_23, %c0_24] : memref<1x32x32xf32, #tpu.memory_space<vmem>>, vector<1x32x32xf32>
    %44 = vector.shape_cast %43 : vector<1x32x32xf32> to vector<32x32xf32>
    %cst_25 = arith.constant 0.000000e+00 : f32
    %45 = vector.broadcast %cst_25 : f32 to vector<64x32xf32>
    %46 = vector.extract_strided_slice %40 {offsets = [0, 0, 0], sizes = [8, 8, 8], strides = [1, 1, 1]} : vector<8x8x128xbf16> to vector<8x8x8xbf16>
    %47 = vector.extract_strided_slice %40 {offsets = [0, 0, 32], sizes = [8, 8, 8], strides = [1, 1, 1]} : vector<8x8x128xbf16> to vector<8x8x8xbf16>
    %48 = vector.extract_strided_slice %40 {offsets = [0, 0, 64], sizes = [8, 8, 8], strides = [1, 1, 1]} : vector<8x8x128xbf16> to vector<8x8x8xbf16>
    "tpu.trace_start"() <{level = 10 : i32, message = "btd,bsd->bts"}> : () -> ()
    %cst_26 = arith.constant dense<0.000000e+00> : vector<8x8x8xf32>
    %49 = tpu.matmul %46, %47, %cst_26 {dimension_numbers = #tpu.dot_dimension_numbers<[2], [2], [1], [1], [0, 0, 0, 1, 1, 1], [0], [0]>} : vector<8x8x8xbf16>, vector<8x8x8xbf16>, vector<8x8x8xf32> -> vector<8x8x8xf32>
    "tpu.trace_stop"() : () -> ()
    %cst_27 = arith.constant 0.353553385 : f32
    %50 = vector.broadcast %cst_27 : f32 to vector<8x8x8xf32>
    %51 = arith.mulf %49, %50 : vector<8x8x8xf32>
    %52 = vector.broadcast %42 : vector<1x1x8xf32> to vector<8x8x8xf32>
    %53 = arith.addf %51, %52 : vector<8x8x8xf32>
    %cst_28 = arith.constant dense<0xFF800000> : vector<8x8xf32>
    %54 = vector.multi_reduction <maximumf>, %53, %cst_28 [2] : vector<8x8x8xf32> to vector<8x8xf32>
    %55 = vector.shape_cast %54 : vector<8x8xf32> to vector<8x8x1xf32>
    %56 = vector.broadcast %55 : vector<8x8x1xf32> to vector<8x8x8xf32>
    %57 = arith.subf %53, %56 : vector<8x8x8xf32>
    %58 = math.exp %57 : vector<8x8x8xf32>
    %cst_29 = arith.constant dense<0.000000e+00> : vector<8x8xf32>
    %59 = vector.multi_reduction <add>, %58, %cst_29 [2] : vector<8x8x8xf32> to vector<8x8xf32>
    %60 = vector.shape_cast %59 : vector<8x8xf32> to vector<8x8x1xf32>
    %61 = tpu.reciprocal %60 {approx = true} : vector<8x8x1xf32> -> vector<8x8x1xf32>
    %62 = vector.broadcast %61 : vector<8x8x1xf32> to vector<8x8x8xf32>
    %63 = arith.mulf %58, %62 : vector<8x8x8xf32>
    %64 = arith.truncf %63 : vector<8x8x8xf32> to vector<8x8x8xbf16>
    "tpu.trace_start"() <{level = 10 : i32, message = "bts,bsd->btd"}> : () -> ()
    %cst_30 = arith.constant dense<0.000000e+00> : vector<8x8x8xf32>
    %65 = tpu.matmul %64, %48, %cst_30 {dimension_numbers = #tpu.dot_dimension_numbers<[2], [1], [1], [2], [0, 0, 0, 1, 1, 2], [0], [0]>} : vector<8x8x8xbf16>, vector<8x8x8xbf16>, vector<8x8x8xf32> -> vector<8x8x8xf32>
    "tpu.trace_stop"() : () -> ()
    %66 = vector.shape_cast %65 : vector<8x8x8xf32> to vector<64x8xf32>
    %67 = arith.truncf %66 : vector<64x8xf32> to vector<64x8xbf16>
    %68 = vector.extract_strided_slice %44 {offsets = [0, 0], sizes = [8, 32], strides = [1, 1]} : vector<32x32xf32> to vector<8x32xf32>
    %69 = arith.truncf %68 : vector<8x32xf32> to vector<8x32xbf16>
    %cst_31 = arith.constant dense<0.000000e+00> : vector<64x32xf32>
    %70 = tpu.matmul %67, %69, %cst_31 {dimension_numbers = #tpu.dot_dimension_numbers<[1], [0], [0], [1], [0, 0, 1, 1], [], []>} : vector<64x8xbf16>, vector<8x32xbf16>, vector<64x32xf32> -> vector<64x32xf32>
    %71 = arith.addf %45, %70 : vector<64x32xf32>
    %72 = vector.extract_strided_slice %40 {offsets = [0, 0, 8], sizes = [8, 8, 8], strides = [1, 1, 1]} : vector<8x8x128xbf16> to vector<8x8x8xbf16>
    %73 = vector.extract_strided_slice %40 {offsets = [0, 0, 40], sizes = [8, 8, 8], strides = [1, 1, 1]} : vector<8x8x128xbf16> to vector<8x8x8xbf16>
    %74 = vector.extract_strided_slice %40 {offsets = [0, 0, 72], sizes = [8, 8, 8], strides = [1, 1, 1]} : vector<8x8x128xbf16> to vector<8x8x8xbf16>
    "tpu.trace_start"() <{level = 10 : i32, message = "btd,bsd->bts"}> : () -> ()
    %cst_32 = arith.constant dense<0.000000e+00> : vector<8x8x8xf32>
    %75 = tpu.matmul %72, %73, %cst_32 {dimension_numbers = #tpu.dot_dimension_numbers<[2], [2], [1], [1], [0, 0, 0, 1, 1, 1], [0], [0]>} : vector<8x8x8xbf16>, vector<8x8x8xbf16>, vector<8x8x8xf32> -> vector<8x8x8xf32>
    "tpu.trace_stop"() : () -> ()
    %cst_33 = arith.constant 0.353553385 : f32
    %76 = vector.broadcast %cst_33 : f32 to vector<8x8x8xf32>
    %77 = arith.mulf %75, %76 : vector<8x8x8xf32>
    %78 = vector.broadcast %42 : vector<1x1x8xf32> to vector<8x8x8xf32>
    %79 = arith.addf %77, %78 : vector<8x8x8xf32>
    %cst_34 = arith.constant dense<0xFF800000> : vector<8x8xf32>
    %80 = vector.multi_reduction <maximumf>, %79, %cst_34 [2] : vector<8x8x8xf32> to vector<8x8xf32>
    %81 = vector.shape_cast %80 : vector<8x8xf32> to vector<8x8x1xf32>
    %82 = vector.broadcast %81 : vector<8x8x1xf32> to vector<8x8x8xf32>
    %83 = arith.subf %79, %82 : vector<8x8x8xf32>
    %84 = math.exp %83 : vector<8x8x8xf32>
    %cst_35 = arith.constant dense<0.000000e+00> : vector<8x8xf32>
    %85 = vector.multi_reduction <add>, %84, %cst_35 [2] : vector<8x8x8xf32> to vector<8x8xf32>
    %86 = vector.shape_cast %85 : vector<8x8xf32> to vector<8x8x1xf32>
    %87 = tpu.reciprocal %86 {approx = true} : vector<8x8x1xf32> -> vector<8x8x1xf32>
    %88 = vector.broadcast %87 : vector<8x8x1xf32> to vector<8x8x8xf32>
    %89 = arith.mulf %84, %88 : vector<8x8x8xf32>
    %90 = arith.truncf %89 : vector<8x8x8xf32> to vector<8x8x8xbf16>
    "tpu.trace_start"() <{level = 10 : i32, message = "bts,bsd->btd"}> : () -> ()
    %cst_36 = arith.constant dense<0.000000e+00> : vector<8x8x8xf32>
    %91 = tpu.matmul %90, %74, %cst_36 {dimension_numbers = #tpu.dot_dimension_numbers<[2], [1], [1], [2], [0, 0, 0, 1, 1, 2], [0], [0]>} : vector<8x8x8xbf16>, vector<8x8x8xbf16>, vector<8x8x8xf32> -> vector<8x8x8xf32>
    "tpu.trace_stop"() : () -> ()
    %92 = vector.shape_cast %91 : vector<8x8x8xf32> to vector<64x8xf32>
    %93 = arith.truncf %92 : vector<64x8xf32> to vector<64x8xbf16>
    %94 = vector.extract_strided_slice %44 {offsets = [8, 0], sizes = [8, 32], strides = [1, 1]} : vector<32x32xf32> to vector<8x32xf32>
    %95 = arith.truncf %94 : vector<8x32xf32> to vector<8x32xbf16>
    %cst_37 = arith.constant dense<0.000000e+00> : vector<64x32xf32>
    %96 = tpu.matmul %93, %95, %cst_37 {dimension_numbers = #tpu.dot_dimension_numbers<[1], [0], [0], [1], [0, 0, 1, 1], [], []>} : vector<64x8xbf16>, vector<8x32xbf16>, vector<64x32xf32> -> vector<64x32xf32>
    %97 = arith.addf %71, %96 : vector<64x32xf32>
    %98 = vector.extract_strided_slice %40 {offsets = [0, 0, 16], sizes = [8, 8, 8], strides = [1, 1, 1]} : vector<8x8x128xbf16> to vector<8x8x8xbf16>
    %99 = vector.extract_strided_slice %40 {offsets = [0, 0, 48], sizes = [8, 8, 8], strides = [1, 1, 1]} : vector<8x8x128xbf16> to vector<8x8x8xbf16>
    %100 = vector.extract_strided_slice %40 {offsets = [0, 0, 80], sizes = [8, 8, 8], strides = [1, 1, 1]} : vector<8x8x128xbf16> to vector<8x8x8xbf16>
    "tpu.trace_start"() <{level = 10 : i32, message = "btd,bsd->bts"}> : () -> ()
    %cst_38 = arith.constant dense<0.000000e+00> : vector<8x8x8xf32>
    %101 = tpu.matmul %98, %99, %cst_38 {dimension_numbers = #tpu.dot_dimension_numbers<[2], [2], [1], [1], [0, 0, 0, 1, 1, 1], [0], [0]>} : vector<8x8x8xbf16>, vector<8x8x8xbf16>, vector<8x8x8xf32> -> vector<8x8x8xf32>
    "tpu.trace_stop"() : () -> ()
    %cst_39 = arith.constant 0.353553385 : f32
    %102 = vector.broadcast %cst_39 : f32 to vector<8x8x8xf32>
    %103 = arith.mulf %101, %102 : vector<8x8x8xf32>
    %104 = vector.broadcast %42 : vector<1x1x8xf32> to vector<8x8x8xf32>
    %105 = arith.addf %103, %104 : vector<8x8x8xf32>
    %cst_40 = arith.constant dense<0xFF800000> : vector<8x8xf32>
    %106 = vector.multi_reduction <maximumf>, %105, %cst_40 [2] : vector<8x8x8xf32> to vector<8x8xf32>
    %107 = vector.shape_cast %106 : vector<8x8xf32> to vector<8x8x1xf32>
    %108 = vector.broadcast %107 : vector<8x8x1xf32> to vector<8x8x8xf32>
    %109 = arith.subf %105, %108 : vector<8x8x8xf32>
    %110 = math.exp %109 : vector<8x8x8xf32>
    %cst_41 = arith.constant dense<0.000000e+00> : vector<8x8xf32>
    %111 = vector.multi_reduction <add>, %110, %cst_41 [2] : vector<8x8x8xf32> to vector<8x8xf32>
    %112 = vector.shape_cast %111 : vector<8x8xf32> to vector<8x8x1xf32>
    %113 = tpu.reciprocal %112 {approx = true} : vector<8x8x1xf32> -> vector<8x8x1xf32>
    %114 = vector.broadcast %113 : vector<8x8x1xf32> to vector<8x8x8xf32>
    %115 = arith.mulf %110, %114 : vector<8x8x8xf32>
    %116 = arith.truncf %115 : vector<8x8x8xf32> to vector<8x8x8xbf16>
    "tpu.trace_start"() <{level = 10 : i32, message = "bts,bsd->btd"}> : () -> ()
    %cst_42 = arith.constant dense<0.000000e+00> : vector<8x8x8xf32>
    %117 = tpu.matmul %116, %100, %cst_42 {dimension_numbers = #tpu.dot_dimension_numbers<[2], [1], [1], [2], [0, 0, 0, 1, 1, 2], [0], [0]>} : vector<8x8x8xbf16>, vector<8x8x8xbf16>, vector<8x8x8xf32> -> vector<8x8x8xf32>
    "tpu.trace_stop"() : () -> ()
    %118 = vector.shape_cast %117 : vector<8x8x8xf32> to vector<64x8xf32>
    %119 = arith.truncf %118 : vector<64x8xf32> to vector<64x8xbf16>
    %120 = vector.extract_strided_slice %44 {offsets = [16, 0], sizes = [8, 32], strides = [1, 1]} : vector<32x32xf32> to vector<8x32xf32>
    %121 = arith.truncf %120 : vector<8x32xf32> to vector<8x32xbf16>
    %cst_43 = arith.constant dense<0.000000e+00> : vector<64x32xf32>
    %122 = tpu.matmul %119, %121, %cst_43 {dimension_numbers = #tpu.dot_dimension_numbers<[1], [0], [0], [1], [0, 0, 1, 1], [], []>} : vector<64x8xbf16>, vector<8x32xbf16>, vector<64x32xf32> -> vector<64x32xf32>
    %123 = arith.addf %97, %122 : vector<64x32xf32>
    %124 = vector.extract_strided_slice %40 {offsets = [0, 0, 24], sizes = [8, 8, 8], strides = [1, 1, 1]} : vector<8x8x128xbf16> to vector<8x8x8xbf16>
    %125 = vector.extract_strided_slice %40 {offsets = [0, 0, 56], sizes = [8, 8, 8], strides = [1, 1, 1]} : vector<8x8x128xbf16> to vector<8x8x8xbf16>
    %126 = vector.extract_strided_slice %40 {offsets = [0, 0, 88], sizes = [8, 8, 8], strides = [1, 1, 1]} : vector<8x8x128xbf16> to vector<8x8x8xbf16>
    "tpu.trace_start"() <{level = 10 : i32, message = "btd,bsd->bts"}> : () -> ()
    %cst_44 = arith.constant dense<0.000000e+00> : vector<8x8x8xf32>
    %127 = tpu.matmul %124, %125, %cst_44 {dimension_numbers = #tpu.dot_dimension_numbers<[2], [2], [1], [1], [0, 0, 0, 1, 1, 1], [0], [0]>} : vector<8x8x8xbf16>, vector<8x8x8xbf16>, vector<8x8x8xf32> -> vector<8x8x8xf32>
    "tpu.trace_stop"() : () -> ()
    %cst_45 = arith.constant 0.353553385 : f32
    %128 = vector.broadcast %cst_45 : f32 to vector<8x8x8xf32>
    %129 = arith.mulf %127, %128 : vector<8x8x8xf32>
    %130 = vector.broadcast %42 : vector<1x1x8xf32> to vector<8x8x8xf32>
    %131 = arith.addf %129, %130 : vector<8x8x8xf32>
    %cst_46 = arith.constant dense<0xFF800000> : vector<8x8xf32>
    %132 = vector.multi_reduction <maximumf>, %131, %cst_46 [2] : vector<8x8x8xf32> to vector<8x8xf32>
    %133 = vector.shape_cast %132 : vector<8x8xf32> to vector<8x8x1xf32>
    %134 = vector.broadcast %133 : vector<8x8x1xf32> to vector<8x8x8xf32>
    %135 = arith.subf %131, %134 : vector<8x8x8xf32>
    %136 = math.exp %135 : vector<8x8x8xf32>
    %cst_47 = arith.constant dense<0.000000e+00> : vector<8x8xf32>
    %137 = vector.multi_reduction <add>, %136, %cst_47 [2] : vector<8x8x8xf32> to vector<8x8xf32>
    %138 = vector.shape_cast %137 : vector<8x8xf32> to vector<8x8x1xf32>
    %139 = tpu.reciprocal %138 {approx = true} : vector<8x8x1xf32> -> vector<8x8x1xf32>
    %140 = vector.broadcast %139 : vector<8x8x1xf32> to vector<8x8x8xf32>
    %141 = arith.mulf %136, %140 : vector<8x8x8xf32>
    %142 = arith.truncf %141 : vector<8x8x8xf32> to vector<8x8x8xbf16>
    "tpu.trace_start"() <{level = 10 : i32, message = "bts,bsd->btd"}> : () -> ()
    %cst_48 = arith.constant dense<0.000000e+00> : vector<8x8x8xf32>
    %143 = tpu.matmul %142, %126, %cst_48 {dimension_numbers = #tpu.dot_dimension_numbers<[2], [1], [1], [2], [0, 0, 0, 1, 1, 2], [0], [0]>} : vector<8x8x8xbf16>, vector<8x8x8xbf16>, vector<8x8x8xf32> -> vector<8x8x8xf32>
    "tpu.trace_stop"() : () -> ()
    %144 = vector.shape_cast %143 : vector<8x8x8xf32> to vector<64x8xf32>
    %145 = arith.truncf %144 : vector<64x8xf32> to vector<64x8xbf16>
    %146 = vector.extract_strided_slice %44 {offsets = [24, 0], sizes = [8, 32], strides = [1, 1]} : vector<32x32xf32> to vector<8x32xf32>
    %147 = arith.truncf %146 : vector<8x32xf32> to vector<8x32xbf16>
    %cst_49 = arith.constant dense<0.000000e+00> : vector<64x32xf32>
    %148 = tpu.matmul %145, %147, %cst_49 {dimension_numbers = #tpu.dot_dimension_numbers<[1], [0], [0], [1], [0, 0, 1, 1], [], []>} : vector<64x8xbf16>, vector<8x32xbf16>, vector<64x32xf32> -> vector<64x32xf32>
    %149 = arith.addf %123, %148 : vector<64x32xf32>
    %150 = vector.shape_cast %149 : vector<64x32xf32> to vector<8x8x32xf32>
    %151 = arith.addf %3, %150 : vector<8x8x32xf32>
    %c0_50 = arith.constant 0 : index
    %c0_51 = arith.constant 0 : index
    %c0_52 = arith.constant 0 : index
    %152 = vector.load %arg12[%c0_50, %c0_51, %c0_52] : memref<1x1x32xf32, #tpu.memory_space<vmem>>, vector<1x1x32xf32>
    %153 = vector.shape_cast %152 : vector<1x1x32xf32> to vector<1x32xf32>
    %154 = vector.shape_cast %153 : vector<1x32xf32> to vector<1x1x32xf32>
    %155 = vector.broadcast %154 : vector<1x1x32xf32> to vector<8x8x32xf32>
    %156 = arith.addf %151, %155 : vector<8x8x32xf32>
    %c0_53 = arith.constant 0 : index
    %c0_54 = arith.constant 0 : index
    %c0_55 = arith.constant 0 : index
    %157 = vector.load %arg13[%c0_53, %c0_54, %c0_55] : memref<1x1x32xf32, #tpu.memory_space<vmem>>, vector<1x1x32xf32>
    %158 = vector.shape_cast %157 : vector<1x1x32xf32> to vector<1x32xf32>
    %c0_56 = arith.constant 0 : index
    %c0_57 = arith.constant 0 : index
    %c0_58 = arith.constant 0 : index
    %159 = vector.load %arg14[%c0_56, %c0_57, %c0_58] : memref<1x1x32xf32, #tpu.memory_space<vmem>>, vector<1x1x32xf32>
    %160 = vector.shape_cast %159 : vector<1x1x32xf32> to vector<1x32xf32>
    %cst_59 = arith.constant dense<0.000000e+00> : vector<8x8xf32>
    %161 = vector.multi_reduction <add>, %156, %cst_59 [2] : vector<8x8x32xf32> to vector<8x8xf32>
    %162 = vector.shape_cast %161 : vector<8x8xf32> to vector<8x8x1xf32>
    %cst_60 = arith.constant 3.200000e+01 : f32
    %163 = vector.broadcast %cst_60 : f32 to vector<8x8x1xf32>
    %164 = arith.divf %162, %163 : vector<8x8x1xf32>
    %165 = vector.broadcast %164 : vector<8x8x1xf32> to vector<8x8x32xf32>
    %166 = arith.subf %156, %165 : vector<8x8x32xf32>
    %167 = arith.mulf %166, %166 : vector<8x8x32xf32>
    %cst_61 = arith.constant dense<0.000000e+00> : vector<8x8xf32>
    %168 = vector.multi_reduction <add>, %167, %cst_61 [2] : vector<8x8x32xf32> to vector<8x8xf32>
    %169 = vector.shape_cast %168 : vector<8x8xf32> to vector<8x8x1xf32>
    %cst_62 = arith.constant 3.200000e+01 : f32
    %170 = vector.broadcast %cst_62 : f32 to vector<8x8x1xf32>
    %171 = arith.divf %169, %170 : vector<8x8x1xf32>
    %cst_63 = arith.constant 9.99999974E-6 : f32
    %172 = vector.broadcast %cst_63 : f32 to vector<8x8x1xf32>
    %173 = arith.addf %171, %172 : vector<8x8x1xf32>
    %174 = math.rsqrt %173 : vector<8x8x1xf32>
    %175 = vector.broadcast %174 : vector<8x8x1xf32> to vector<8x8x32xf32>
    %176 = arith.mulf %166, %175 : vector<8x8x32xf32>
    %177 = vector.shape_cast %158 : vector<1x32xf32> to vector<1x1x32xf32>
    %178 = vector.broadcast %177 : vector<1x1x32xf32> to vector<8x8x32xf32>
    %179 = arith.mulf %176, %178 : vector<8x8x32xf32>
    %180 = vector.shape_cast %160 : vector<1x32xf32> to vector<1x1x32xf32>
    %181 = vector.broadcast %180 : vector<1x1x32xf32> to vector<8x8x32xf32>
    %182 = arith.addf %179, %181 : vector<8x8x32xf32>
    %183 = vector.shape_cast %182 : vector<8x8x32xf32> to vector<64x32xf32>
    %184 = arith.truncf %183 : vector<64x32xf32> to vector<64x32xbf16>
    %c0_64 = arith.constant 0 : index
    %c0_65 = arith.constant 0 : index
    %c0_66 = arith.constant 0 : index
    %185 = vector.load %arg15[%c0_64, %c0_65, %c0_66] : memref<1x32x128xbf16, #tpu.memory_space<vmem>>, vector<1x32x128xbf16>
    %186 = vector.shape_cast %185 : vector<1x32x128xbf16> to vector<32x128xbf16>
    %cst_67 = arith.constant dense<0.000000e+00> : vector<64x128xf32>
    %187 = tpu.matmul %184, %186, %cst_67 {dimension_numbers = #tpu.dot_dimension_numbers<[1], [0], [0], [1], [0, 0, 1, 1], [], []>} : vector<64x32xbf16>, vector<32x128xbf16>, vector<64x128xf32> -> vector<64x128xf32>
    %c0_68 = arith.constant 0 : index
    %c0_69 = arith.constant 0 : index
    %c0_70 = arith.constant 0 : index
    %188 = vector.load %arg16[%c0_68, %c0_69, %c0_70] : memref<1x1x128xf32, #tpu.memory_space<vmem>>, vector<1x1x128xf32>
    %189 = vector.shape_cast %188 : vector<1x1x128xf32> to vector<1x128xf32>
    %190 = vector.broadcast %189 : vector<1x128xf32> to vector<64x128xf32>
    %191 = arith.addf %187, %190 : vector<64x128xf32>
    %cst_71 = arith.constant 5.000000e-01 : f32
    %192 = vector.broadcast %cst_71 : f32 to vector<64x128xf32>
    %193 = arith.mulf %192, %191 : vector<64x128xf32>
    %cst_72 = arith.constant 4.471500e-02 : f32
    %194 = vector.broadcast %cst_72 : f32 to vector<64x128xf32>
    %195 = arith.mulf %194, %191 : vector<64x128xf32>
    %196 = arith.mulf %195, %191 : vector<64x128xf32>
    %197 = arith.mulf %196, %191 : vector<64x128xf32>
    %198 = arith.addf %191, %197 : vector<64x128xf32>
    %cst_73 = arith.constant 0.797884583 : f32
    %199 = vector.broadcast %cst_73 : f32 to vector<64x128xf32>
    %200 = arith.mulf %199, %198 : vector<64x128xf32>
    %201 = math.tanh %200 : vector<64x128xf32>
    %cst_74 = arith.constant 1.000000e+00 : f32
    %202 = vector.broadcast %cst_74 : f32 to vector<64x128xf32>
    %203 = arith.addf %202, %201 : vector<64x128xf32>
    %204 = arith.mulf %193, %203 : vector<64x128xf32>
    %205 = arith.truncf %204 : vector<64x128xf32> to vector<64x128xbf16>
    %c0_75 = arith.constant 0 : index
    %c0_76 = arith.constant 0 : index
    %c0_77 = arith.constant 0 : index
    %206 = vector.load %arg17[%c0_75, %c0_76, %c0_77] : memref<1x128x32xbf16, #tpu.memory_space<vmem>>, vector<1x128x32xbf16>
    %207 = vector.shape_cast %206 : vector<1x128x32xbf16> to vector<128x32xbf16>
    %cst_78 = arith.constant dense<0.000000e+00> : vector<64x32xf32>
    %208 = tpu.matmul %205, %207, %cst_78 {dimension_numbers = #tpu.dot_dimension_numbers<[1], [0], [0], [1], [0, 0, 1, 1], [], []>} : vector<64x128xbf16>, vector<128x32xbf16>, vector<64x32xf32> -> vector<64x32xf32>
    %209 = vector.shape_cast %208 : vector<64x32xf32> to vector<8x8x32xf32>
    %210 = arith.addf %156, %209 : vector<8x8x32xf32>
    %c0_79 = arith.constant 0 : index
    %c0_80 = arith.constant 0 : index
    %c0_81 = arith.constant 0 : index
    %211 = vector.load %arg18[%c0_79, %c0_80, %c0_81] : memref<1x1x32xf32, #tpu.memory_space<vmem>>, vector<1x1x32xf32>
    %212 = vector.shape_cast %211 : vector<1x1x32xf32> to vector<1x32xf32>
    %213 = vector.shape_cast %212 : vector<1x32xf32> to vector<1x1x32xf32>
    %214 = vector.broadcast %213 : vector<1x1x32xf32> to vector<8x8x32xf32>
    %215 = arith.addf %210, %214 : vector<8x8x32xf32>
    %c0_82 = arith.constant 0 : index
    %c0_83 = arith.constant 0 : index
    %c0_84 = arith.constant 0 : index
    %216 = vector.load %arg22[%c0_82, %c0_83, %c0_84] : memref<8x8x32xf32, #tpu.memory_space<vmem>>, vector<8x8x32xf32>
    tpu.vector_store %arg22[%c0_82, %c0_83, %c0_84], %215 {strides = array<i32>} : memref<8x8x32xf32, #tpu.memory_space<vmem>>, vector<8x8x32xf32>,
    %c1_i32 = arith.constant 1 : i32
    %217 = arith.cmpi eq, %arg1, %c1_i32 : i32
    %218 = arith.extui %217 : i1 to i32
    %c0_i32_85 = arith.constant 0 : i32
    %219 = arith.cmpi ne, %218, %c0_i32_85 : i32
    scf.if %219 {
      %220 = vector.extract_strided_slice %215 {offsets = [0, 3, 0], sizes = [8, 1, 32], strides = [1, 1, 1]} : vector<8x8x32xf32> to vector<8x1x32xf32>
      %221 = vector.shape_cast %220 : vector<8x1x32xf32> to vector<8x32xf32>
      %222 = arith.truncf %221 : vector<8x32xf32> to vector<8x32xbf16>
      %c0_86 = arith.constant 0 : index
      %c0_87 = arith.constant 0 : index
      %223 = vector.load %arg19[%c0_86, %c0_87] : memref<32x128xbf16, #tpu.memory_space<vmem>>, vector<32x128xbf16>
      %cst_88 = arith.constant dense<0.000000e+00> : vector<8x128xf32>
      %224 = tpu.matmul %222, %223, %cst_88 {dimension_numbers = #tpu.dot_dimension_numbers<[1], [0], [0], [1], [0, 0, 1, 1], [], []>} : vector<8x32xbf16>, vector<32x128xbf16>, vector<8x128xf32> -> vector<8x128xf32>
      %c0_89 = arith.constant 0 : index
      %c0_90 = arith.constant 0 : index
      %225 = vector.load %arg20[%c0_89, %c0_90] : memref<1x128xf32, #tpu.memory_space<vmem>>, vector<1x128xf32>
      %226 = vector.broadcast %225 : vector<1x128xf32> to vector<8x128xf32>
      %227 = arith.addf %224, %226 : vector<8x128xf32>
      %c0_91 = arith.constant 0 : index
      %c0_92 = arith.constant 0 : index
      %228 = vector.load %arg21[%c0_91, %c0_92] : memref<8x128xf32, #tpu.memory_space<vmem>>, vector<8x128xf32>
      tpu.vector_store %arg21[%c0_91, %c0_92], %227 {strides = array<i32>} : memref<8x128xf32, #tpu.memory_space<vmem>>, vector<8x128xf32>,
    } else {
    }
    return
  }
  func.func @transform_0(%arg0: i32, %arg1: i32) -> (i32, i32, i32) {
    %c0_i32 = arith.constant 0 : i32
    %c0_i32_0 = arith.constant 0 : i32
    %c0_i32_1 = arith.constant 0 : i32
    return %arg0, %c0_i32, %c0_i32_0 : i32, i32, i32
  }
  func.func @transform_1(%arg0: i32, %arg1: i32) -> (i32, i32) {
    %c0_i32 = arith.constant 0 : i32
    %c0_i32_0 = arith.constant 0 : i32
    %c0_i32_1 = arith.constant 0 : i32
    return %c0_i32, %c0_i32_0 : i32, i32
  }
  func.func @transform_2(%arg0: i32, %arg1: i32) -> (i32, i32) {
    %c0_i32 = arith.constant 0 : i32
    %c0_i32_0 = arith.constant 0 : i32
    %c0_i32_1 = arith.constant 0 : i32
    return %c0_i32, %c0_i32_0 : i32, i32
  }
  func.func @transform_3(%arg0: i32, %arg1: i32) -> (i32, i32) {
    %c0_i32 = arith.constant 0 : i32
    %c0_i32_0 = arith.constant 0 : i32
    %c0_i32_1 = arith.constant 0 : i32
    return %c0_i32, %c0_i32_0 : i32, i32
  }
  func.func @transform_4(%arg0: i32, %arg1: i32) -> (i32, i32) {
    %c0_i32 = arith.constant 0 : i32
    %c0_i32_0 = arith.constant 0 : i32
    %c0_i32_1 = arith.constant 0 : i32
    return %c0_i32, %c0_i32_0 : i32, i32
  }
  func.func @transform_5(%arg0: i32, %arg1: i32) -> (i32, i32, i32) {
    %c0_i32 = arith.constant 0 : i32
    %c0_i32_0 = arith.constant 0 : i32
    %c0_i32_1 = arith.constant 0 : i32
    return %arg1, %c0_i32, %c0_i32_0 : i32, i32, i32
  }
  func.func @transform_6(%arg0: i32, %arg1: i32) -> (i32, i32, i32) {
    %c0_i32 = arith.constant 0 : i32
    %c0_i32_0 = arith.constant 0 : i32
    %c0_i32_1 = arith.constant 0 : i32
    return %arg1, %c0_i32, %c0_i32_0 : i32, i32, i32
  }
  func.func @transform_7(%arg0: i32, %arg1: i32) -> (i32, i32, i32) {
    %c0_i32 = arith.constant 0 : i32
    %c0_i32_0 = arith.constant 0 : i32
    %c0_i32_1 = arith.constant 0 : i32
    return %arg1, %c0_i32, %c0_i32_0 : i32, i32, i32
  }
  func.func @transform_8(%arg0: i32, %arg1: i32) -> (i32, i32, i32) {
    %c0_i32 = arith.constant 0 : i32
    %c0_i32_0 = arith.constant 0 : i32
    %c0_i32_1 = arith.constant 0 : i32
    return %arg1, %c0_i32, %c0_i32_0 : i32, i32, i32
  }
  func.func @transform_9(%arg0: i32, %arg1: i32) -> (i32, i32, i32) {
    %c0_i32 = arith.constant 0 : i32
    %c0_i32_0 = arith.constant 0 : i32
    %c0_i32_1 = arith.constant 0 : i32
    return %arg1, %c0_i32, %c0_i32_0 : i32, i32, i32
  }
  func.func @transform_10(%arg0: i32, %arg1: i32) -> (i32, i32, i32) {
    %c0_i32 = arith.constant 0 : i32
    %c0_i32_0 = arith.constant 0 : i32
    %c0_i32_1 = arith.constant 0 : i32
    return %arg1, %c0_i32, %c0_i32_0 : i32, i32, i32
  }
  func.func @transform_11(%arg0: i32, %arg1: i32) -> (i32, i32, i32) {
    %c0_i32 = arith.constant 0 : i32
    %c0_i32_0 = arith.constant 0 : i32
    %c0_i32_1 = arith.constant 0 : i32
    return %arg1, %c0_i32, %c0_i32_0 : i32, i32, i32
  }
  func.func @transform_12(%arg0: i32, %arg1: i32) -> (i32, i32, i32) {
    %c0_i32 = arith.constant 0 : i32
    %c0_i32_0 = arith.constant 0 : i32
    %c0_i32_1 = arith.constant 0 : i32
    return %arg1, %c0_i32, %c0_i32_0 : i32, i32, i32
  }
  func.func @transform_13(%arg0: i32, %arg1: i32) -> (i32, i32, i32) {
    %c0_i32 = arith.constant 0 : i32
    %c0_i32_0 = arith.constant 0 : i32
    %c0_i32_1 = arith.constant 0 : i32
    return %arg1, %c0_i32, %c0_i32_0 : i32, i32, i32
  }
  func.func @transform_14(%arg0: i32, %arg1: i32) -> (i32, i32, i32) {
    %c0_i32 = arith.constant 0 : i32
    %c0_i32_0 = arith.constant 0 : i32
    %c0_i32_1 = arith.constant 0 : i32
    return %arg1, %c0_i32, %c0_i32_0 : i32, i32, i32
  }
  func.func @transform_15(%arg0: i32, %arg1: i32) -> (i32, i32, i32) {
    %c0_i32 = arith.constant 0 : i32
    %c0_i32_0 = arith.constant 0 : i32
    %c0_i32_1 = arith.constant 0 : i32
    return %arg1, %c0_i32, %c0_i32_0 : i32, i32, i32
  }
  func.func @transform_16(%arg0: i32, %arg1: i32) -> (i32, i32, i32) {
    %c0_i32 = arith.constant 0 : i32
    %c0_i32_0 = arith.constant 0 : i32
    %c0_i32_1 = arith.constant 0 : i32
    return %arg1, %c0_i32, %c0_i32_0 : i32, i32, i32
  }
  func.func @transform_17(%arg0: i32, %arg1: i32) -> (i32, i32) {
    %c0_i32 = arith.constant 0 : i32
    %c0_i32_0 = arith.constant 0 : i32
    %c0_i32_1 = arith.constant 0 : i32
    return %c0_i32, %c0_i32_0 : i32, i32
  }
  func.func @transform_18(%arg0: i32, %arg1: i32) -> (i32, i32) {
    %c0_i32 = arith.constant 0 : i32
    %c0_i32_0 = arith.constant 0 : i32
    %c0_i32_1 = arith.constant 0 : i32
    return %c0_i32, %c0_i32_0 : i32, i32
  }
  func.func @transform_19(%arg0: i32, %arg1: i32) -> (i32, i32) {
    %c0_i32 = arith.constant 0 : i32
    %c0_i32_0 = arith.constant 0 : i32
    return %arg0, %c0_i32 : i32, i32
  }
}

</mosaic_0001>

<bundles_post_ra>
// kernel: bert_forward.1
= control target key start
LH: loop header
LB: loop body
LE: loop exit
PB: predicated region body
PF: predicated region fallthrough
CT: control target
= control target key end

     0   :  { %s7278_s30 = smov 0   ;;  %s7280_s20 = smov 0   ;;  %s8665_s0 = inlined_call_operand.vmem [shape: f32[16,8,4], index: 0, kind: input, shape index: {}]   ;;  %s8666_s1 = inlined_call_operand.vmem [shape: f32[1,8], index: 1, kind: input, shape index: {}]   ;;  %s8667_s2 = inlined_call_operand.vmem [shape: f32[4,32], index: 2, kind: input, shape index: {}]   ;;  %s8668_s3 = inlined_call_operand.vmem [shape: f32[1,32], index: 3, kind: input, shape index: {}]   ;;  %s8669_s4 = inlined_call_operand.vmem [shape: f32[8,32], index: 4, kind: input, shape index: {}]   ;;  %s8670_s5 = inlined_call_operand.vmem [shape: f32[2,1,32], index: 5, kind: input, shape index: {}]   ;;  %s8671_s6 = inlined_call_operand.vmem [shape: f32[2,1,32], index: 6, kind: input, shape index: {}]   ;;  %s8672_s7 = inlined_call_operand.vmem [shape: bf16[2,32,128], index: 7, kind: input, shape index: {}]   ;;  %s8673_s8 = inlined_call_operand.vmem [shape: f32[2,1,128], index: 8, kind: input, shape index: {}]   ;;  %s8674_s9 = inlined_call_operand.vmem [shape: f32[2,32,32], index: 9, kind: input, shape index: {}]   ;;  %s8675_s10 = inlined_call_operand.vmem [shape: f32[2,1,32], index: 10, kind: input, shape index: {}]   ;;  %s8676_s11 = inlined_call_operand.vmem [shape: f32[2,1,32], index: 11, kind: input, shape index: {}]   ;;  %s8677_s12 = inlined_call_operand.vmem [shape: f32[2,1,32], index: 12, kind: input, shape index: {}]   ;;  %s8678_s13 = inlined_call_operand.vmem [shape: bf16[2,32,128], index: 13, kind: input, shape index: {}]   ;;  %s8679_s14 = inlined_call_operand.vmem [shape: f32[2,1,128], index: 14, kind: input, shape index: {}]   ;;  %s8680_s15 = inlined_call_operand.vmem [shape: bf16[2,128,32], index: 15, kind: input, shape index: {}]   ;;  %s8681_s16 = inlined_call_operand.vmem [shape: f32[2,1,32], index: 16, kind: input, shape index: {}]   ;;  %s8682_s17 = inlined_call_operand.vmem [shape: bf16[32,128], index: 17, kind: input, shape index: {}]   ;;  %s8683_s18 = inlined_call_operand.vmem [shape: f32[1,128], index: 18, kind: input, shape index: {}]   ;;  %s8684_s19 = inlined_call_operand.vmem [shape: f32[16,128], index: 19, kind: output, shape index: {}]  }
   0x1   :  { %8691 = sst [smem:[#allocation9_spill]] %s8665_s0  ;;  %s7276_s0 = smov 0  }
   0x2   :  { %8692 = sst [smem:[#allocation10_spill]] %s8666_s1  ;;  %s7282_s21 = smov 0  }
   0x3   :  { %8693 = sst [smem:[#allocation11_spill]] %s8667_s2  ;;  %s7284_s1 = smov 0  }
   0x4   :  { %8694 = sst [smem:[#allocation12_spill]] %s8668_s3 }
   0x5   :  { %8695 = sst [smem:[#allocation13_spill]] %s8669_s4 }
   0x6   :  { %8696 = sst [smem:[#allocation14_spill]] %s8670_s5 }
   0x7   :  { %8697 = sst [smem:[#allocation15_spill]] %s8671_s6 }
   0x8   :  { %8698 = sst [smem:[#allocation16_spill]] %s8672_s7 }
   0x9   :  { %8699 = sst [smem:[#allocation17_spill]] %s8674_s9 }
   0xa   :  { %8700 = sst [smem:[#allocation18_spill]] %s8682_s17 }
   0xb   :  { %8701 = sst [smem:[#allocation19_spill]] %s8683_s18 }
   0xc LB: > { %8702 = sst [smem:[#allocation3_spill]] %s7139_s0  ;;  %s38_s22 = sadd.s32 1, %s7147_s20  ;;  %s7155_s1 = sphi %s7284_s1, %s29_s1   ;;  %s7151_s21 = sphi %s7282_s21, %s8732_s21   ;;  %s7147_s20 = sphi %s7280_s20, %s8731_s20   ;;  %s7143_s30 = sphi %s7278_s30, %s8730_s30   ;;  %s7139_s0 = sphi %s7276_s0, %s8729_s0  }
   0xd   : > { %8703 = sst [smem:[#allocation4_spill]] %s7147_s20  ;;  %s41_s2 = sadd.s32 1, %s7151_s21 }
   0xe   : > { %8704 = sst [smem:[#allocation5_spill]] %s7151_s21  ;;  %p39_p0 = scmp.ge.s32.totalorder %s38_s22, 2 }
   0xf   : > { %8705 = sst [smem:[#allocation6_spill]] %s7155_s1  ;;  %p6058_p1 = scmp.ge.s32.totalorder %s7155_s1, 1 }
  0x10   : > { %p654_p2 = scmp.lt.s32.totalorder %s7155_s1, 5  ;;  %s8734_s22 = smov (%p39_p0, %s38_s22), 0 }
  0x11   : > { %8706 = sst [smem:[#allocation7_spill]] %s8734_s22  ;;  %s8736_s2 = smov (!%p39_p0, %s41_s2), %s7151_s21 }
  0x12   : > { %p655_p3 = pnand %p6058_p1, %p654_p2  ;;  %p43_p4 = scmp.ge.s32.totalorder %s8736_s2, 2 }
  0x13   : > { %s6059_s23 = sshll.u32 (!%p655_p3), %s7143_s30, 3  ;;  %p759_p5 = scmp.lt.s32.totalorder (!%p655_p3), %s7139_s0, 1 }
  0x14   : > { %s8738_s2 = smov (%p43_p4, %s8736_s2), 0  ;;  %658 = sbr.rel (%p655_p3) target bundleno = 5028 (0x13a4), region = 96 }
  0x15   : > { %8707 = sst [smem:[#allocation8_spill]] %s8738_s2  ;;  %p754_p6 = scmp.lt.s32.totalorder (!%p655_p3), %s6059_s23, 15 }
  0x16   : > { %p803_p7 = scmp.lt.s32.totalorder (!%p655_p3), %s7143_s30, 1  ;;  %s8710_s1 = sld [smem:[#allocation9_spill]] (!%p655_p3) }
  0x17   : > { %s8711_s7 = sld [smem:[#allocation16_spill]] (!%p655_p3) }
  0x18   : > { %s8712_s9 = sld [smem:[#allocation17_spill]] (!%p655_p3) }
  0x19   : > { %s7314_s24 = scalar_select %p759_p5, %s7139_s0, 1 }
  0x1a   : > { %s8740_s23 = smov (!%p754_p6, %s6059_s23), 15  ;;  %s8742_s30 = smov (!%p803_p7, %s7143_s30), 1 }
  0x1b   : > { %s6060_s2 = sshll.u32 %s8740_s23, 3  ;;  %s6188_s22 = sshll.u32 %s7314_s24, 4 }
  0x1c   : > { %s7328_s18 = scalar_lea.vmem %s8710_s1, %s6060_s2  ;;  %s6189_s27 = sshll.u32 %s7314_s24, 5 }
  0x1d   : > { %s7333_s0 = scalar_lea.vmem %s8711_s7, %s6188_s22  ;;  %s786_s7 = scalar_lea.vmem %s8677_s12, %s7314_s24 }
  0x1e   : > { %s7343_s23 = scalar_lea.vmem %s8712_s9, %s6189_s27  ;;  %s7360_s26 = scalar_lea.vmem %s8678_s13, %s6188_s22 }
  0x1f   : > { %s794_s28 = scalar_lea.vmem %s8679_s14, %s7314_s24  ;;  %s6191_s9 = sshll.u32 %s7314_s24, 6 }
  0x20   : > { %s802_s20 = scalar_lea.vmem %s8681_s16, %s7314_s24  ;;  %s7374_s4 = scalar_lea.vmem %s8680_s15, %s6191_s9 }
  0x21   : > { %s6069_s17 = sshll.u32 %s8742_s30, 3  ;;  %s8713_s3 = sld [smem:[#allocation3_spill]] }
  0x22   : > { %s7382_s25 = scalar_lea.vmem %s8684_s19, %s6069_s17 }
  0x27   : > { %p6070_p8 = scmp.ne.s32.totalorder %s8713_s3, 0 }
  0x28   : > { %s8714_s30 = sld [smem:[#allocation11_spill]] (!%p6070_p8) }
  0x29   : > { %811 = sbr.rel (%p6070_p8) target bundleno = 244 (0xf4), region = 100  ;;  %s8715_s5 = sld [smem:[#allocation12_spill]] (!%p6070_p8) }
  0x2a   : > { %s8716_s1 = sld [smem:[#allocation13_spill]] (!%p6070_p8) }
  0x2e   : > { %v814_v0 = vld [vmem:[%s7328_s18 + $0x10] sm:$0xff]  ;;  %v812_v1 = vld [vmem:[%s7328_s18] sm:$0xff]  ;;  %v7157_v2 = vmov 0   ;;  %v815_v3 = vld [vmem:[%s7328_s18 + $0x18] sm:$0xff]  ;;  %v7158_v9 = vmov 1   ;;  %v7159_v10 = vmov 2   ;;  %v870_v26 = vlaneseq }
  0x2f   : > { %6911 = vset.pattern.permute.xlu1 %v7157_v2  ;;  %6910 = vset.pattern.permute.xlu0 %v7157_v2  ;;  %v813_v4 = vld [vmem:[%s7328_s18 + $0x8] sm:$0xff]  ;;  %v816_v6 = vld [vmem:[%s7328_s18 + $0x20] sm:$0xff]  ;;  %v819_v7 = vld [vmem:[%s7328_s18 + $0x38] sm:$0xff]  ;;  %v7160_v11 = vmov 3   ;;  %vm1046_vm0 = vcmask 261120  }
  0x30   : > { %842 = vperm.xlu1 %6911, %v814_v0   ;;  %832 = vperm.xlu0 %6910, %v812_v1   ;;  %v817_v5 = vld [vmem:[%s7328_s18 + $0x28] sm:$0xff]  ;;  %v818_v8 = vld [vmem:[%s7328_s18 + $0x30] sm:$0xff]  ;;  %v871_v29 = vshrl.u32 %v870_v26, 7  ;;  %v820_v34 = vld [vmem:[%s8714_s30] sm:$0xf] }
  0x31   : > { %v6071_v40 = vld [vmem:[%s8715_s5] ss:$0 sm:$0xff] }
  0x32   : > { %v872_v30 = vsub.s32 0, %v871_v29  ;;  %v924_v31 = vsub.s32 1, %v871_v29  ;;  %v976_v35 = vsub.s32 2, %v871_v29  ;;  %v822_v41 = vld [vmem:[%s8716_s1] sm:$0xff]  ;;  %v1028_v44 = vsub.s32 3, %v871_v29 }
  0x33   : > { %v7419_v45 = vadd.f32 %v6071_v40, %v822_v41 }
  0x34   : > { %847 = vperm.xlu1 %6911, %v815_v3   ;;  %837 = vperm.xlu0 %6910, %v813_v4   ;;  %v7404_v36 = vrot.slane %v820_v34, %v872_v30  ;;  %v7406_v37 = vrot.slane %v820_v34, %v924_v31  ;;  %v7417_v43 = vrot.slane %v820_v34, %v976_v35 }
  0x35   : > { %v7427_v52 = vrot.slane %v820_v34, %v1028_v44 }
  0x38   : > { %857 = vperm.xlu1 %6911, %v817_v5   ;;  %852 = vperm.xlu0 %6910, %v816_v6  }
  0x3c   : > { %867 = vperm.xlu1 %6911, %v819_v7   ;;  %862 = vperm.xlu0 %6910, %v818_v8  }
  0x40   : > { %6913 = vset.pattern.permute.xlu1 %v7158_v9  ;;  %6912 = vset.pattern.permute.xlu0 %v7158_v9 }
  0x41   : > { %895 = vperm.xlu1 %6913, %v813_v4   ;;  %891 = vperm.xlu0 %6912, %v812_v1  }
  0x45   : > { %899 = vperm.xlu1 %6913, %v814_v0   ;;  %903 = vperm.xlu0 %6912, %v815_v3  }
  0x49   : > { %907 = vperm.xlu1 %6913, %v816_v6   ;;  %911 = vperm.xlu0 %6912, %v817_v5  }
  0x4d   : > { %915 = vperm.xlu1 %6913, %v818_v8   ;;  %919 = vperm.xlu0 %6912, %v819_v7  }
  0x51   : > { %6914 = vset.pattern.permute.xlu1 %v7159_v10  ;;  %6915 = vset.pattern.permute.xlu0 %v7159_v10 }
  0x52   : > { %943 = vperm.xlu1 %6914, %v812_v1   ;;  %947 = vperm.xlu0 %6915, %v813_v4  }
  0x56   : > { %951 = vperm.xlu1 %6914, %v814_v0   ;;  %959 = vperm.xlu0 %6915, %v816_v6  }
  0x5a   : > { %955 = vperm.xlu1 %6914, %v815_v3   ;;  %967 = vperm.xlu0 %6915, %v818_v8  }
  0x5e   : > { %963 = vperm.xlu1 %6914, %v817_v5   ;;  %6916 = vset.pattern.permute.xlu0 %v7160_v11 }
  0x5f   : > { %995 = vperm.xlu0 %6916, %v812_v1  }
  0x62   : > { %971 = vperm.xlu1 %6914, %v819_v7  }
  0x63   : > { %1007 = vperm.xlu0 %6916, %v815_v3  }
  0x66   : > { %6917 = vset.pattern.permute.xlu1 %v7160_v11 }
  0x67   : > { %999 = vperm.xlu1 %6917, %v813_v4   ;;  %1015 = vperm.xlu0 %6916, %v817_v5  }
  0x6b   : > { %1003 = vperm.xlu1 %6917, %v814_v0   ;;  %1023 = vperm.xlu0 %6916, %v819_v7  }
  0x6f   : > { %1011 = vperm.xlu1 %6917, %v816_v6  }
  0x73   : > { %1019 = vperm.xlu1 %6917, %v818_v8  }
  0xab   : > { %v843_v12 = vpop.permute.xlu1 %842  ;;  %v833_v13 = vpop.permute.xlu0 %832 }
  0xac   : > { %v874_v42 = vmul.f32 %v7404_v36, %v833_v13  ;;  %v876_v0 = vmul.f32 %v7404_v36, %v843_v12 }
  0xae   : > { %v882_v50 = vadd.f32 %v874_v42, %v7419_v45 }
  0xaf   : > { %v848_v14 = vpop.permute.xlu1 %847  ;;  %v838_v15 = vpop.permute.xlu0 %837 }
  0xb0   : > { %v877_v49 = vmul.f32 %v7404_v36, %v848_v14  ;;  %v875_v57 = vmul.f32 %v7404_v36, %v838_v15  ;;  %v884_v15 = vadd.f32 %v876_v0, %v7419_v45 }
  0xb2   : > { %v885_v56 = vadd.f32 %v877_v49, %v7419_v45  ;;  %v883_v5 = vadd.f32 %v875_v57, %v7419_v45 }
  0xb3   : > { %v858_v16 = vpop.permute.xlu1 %857  ;;  %v7393_v17 = vpop.permute.xlu0 %852 }
  0xb4   : > { %v879_v59 = vmul.f32 %v7404_v36, %v858_v16 }
  0xb6   : > { %v887_v9 = vadd.f32 %v879_v59, %v7419_v45 }
  0xb7   : > { %v868_v18 = vpop.permute.xlu1 %867  ;;  %v7395_v19 = vpop.permute.xlu0 %862 }
  0xb8   : > { %v881_v6 = vmul.f32 %v7404_v36, %v868_v18  ;;  %v880_v41 = vmul.f32 %v7404_v36, %v7395_v19 }
  0xbc   : > { %v896_v20 = vpop.permute.xlu1 %895  ;;  %v892_v21 = vpop.permute.xlu0 %891 }
  0xbd   : > { %v926_v46 = vmul.f32 %v7406_v37, %v892_v21  ;;  %v927_v63 = vmul.f32 %v7406_v37, %v896_v20  ;;  %v878_v21 = vmul.f32 %v7404_v36, %v7393_v17 }
  0xbf   : > { %v934_v53 = vadd.f32 %v926_v46, %v882_v50  ;;  %v935_v13 = vadd.f32 %v927_v63, %v883_v5 }
  0xc0   : > { %v900_v22 = vpop.permute.xlu1 %899  ;;  %v904_v23 = vpop.permute.xlu0 %903 }
  0xc1   : > { %v929_v54 = vmul.f32 %v7406_v37, %v904_v23  ;;  %v928_v14 = vmul.f32 %v7406_v37, %v900_v22  ;;  %v889_v23 = vadd.f32 %v881_v6, %v7419_v45 }
  0xc3   : > { %v937_v1 = vadd.f32 %v929_v54, %v885_v56 }
  0xc4   : > { %v7397_v24 = vpop.permute.xlu1 %907  ;;  %v912_v25 = vpop.permute.xlu0 %911 }
  0xc5   : > { %v931_v2 = vmul.f32 %v7406_v37, %v912_v25  ;;  %v930_v17 = vmul.f32 %v7406_v37, %v7397_v24 }
  0xc7   : > { %v939_v16 = vadd.f32 %v931_v2, %v887_v9 }
  0xc8   : > { %v7399_v27 = vpop.permute.xlu1 %915  ;;  %v920_v28 = vpop.permute.xlu0 %919 }
  0xc9   : > { %v933_v18 = vmul.f32 %v7406_v37, %v920_v28 }
  0xcb   : > { %v941_v34 = vadd.f32 %v933_v18, %v889_v23 }
  0xcd   : > { %v944_v32 = vpop.permute.xlu1 %943  ;;  %v948_v33 = vpop.permute.xlu0 %947 }
  0xce   : > { %v978_v51 = vmul.f32 %v7417_v43, %v944_v32  ;;  %v979_v7 = vmul.f32 %v7417_v43, %v948_v33  ;;  %v936_v33 = vadd.f32 %v928_v14, %v884_v15 }
  0xd0   : > { %v986_v60 = vadd.f32 %v978_v51, %v934_v53  ;;  %v987_v25 = vadd.f32 %v979_v7, %v935_v13  ;;  %v932_v53 = vmul.f32 %v7406_v37, %v7399_v27 }
  0xd1   : > { %v952_v38 = vpop.permute.xlu1 %951  ;;  %v7408_v39 = vpop.permute.xlu0 %959 }
  0xd2   : > { %v980_v26 = vmul.f32 %v7417_v43, %v952_v38  ;;  %v886_v38 = vadd.f32 %v878_v21, %v7419_v45  ;;  %v982_v42 = vmul.f32 %v7417_v43, %v7408_v39  ;;  %v888_v39 = vadd.f32 %v880_v41, %v7419_v45 }
  0xd4   : > { %v938_v51 = vadd.f32 %v930_v17, %v886_v38 }
  0xd5   : > { %v956_v47 = vpop.permute.xlu1 %955  ;;  %v7422_v48 = vpop.permute.xlu0 %967 }
  0xd6   : > { %v981_v61 = vmul.f32 %v7417_v43, %v956_v47  ;;  %v988_v47 = vadd.f32 %v980_v26, %v936_v33  ;;  %v984_v56 = vmul.f32 %v7417_v43, %v7422_v48 }
  0xd8   : > { %v989_v10 = vadd.f32 %v981_v61, %v937_v1 }
  0xd9   : > { %v964_v55 = vpop.permute.xlu1 %963 }
  0xda   : > { %v996_v58 = vpop.permute.xlu0 %995  ;;  %v983_v11 = vmul.f32 %v7417_v43, %v964_v55  ;;  %v990_v55 = vadd.f32 %v982_v42, %v938_v51 }
  0xdb   : > { %v1030_v62 = vmul.f32 %v7427_v52, %v996_v58  ;;  %v940_v58 = vadd.f32 %v932_v53, %v888_v39 }
  0xdc   : > { %v991_v31 = vadd.f32 %v983_v11, %v939_v16 }
  0xdd   : > { %v1038_v3 = vadd.f32 %v1030_v62, %v986_v60  ;;  %v972_v4 = vpop.permute.xlu1 %971  ;;  %v992_v61 = vadd.f32 %v984_v56, %v940_v58 }
  0xde   : > { %v1008_v8 = vpop.permute.xlu0 %1007  ;;  %v985_v32 = vmul.f32 %v7417_v43, %v972_v4 }
  0xdf   : > { %1047 = vst.msk [vmem:[#allocation2] sm:$0xff] %vm1046_vm0, %v1038_v3  ;;  %v1033_v12 = vmul.f32 %v7427_v52, %v1008_v8 }
  0xe0   : > { %v993_v49 = vadd.f32 %v985_v32, %v941_v34 }
  0xe1   : > { %v1041_v20 = vadd.f32 %v1033_v12, %v989_v10 }
  0xe2   : > { %v1000_v29 = vpop.permute.xlu1 %999  ;;  %v1016_v30 = vpop.permute.xlu0 %1015 }
  0xe3   : > { %1050 = vst.msk [vmem:[#allocation2 + $0x18] sm:$0xff] %vm1046_vm0, %v1041_v20  ;;  %v1031_v22 = vmul.f32 %v7427_v52, %v1000_v29  ;;  %v1035_v28 = vmul.f32 %v7427_v52, %v1016_v30 }
  0xe5   : > { %v1039_v35 = vadd.f32 %v1031_v22, %v987_v25  ;;  %v1043_v40 = vadd.f32 %v1035_v28, %v991_v31 }
  0xe6   : > { %v1004_v44 = vpop.permute.xlu1 %1003  ;;  %v1024_v46 = vpop.permute.xlu0 %1023 }
  0xe7   : > { %1048 = vst.msk [vmem:[#allocation2 + $0x8] sm:$0xff] %vm1046_vm0, %v1039_v35  ;;  %1052 = vst.msk [vmem:[#allocation2 + $0x28] sm:$0xff] %vm1046_vm0, %v1043_v40  ;;  %v1032_v24 = vmul.f32 %v7427_v52, %v1004_v44  ;;  %v1037_v50 = vmul.f32 %v7427_v52, %v1024_v46 }
  0xe9   : > { %v1040_v19 = vadd.f32 %v1032_v24, %v988_v47  ;;  %v1045_v36 = vadd.f32 %v1037_v50, %v993_v49 }
  0xea   : > { %v1012_v54 = vpop.permute.xlu1 %1011 }
  0xeb   : > { %1049 = vst.msk [vmem:[#allocation2 + $0x10] sm:$0xff] %vm1046_vm0, %v1040_v19  ;;  %1054 = vst.msk [vmem:[#allocation2 + $0x38] sm:$0xff] %vm1046_vm0, %v1045_v36  ;;  %v1034_v57 = vmul.f32 %v7427_v52, %v1012_v54 }
  0xed   : > { %v1042_v59 = vadd.f32 %v1034_v57, %v990_v55 }
  0xee   : > { %v1020_v60 = vpop.permute.xlu1 %1019 }
  0xef   : > { %1051 = vst.msk [vmem:[#allocation2 + $0x20] sm:$0xff] %vm1046_vm0, %v1042_v59  ;;  %v1036_v27 = vmul.f32 %v7427_v52, %v1020_v60 }
  0xf1   : > { %v1044_v37 = vadd.f32 %v1036_v27, %v992_v61 }
  0xf3   : > { %1053 = vst.msk [vmem:[#allocation2 + $0x30] sm:$0xff] %vm1046_vm0, %v1044_v37 }
  0xf4 PF: > { %v1055_v45 = vld [vmem:[#allocation2] sm:$0xff]  ;;  %vm1065_vm1 = vcmask 261120   ;;  %v1057_v43 = vld [vmem:[#allocation2 + $0x10] sm:$0xff]  ;;  %v1056_v48 = vld [vmem:[#allocation2 + $0x8] sm:$0xff]  ;;  %s8717_s2 = sld [smem:[#allocation14_spill]]  ;;  %s8721_s5 = scalar_lea.vmem %s8673_s8, %s7314_s24  ;;  %vm7162_vm2 = vmmov 0  }
  0xf5   : > { %v1066_v62 = vsel %vm1065_vm1, %v1055_v45, 0.0  ;;  %v1072_v63 = vsel %vm1065_vm1, %v1057_v43, 0.0  ;;  %v1058_v0 = vld [vmem:[#allocation2 + $0x18] sm:$0xff]  ;;  %v1060_v2 = vld [vmem:[#allocation2 + $0x28] sm:$0xff]  ;;  %v1069_v3 = vsel %vm1065_vm1, %v1056_v48, 0.0  ;;  %v6919_v57 = vld [vmem:[%s7333_s0] sm:$0xff]  }
  0xf6   : > { %v1059_v1 = vld [vmem:[#allocation2 + $0x20] sm:$0xff]  ;;  %1067 = vadd.xlane.f32.xlu0 %v1066_v62  ;;  %1073 = vadd.xlane.f32.xlu1 %v1072_v63  ;;  %v1075_v52 = vsel %vm1065_vm1, %v1058_v0, 0.0  ;;  %v1081_v5 = vsel %vm1065_vm1, %v1060_v2, 0.0  ;;  %v1062_v7 = vld [vmem:[#allocation2 + $0x38] sm:$0xff]  ;;  %v6918_v56 = vld [vmem:[%s7333_s0 + $0x8] sm:$0xff]   ;;  %s8719_s18 = sld [smem:[#allocation15_spill]]  ;;  %s8723_s0 = scalar_lea.vmem %s8675_s10, %s7314_s24 }
  0xf7   : > { %v1078_v4 = vsel %vm1065_vm1, %v1059_v1, 0.0  ;;  %v1087_v9 = vsel %vm1065_vm1, %v1062_v7, 0.0  ;;  %6367 = vmatprep.subr.bf16.mxu1 %v6918_v56  ;;  %s7163_s6 = smov 96   ;;  %s7164_s21 = smov 64   ;;  %vm1319_vm3 = vcmask 64512   ;;  %vm1832_vm4 = vcmask 1043456  }
  0xf8   : > { %6368 = vmatpush3.bf16.msra.mxu1 %v6918_v56  ;;  %s8722_s17 = sld [smem:[#allocation10_spill]]  ;;  %s7167_s3 = smov 56  }
  0xf9   : > { %6369 = vmatprep.subr.bf16.mxu1 %v6919_v57  ;;  %s7168_s9 = smov 80   ;;  %s7170_s27 = smov 48  }
  0xfa   : > { %1070 = vadd.xlane.f32.xlu0 %v1069_v3  ;;  %1076 = vadd.xlane.f32.xlu1 %v1075_v52  ;;  %v1061_v6 = vld [vmem:[#allocation2 + $0x30] sm:$0xff]  ;;  %s8718_s22 = scalar_lea.vmem %s8717_s2, %s7314_s24  ;;  %s7165_s2 = smov 88  }
  0xfb   : > { %v1084_v8 = vsel %vm1065_vm1, %v1061_v6, 0.0 }
  0xfc   : > { %6370 = vmatpush3.bf16.msra.mxu1 %v6919_v57  ;;  %s8720_s30 = scalar_lea.vmem %s8719_s18, %s7314_s24  ;;  %s7169_s18 = smov 112  }
  0xfe   : > { %1079 = vadd.xlane.f32.xlu0 %v1078_v4  ;;  %1082 = vadd.xlane.f32.xlu1 %v1081_v5 }
 0x102   : > { %1085 = vadd.xlane.f32.xlu0 %v1084_v8  ;;  %1088 = vadd.xlane.f32.xlu1 %v1087_v9 }
 0x17f   : > { %v1068_v10 = vpop.xlane.xlu0 %1067  ;;  %v1074_v11 = vpop.xlane.xlu1 %1073 }
 0x180   : > { %v1091_v12 = vmul.f32 0.03125, %v1068_v10  ;;  %v1093_v13 = vmul.f32 0.03125, %v1074_v11 }
 0x182   : > { %v7486_v14 = vsub.f32 %v1055_v45, %v1091_v12  ;;  %v7488_v15 = vsub.f32 %v1057_v43, %v1093_v13 }
 0x183   : > { %v1071_v16 = vpop.xlane.xlu0 %1070  ;;  %v1077_v18 = vpop.xlane.xlu1 %1076 }
 0x184   : > { %v1092_v20 = vmul.f32 0.03125, %v1071_v16  ;;  %v1094_v21 = vmul.f32 0.03125, %v1077_v18  ;;  %v1107_v23 = vmul.f32 %v7486_v14, %v7486_v14  ;;  %v1109_v25 = vmul.f32 %v7488_v15, %v7488_v15  ;;  %v6072_v16 = vld [vmem:[%s8718_s22] ss:$0 sm:$0xff]  ;;  %s7166_s22 = smov 120  }
 0x186   : > { %v7494_v26 = vsub.f32 %v1056_v48, %v1092_v20  ;;  %v7496_v29 = vsub.f32 %v1058_v0, %v1094_v21  ;;  %v1115_v30 = vsel %vm1065_vm1, %v1107_v23, 0.0  ;;  %v1121_v22 = vsel %vm1065_vm1, %v1109_v25, 0.0  ;;  %v6073_v25 = vld [vmem:[%s8720_s30] ss:$0 sm:$0xff] }
 0x187   : > { %1116 = vadd.xlane.f32.xlu0 %v1115_v30  ;;  %v1080_v31 = vpop.xlane.xlu0 %1079  ;;  %v1083_v32 = vpop.xlane.xlu1 %1082 }
 0x188   : > { %v1095_v28 = vmul.f32 0.03125, %v1080_v31  ;;  %v1096_v33 = vmul.f32 0.03125, %v1083_v32  ;;  %v1108_v17 = vmul.f32 %v7494_v26, %v7494_v26  ;;  %v1110_v34 = vmul.f32 %v7496_v29, %v7496_v29 }
 0x18a   : > { %v7504_v35 = vsub.f32 %v1059_v1, %v1095_v28  ;;  %v7506_v40 = vsub.f32 %v1060_v2, %v1096_v33  ;;  %v1118_v38 = vsel %vm1065_vm1, %v1108_v17, 0.0  ;;  %v1124_v44 = vsel %vm1065_vm1, %v1110_v34, 0.0 }
 0x18b   : > { %1122 = vadd.xlane.f32.xlu0 %v1121_v22  ;;  %1119 = vadd.xlane.f32.xlu1 %v1118_v38  ;;  %v1086_v41 = vpop.xlane.xlu0 %1085  ;;  %v1089_v42 = vpop.xlane.xlu1 %1088 }
 0x18c   : > { %v1097_v46 = vmul.f32 0.03125, %v1086_v41  ;;  %v1098_v47 = vmul.f32 0.03125, %v1089_v42  ;;  %v1111_v49 = vmul.f32 %v7504_v35, %v7504_v35  ;;  %v1112_v24 = vmul.f32 %v7506_v40, %v7506_v40 }
 0x18e   : > { %v7514_v50 = vsub.f32 %v1061_v6, %v1097_v46  ;;  %v7516_v51 = vsub.f32 %v1062_v7, %v1098_v47  ;;  %v1127_v53 = vsel %vm1065_vm1, %v1111_v49, 0.0  ;;  %v1130_v19 = vsel %vm1065_vm1, %v1112_v24, 0.0 }
 0x18f   : > { %1125 = vadd.xlane.f32.xlu1 %v1124_v44  ;;  %1128 = vadd.xlane.f32.xlu0 %v1127_v53 }
 0x190   : > { %v1113_v36 = vmul.f32 %v7514_v50, %v7514_v50  ;;  %v1114_v54 = vmul.f32 %v7516_v51, %v7516_v51 }
 0x192   : > { %v1133_v39 = vsel %vm1065_vm1, %v1113_v36, 0.0  ;;  %v1136_v55 = vsel %vm1065_vm1, %v1114_v54, 0.0 }
 0x193   : > { %1131 = vadd.xlane.f32.xlu1 %v1130_v19  ;;  %1134 = vadd.xlane.f32.xlu0 %v1133_v39 }
 0x197   : > { %1137 = vadd.xlane.f32.xlu1 %v1136_v55 }
 0x210   : > { %v1117_v58 = vpop.xlane.xlu0 %1116 }
 0x211   : > { %v1139_v59 = vmul.f32 0.03125, %v1117_v58 }
 0x213   : > { %v1147_v60 = vadd.f32 1e-05, %v1139_v59 }
 0x214   : > { %v1120_v61 = vpop.xlane.xlu1 %1119  ;;  %v1123_v27 = vpop.xlane.xlu0 %1122 }
 0x215   : > { %6930 = vrsqrt.f32 %v1147_v60  ;;  %v1140_v37 = vmul.f32 0.03125, %v1120_v61  ;;  %v1141_v45 = vmul.f32 0.03125, %v1123_v27 }
 0x217   : > { %v1148_v43 = vadd.f32 1e-05, %v1140_v37  ;;  %v1149_v48 = vadd.f32 1e-05, %v1141_v45 }
 0x218   : > { %v1126_v62 = vpop.xlane.xlu1 %1125  ;;  %v1129_v63 = vpop.xlane.xlu0 %1128 }
 0x219   : > { %6932 = vrsqrt.f32 %v1148_v43  ;;  %v1142_v0 = vmul.f32 0.03125, %v1126_v62  ;;  %v1143_v1 = vmul.f32 0.03125, %v1129_v63 }
 0x21a   : > { %6934 = vrsqrt.f32 %v1149_v48 }
 0x21b   : > { %v1150_v2 = vadd.f32 1e-05, %v1142_v0  ;;  %v1151_v3 = vadd.f32 1e-05, %v1143_v1 }
 0x21c   : > { %v1132_v52 = vpop.xlane.xlu1 %1131  ;;  %v1135_v4 = vpop.xlane.xlu0 %1134 }
 0x21d   : > { %6936 = vrsqrt.f32 %v1150_v2  ;;  %v1144_v5 = vmul.f32 0.03125, %v1132_v52  ;;  %v1145_v6 = vmul.f32 0.03125, %v1135_v4 }
 0x21e   : > { %6938 = vrsqrt.f32 %v1151_v3 }
 0x21f   : > { %v1152_v7 = vadd.f32 1e-05, %v1144_v5  ;;  %v1153_v8 = vadd.f32 1e-05, %v1145_v6 }
 0x220   : > { %v1138_v9 = vpop.xlane.xlu1 %1137 }
 0x221   : > { %6940 = vrsqrt.f32 %v1152_v7  ;;  %v1146_v10 = vmul.f32 0.03125, %v1138_v9 }
 0x222   : > { %v6931_v11 = vpop.eup %6930  ;;  %6942 = vrsqrt.f32 %v1153_v8 }
 0x223   : > { %v1154_v12 = vadd.f32 1e-05, %v1146_v10  ;;  %v1163_v13 = vmul.f32 %v6931_v11, %v7486_v14 }
 0x225   : > { %6944 = vrsqrt.f32 %v1154_v12  ;;  %v1177_v23 = vmul.f32 %v6072_v16, %v1163_v13 }
 0x226   : > { %v6933_v18 = vpop.eup %6932 }
 0x227   : > { %v6935_v20 = vpop.eup %6934  ;;  %v1164_v21 = vmul.f32 %v6933_v18, %v7494_v26  ;;  %v1191_v22 = vadd.f32 %v6073_v25, %v1177_v23 }
 0x228   : > { %v1165_v30 = vmul.f32 %v6935_v20, %v7488_v15 }
 0x229   : > { %v1178_v31 = vmul.f32 %v6072_v16, %v1164_v21 }
 0x22a   : > { %v6937_v14 = vpop.eup %6936  ;;  %v1179_v17 = vmul.f32 %v6072_v16, %v1165_v30 }
 0x22b   : > { %v6939_v32 = vpop.eup %6938  ;;  %v1192_v28 = vadd.f32 %v6073_v25, %v1178_v31  ;;  %v1166_v33 = vmul.f32 %v6937_v14, %v7496_v29 }
 0x22c   : > { %v1167_v34 = vmul.f32 %v6939_v32, %v7504_v35  ;;  %v1193_v44 = vadd.f32 %v6073_v25, %v1179_v17 }
 0x22d   : > { %v1199_v38 = vpack.c.bf16 %v1192_v28, %v1191_v22  ;;  %v1180_v26 = vmul.f32 %v6072_v16, %v1166_v33 }
 0x22e   : > { %v6941_v41 = vpop.eup %6940  ;;  %v1181_v47 = vmul.f32 %v6072_v16, %v1167_v34 }
 0x22f   : > { %v6943_v42 = vpop.eup %6942  ;;  %6371 = vmatprep.mubr.msk.bf16.mxu1 %vm1065_vm1, %v1199_v38  ;;  %v1194_v46 = vadd.f32 %v6073_v25, %v1180_v26  ;;  %v1168_v15 = vmul.f32 %v6941_v41, %v7506_v40 }
 0x230   : > { %v1169_v49 = vmul.f32 %v6943_v42, %v7514_v50  ;;  %v1195_v29 = vadd.f32 %v6073_v25, %v1181_v47  ;;  %v7161_v50 = vmov 0.0  }
 0x231   : > { %v1200_v24 = vpack.c.bf16 %v1194_v46, %v1193_v44  ;;  %v1182_v53 = vmul.f32 %v6072_v16, %v1168_v15  ;;  %6379 = vmatprep.subr.bf16.mxu1 %v7161_v50  ;;  %6391 = vmatprep.subr.bf16.mxu0 %v7161_v50 }
 0x232   : > { %v6945_v19 = vpop.eup %6944  ;;  %v1183_v54 = vmul.f32 %v6072_v16, %v1169_v49  ;;  %6393 = vmatprep.mubr.msk.bf16.mxu0 %vm7162_vm2, %v7161_v50 }
 0x233   : > { %6372 = vmatmul.mubr.msk.bf16.vlgmr.msra.gmra.mxu1 %vm1065_vm1, %v1200_v24  ;;  %v1196_v35 = vadd.f32 %v6073_v25, %v1182_v53  ;;  %v1170_v36 = vmul.f32 %v6945_v19, %v7516_v51  ;;  %v6074_v51 = vld [vmem:[%s8721_s5] ss:$0 sm:$0xff]  ;;  %s7171_s5 = smov 104  }
 0x234   : > { %v1197_v56 = vadd.f32 %v6073_v25, %v1183_v54 }
 0x235   : > { %v1201_v39 = vpack.c.bf16 %v1196_v35, %v1195_v29  ;;  %v1184_v55 = vmul.f32 %v6072_v16, %v1170_v36  ;;  %v7648_v36 = vld [vmem:[%s8722_s17] ss:$0 sm:$0xff] }
 0x237   : > { %6375 = vmatprep.mubr.msk.bf16.mxu1 %vm1065_vm1, %v1201_v39  ;;  %v1198_v40 = vadd.f32 %v6073_v25, %v1184_v55 }
 0x239   : > { %v1202_v57 = vpack.c.bf16 %v1198_v40, %v1197_v56 }
 0x23b   : > { %6376 = vmatmul.mubr.msk.bf16.gmra.mxu1 %vm1065_vm1, %v1202_v57 }
 0x23c   : > { %6381 = vmatprep.mubr.msk.bf16.mxu1 %vm7162_vm2, %v7161_v50 }
 0x2f3   : > { %v6373_v58 = vpop.f32.mrf.mxu1 }
 0x2f4   : > { %v1281_v48 = vadd.f32 %v6373_v58, %v6074_v51 }
 0x2f5   : > { %v1272_v59 = vpop.f32.mrf.mxu1 }
 0x2f6   : > { %v1273_v60 = vadd.f32 %v6074_v51, %v1272_v59  ;;  %v7567_v2 = vpack.c.bf16 %v1281_v48, %v1281_v48 }
 0x2f7   : > { %v6374_v61 = vpop.f32.mrf.mxu1 }
 0x2f8   : > { %v7561_v27 = vpack.c.bf16 %v1273_v60, %v1273_v60  ;;  %v1284_v3 = vadd.f32 %v6374_v61, %v6074_v51 }
 0x2f9   : > { %v1275_v37 = vpop.f32.mrf.mxu1 }
 0x2fa   : > { %v1276_v45 = vadd.f32 %v6074_v51, %v1275_v37  ;;  %1317 = vrot.lane.b32.xlu0 %v7561_v27, %s7163_s6  ;;  %v7573_v6 = vpack.c.bf16 %v1284_v3, %v1284_v3 }
 0x2fb   : > { %v6377_v43 = vpop.f32.mrf.mxu1 }
 0x2fc   : > { %v7564_v62 = vpack.c.bf16 %v1276_v45, %v1276_v45  ;;  %v1297_v52 = vadd.f32 %v6377_v43, %v6074_v51 }
 0x2fd   : > { %v1288_v63 = vpop.f32.mrf.mxu1 }
 0x2fe   : > { %v1289_v0 = vadd.f32 %v6074_v51, %v1288_v63  ;;  %1367 = vrot.lane.b32.xlu1 %v7564_v62, %s7163_s6  ;;  %v7575_v7 = vpack.c.bf16 %v1297_v52, %v1297_v52 }
 0x2ff   : > { %v6378_v1 = vpop.f32.mrf.mxu1 }
 0x300   : > { %v7569_v4 = vpack.c.bf16 %v1289_v0, %v1289_v0  ;;  %v1300_v9 = vadd.f32 %v6378_v1, %v6074_v51 }
 0x301   : > { %v1291_v5 = vpop.f32.mrf.mxu1 }
 0x302   : > { %1416 = vrot.lane.b32.xlu1 %v7567_v2, %s7163_s6  ;;  %1514 = vrot.lane.b32.xlu0 %v7569_v4, %s7163_s6  ;;  %v1292_v8 = vadd.f32 %v6074_v51, %v1291_v5  ;;  %v7584_v11 = vpack.c.bf16 %v1300_v9, %v1300_v9 }
 0x304   : > { %v7579_v10 = vpack.c.bf16 %v1292_v8, %v1292_v8 }
 0x306   : > { %1465 = vrot.lane.b32.xlu1 %v7573_v6, %s7163_s6  ;;  %1612 = vrot.lane.b32.xlu0 %v7575_v7, %s7163_s6 }
 0x30a   : > { %1563 = vrot.lane.b32.xlu1 %v7579_v10, %s7163_s6  ;;  %1827 = vrot.lane.b32.xlu0 %v7561_v27, %s7164_s21 }
 0x30e   : > { %1661 = vrot.lane.b32.xlu1 %v7584_v11, %s7163_s6  ;;  %s7172_s6 = smov 72  }
 0x312   : > { %1876 = vrot.lane.b32.xlu1 %v7564_v62, %s7164_s21 }
 0x316   : > { %1924 = vrot.lane.b32.xlu1 %v7567_v2, %s7164_s21 }
 0x31a   : > { %1972 = vrot.lane.b32.xlu1 %v7573_v6, %s7164_s21 }
 0x36c   : > { %v1318_v12 = vpop.permute.xlu0 %1317 }
 0x36d   : > { %v1324_v13 = vsel %vm1319_vm3, %v1318_v12, 0 }
 0x36e   : > { %6380 = vmatpush3.bf16.xpose.msra.mxu1 %v1324_v13 }
 0x36f   : > { %6385 = vmatprep.subr.bf16.mxu1 %v7161_v50 }
 0x370   : > { %v1368_v16 = vpop.permute.xlu1 %1367 }
 0x371   : > { %v1373_v20 = vsel %vm1319_vm3, %v1368_v16, 0 }
 0x374   : > { %v1417_v18 = vpop.permute.xlu1 %1416  ;;  %v1515_v23 = vpop.permute.xlu0 %1514 }
 0x375   : > { %6382 = vmatmul.mubr.msk.bf16.vlgmr.msra.gmra.mxu1 %vm1319_vm3, %v7561_v27  ;;  %v1422_v21 = vsel %vm1319_vm3, %v1417_v18, 0  ;;  %v1520_v30 = vsel %vm1319_vm3, %v1515_v23, 0 }
 0x376   : > { %6386 = vmatpush3.bf16.xpose.msra.mxu1 %v1373_v20  ;;  %6392 = vmatpush3.bf16.xpose.msra.mxu0 %v1422_v21 }
 0x377   : > { %6387 = vmatprep.mubr.msk.bf16.mxu1 %vm7162_vm2, %v7161_v50  ;;  %6397 = vmatprep.subr.bf16.mxu1 %v7161_v50 }
 0x378   : > { %6403 = vmatprep.subr.bf16.mxu0 %v7161_v50  ;;  %v1466_v25 = vpop.permute.xlu1 %1465  ;;  %v1613_v14 = vpop.permute.xlu0 %1612 }
 0x379   : > { %v1471_v31 = vsel %vm1319_vm3, %v1466_v25, 0  ;;  %v1618_v22 = vsel %vm1319_vm3, %v1613_v14, 0 }
 0x37c   : > { %v1564_v32 = vpop.permute.xlu1 %1563  ;;  %v1828_v33 = vpop.permute.xlu0 %1827 }
 0x37d   : > { %6388 = vmatmul.mubr.msk.bf16.vlgmr.msra.gmra.mxu1 %vm1319_vm3, %v7564_v62  ;;  %6394 = vmatmul.mubr.msk.bf16.vlgmr.msra.gmra.mxu0 %vm1319_vm3, %v7567_v2  ;;  %v1569_v28 = vsel %vm1319_vm3, %v1564_v32, 0  ;;  %v1834_v34 = vsel %vm1832_vm4, %v1828_v33, 0 }
 0x37e   : > { %6398 = vmatpush3.bf16.xpose.msra.mxu1 %v1471_v31  ;;  %6404 = vmatpush3.bf16.xpose.msra.mxu0 %v1520_v30 }
 0x37f   : > { %6405 = vmatprep.mubr.msk.bf16.mxu0 %vm7162_vm2, %v7161_v50  ;;  %6399 = vmatprep.mubr.msk.bf16.mxu1 %vm7162_vm2, %v7161_v50 }
 0x380   : > { %6409 = vmatprep.subr.bf16.mxu1 %v7161_v50  ;;  %6415 = vmatprep.subr.bf16.mxu0 %v7161_v50  ;;  %v1662_v17 = vpop.permute.xlu1 %1661 }
 0x381   : > { %v1667_v38 = vsel %vm1319_vm3, %v1662_v17, 0 }
 0x384   : > { %v1877_v26 = vpop.permute.xlu1 %1876 }
 0x385   : > { %6400 = vmatmul.mubr.msk.bf16.vlgmr.msra.gmra.mxu1 %vm1319_vm3, %v7573_v6  ;;  %6406 = vmatmul.mubr.msk.bf16.vlgmr.msra.gmra.mxu0 %vm1319_vm3, %v7569_v4  ;;  %v1882_v41 = vsel %vm1832_vm4, %v1877_v26, 0 }
 0x386   : > { %6410 = vmatpush3.bf16.xpose.msra.mxu1 %v1569_v28  ;;  %6416 = vmatpush3.bf16.xpose.msra.mxu0 %v1618_v22 }
 0x387   : > { %6411 = vmatprep.mubr.msk.bf16.mxu1 %vm7162_vm2, %v7161_v50  ;;  %6417 = vmatprep.mubr.msk.bf16.mxu0 %vm7162_vm2, %v7161_v50 }
 0x388   : > { %6421 = vmatprep.subr.bf16.mxu1 %v7161_v50  ;;  %6427 = vmatprep.subr.bf16.mxu0 %v7161_v50 }
 0x38d   : > { %6412 = vmatmul.mubr.msk.bf16.vlgmr.msra.gmra.mxu1 %vm1319_vm3, %v7579_v10  ;;  %6418 = vmatmul.mubr.msk.bf16.vlgmr.msra.gmra.mxu0 %vm1319_vm3, %v7575_v7 }
 0x38e   : > { %6422 = vmatpush3.bf16.xpose.msra.mxu1 %v1667_v38  ;;  %6428 = vmatpush3.bf16.msra.mxu0 %v1834_v34 }
 0x38f   : > { %6423 = vmatprep.mubr.msk.bf16.mxu1 %vm7162_vm2, %v7161_v50  ;;  %6433 = vmatprep.subr.bf16.mxu1 %v7161_v50 }
 0x390   : > { %6429 = vmatprep.mubr.msk.bf16.mxu0 %vm7162_vm2, %v7161_v50  ;;  %6439 = vmatprep.subr.bf16.mxu0 %v7161_v50 }
 0x395   : > { %6424 = vmatmul.mubr.msk.bf16.vlgmr.msra.gmra.mxu1 %vm1319_vm3, %v7584_v11 }
 0x396   : > { %6434 = vmatpush3.bf16.msra.mxu1 %v1882_v41  ;;  %6435 = vmatprep.mubr.msk.bf16.mxu1 %vm7162_vm2, %v7161_v50 }
 0x397   : > { %6445 = vmatprep.subr.bf16.mxu1 %v7161_v50 }
 0x435   : > { %v1360_v42 = vpop.f32.mrf.mxu1 }
 0x436   : > { %v1709_v24 = vmul.f32 0.35355338, %v1360_v42 }
 0x437   : > { %v6383_v44 = vpop.f32.mrf.mxu1 }
 0x438   : > { %v1723_v58 = vadd.f32 %v7648_v36, %v1709_v24 }
 0x439   : > { %v1363_v46 = vpop.f32.mrf.mxu1 }
 0x43a   : > { %v1731_v43 = vsel %vm1319_vm3, %v1723_v58, -inf  ;;  %v7679_v46 = vpop.permute.xlu1 %1924 }
 0x43b   : > { %v6384_v15 = vpop.f32.mrf.mxu1 }
 0x43d   : > { %v1409_v47 = vpop.f32.mrf.mxu1  ;;  %v1458_v49 = vpop.f32.mrf.mxu0 }
 0x43e   : > { %v1710_v53 = vmul.f32 0.35355338, %v1409_v47  ;;  %v1711_v19 = vmul.f32 0.35355338, %v1458_v49  ;;  %v7681_v15 = vpop.permute.xlu1 %1972 }
 0x43f   : > { %v6389_v29 = vpop.f32.mrf.mxu1  ;;  %v6395_v35 = vpop.f32.mrf.mxu0 }
 0x440   : > { %v1725_v54 = vadd.f32 %v7648_v36, %v1711_v19  ;;  %v1724_v39 = vadd.f32 %v7648_v36, %v1710_v53 }
 0x441   : > { %v1412_v55 = vpop.f32.mrf.mxu1  ;;  %v1461_v56 = vpop.f32.mrf.mxu0 }
 0x442   : > { %v1737_v40 = vsel %vm1319_vm3, %v1725_v54, -inf  ;;  %v1734_v57 = vsel %vm1319_vm3, %v1724_v39, -inf }
 0x443   : > { %v6396_v51 = vpop.f32.mrf.mxu0  ;;  %1738 = vmax.xlane.f32.xlu0 %v1737_v40  ;;  %1735 = vmax.xlane.f32.xlu1 %v1734_v57  ;;  %v6390_v59 = vpop.f32.mrf.mxu1 }
 0x445   : > { %v1507_v60 = vpop.f32.mrf.mxu1  ;;  %v1556_v61 = vpop.f32.mrf.mxu0 }
 0x446   : > { %v1712_v37 = vmul.f32 0.35355338, %v1507_v60  ;;  %v1713_v45 = vmul.f32 0.35355338, %v1556_v61 }
 0x447   : > { %1732 = vmax.xlane.f32.xlu0 %v1731_v43  ;;  %v6401_v48 = vpop.f32.mrf.mxu1  ;;  %v6407_v63 = vpop.f32.mrf.mxu0 }
 0x448   : > { %v1727_v0 = vadd.f32 %v7648_v36, %v1713_v45  ;;  %v7659_v5 = vadd.f32 %v7648_v36, %v1712_v37 }
 0x449   : > { %v1510_v1 = vpop.f32.mrf.mxu1  ;;  %v1559_v3 = vpop.f32.mrf.mxu0 }
 0x44a   : > { %v1743_v52 = vsel %vm1319_vm3, %v1727_v0, -inf  ;;  %v1740_v18 = vsel %vm1319_vm3, %v7659_v5, -inf }
 0x44b   : > { %v6402_v8 = vpop.f32.mrf.mxu1  ;;  %1744 = vmax.xlane.f32.xlu0 %v1743_v52  ;;  %v6408_v9 = vpop.f32.mrf.mxu0 }
 0x44d   : > { %v1605_v12 = vpop.f32.mrf.mxu1  ;;  %v1654_v13 = vpop.f32.mrf.mxu0 }
 0x44e   : > { %v1715_v16 = vmul.f32 0.35355338, %v1654_v13  ;;  %v1714_v34 = vmul.f32 0.35355338, %v1605_v12 }
 0x44f   : > { %v6413_v20 = vpop.f32.mrf.mxu1  ;;  %1741 = vmax.xlane.f32.xlu0 %v1740_v18  ;;  %v6419_v21 = vpop.f32.mrf.mxu0 }
 0x450   : > { %v7664_v23 = vadd.f32 %v7648_v36, %v1715_v16  ;;  %v1728_v26 = vadd.f32 %v7648_v36, %v1714_v34 }
 0x451   : > { %v1608_v25 = vpop.f32.mrf.mxu1  ;;  %v1657_v30 = vpop.f32.mrf.mxu0 }
 0x452   : > { %v1749_v31 = vsel %vm1319_vm3, %v7664_v23, -inf  ;;  %v1746_v41 = vsel %vm1319_vm3, %v1728_v26, -inf }
 0x453   : > { %v6414_v14 = vpop.f32.mrf.mxu1  ;;  %1750 = vmax.xlane.f32.xlu0 %v1749_v31  ;;  %v6420_v32 = vpop.f32.mrf.mxu0 }
 0x454   : > { %2068 = vrot.lane.b32.xlu1 %v7579_v10, %s7164_s21 }
 0x455   : > { %v1703_v22 = vpop.f32.mrf.mxu1 }
 0x456   : > { %v1716_v38 = vmul.f32 0.35355338, %v1703_v22 }
 0x457   : > { %v6425_v28 = vpop.f32.mrf.mxu1 }
 0x458   : > { %v7675_v42 = vadd.f32 %v7648_v36, %v1716_v38 }
 0x459   : > { %v1706_v33 = vpop.f32.mrf.mxu1 }
 0x45a   : > { %v1752_v44 = vsel %vm1319_vm3, %v7675_v42, -inf }
 0x45b   : > { %v6426_v17 = vpop.f32.mrf.mxu1 }
 0x469   : > { %2020 = vrot.lane.b32.xlu0 %v7569_v4, %s7164_s21 }
 0x478   : > { %1747 = vmax.xlane.f32.xlu1 %v1746_v41 }
 0x47c   : > { %1753 = vmax.xlane.f32.xlu1 %v1752_v44 }
 0x4cc   : > { %v1736_v47 = vpop.xlane.xlu1 %1735  ;;  %v1739_v49 = vpop.xlane.xlu0 %1738 }
 0x4cd   : > { %v1756_v24 = vsub.f32 %v1724_v39, %v1736_v47  ;;  %v1757_v53 = vsub.f32 %v1725_v54, %v1739_v49 }
 0x4cf   : > { %v1765_v19 = vmul.f32 1.442695, %v1756_v24  ;;  %v1767_v29 = vmul.f32 1.442695, %v1757_v53  ;;  %v1930_v24 = vsel %vm1832_vm4, %v7679_v46, 0 }
 0x4d0   : > { %v1733_v35 = vpop.xlane.xlu0 %1732  ;;  %v7702_v63 = vpop.permute.xlu1 %2068 }
 0x4d1   : > { %6946 = vpow2.f32 %v1765_v19  ;;  %v1755_v55 = vsub.f32 %v1723_v58, %v1733_v35 }
 0x4d2   : > { %6948 = vpow2.f32 %v1767_v29 }
 0x4d3   : > { %v1763_v56 = vmul.f32 1.442695, %v1755_v55 }
 0x4d4   : > { %v1745_v40 = vpop.xlane.xlu0 %1744 }
 0x4d5   : > { %6950 = vpow2.f32 %v1763_v56  ;;  %v1759_v57 = vsub.f32 %v1727_v0, %v1745_v40 }
 0x4d7   : > { %v1771_v51 = vmul.f32 1.442695, %v1759_v57 }
 0x4d8   : > { %v1742_v43 = vpop.xlane.xlu0 %1741 }
 0x4d9   : > { %6952 = vpow2.f32 %v1771_v51  ;;  %v1758_v48 = vsub.f32 %v7659_v5, %v1742_v43 }
 0x4db   : > { %v1769_v0 = vmul.f32 1.442695, %v1758_v48 }
 0x4dc   : > { %v1751_v3 = vpop.xlane.xlu0 %1750 }
 0x4dd   : > { %6954 = vpow2.f32 %v1769_v0  ;;  %v1761_v9 = vsub.f32 %v7664_v23, %v1751_v3 }
 0x4de   : > { %v7683_v59 = vpop.eup %6946 }
 0x4df   : > { %v7685_v60 = vpop.eup %6948  ;;  %v1782_v39 = vsel %vm1319_vm3, %v7683_v59, 0.0  ;;  %v1775_v12 = vmul.f32 1.442695, %v1761_v9 }
 0x4e0   : > { %1783 = vadd.xlane.f32.xlu1 %v1782_v39  ;;  %v1785_v54 = vsel %vm1319_vm3, %v7685_v60, 0.0  ;;  %v2021_v32 = vpop.permute.xlu0 %2020 }
 0x4e1   : > { %1786 = vadd.xlane.f32.xlu0 %v1785_v54  ;;  %v2026_v29 = vsel %vm1832_vm4, %v2021_v32, 0 }
 0x4e2   : > { %v7691_v58 = vpop.eup %6950 }
 0x4e3   : > { %v1779_v61 = vsel %vm1319_vm3, %v7691_v58, 0.0 }
 0x4e5   : > { %1780 = vadd.xlane.f32.xlu0 %v1779_v61 }
 0x4e6   : > { %v7695_v37 = vpop.eup %6952 }
 0x4e7   : > { %v1791_v45 = vsel %vm1319_vm3, %v7695_v37, 0.0 }
 0x4e9   : > { %1792 = vadd.xlane.f32.xlu0 %v1791_v45 }
 0x4ea   : > { %v7707_v13 = vpop.eup %6954 }
 0x4eb   : > { %v1788_v5 = vsel %vm1319_vm3, %v7707_v13, 0.0 }
 0x4f1   : > { %2164 = vrot.lane.b32.xlu1 %v7584_v11, %s7164_s21 }
 0x4ff   : > { %2116 = vrot.lane.b32.xlu0 %v7575_v7, %s7164_s21  ;;  %s7173_s21 = smov 40  }
 0x501   : > { %v1748_v1 = vpop.xlane.xlu1 %1747 }
 0x502   : > { %v1760_v52 = vsub.f32 %v1728_v26, %v1748_v1 }
 0x504   : > { %v1773_v8 = vmul.f32 1.442695, %v1760_v52 }
 0x505   : > { %v1754_v23 = vpop.xlane.xlu1 %1753 }
 0x506   : > { %6956 = vpow2.f32 %v1773_v8  ;;  %v1762_v25 = vsub.f32 %v7675_v42, %v1754_v23  ;;  %v1978_v42 = vsel %vm1832_vm4, %v7681_v15, 0 }
 0x507   : > { %6958 = vpow2.f32 %v1775_v12 }
 0x508   : > { %v1777_v30 = vmul.f32 1.442695, %v1762_v25 }
 0x50a   : > { %6960 = vpow2.f32 %v1777_v30 }
 0x513   : > { %v7711_v16 = vpop.eup %6956 }
 0x514   : > { %v1794_v18 = vsel %vm1319_vm3, %v7711_v16, 0.0  ;;  %v7715_v20 = vpop.eup %6958 }
 0x515   : > { %1789 = vadd.xlane.f32.xlu1 %v1788_v5  ;;  %v1797_v21 = vsel %vm1319_vm3, %v7715_v20, 0.0 }
 0x517   : > { %v7727_v31 = vpop.eup %6960 }
 0x518   : > { %v1800_v14 = vsel %vm1319_vm3, %v7727_v31, 0.0 }
 0x519   : > { %1795 = vadd.xlane.f32.xlu1 %v1794_v18 }
 0x51e   : > { %1798 = vadd.xlane.f32.xlu0 %v1797_v21 }
 0x52a   : > { %2269 = vrot.lane.b32.xlu1 %v7564_v62, %s7165_s2 }
 0x534   : > { %2219 = vrot.lane.b32.xlu0 %v7561_v27, %s7165_s2 }
 0x538   : > { %2217 = vrot.lane.b32.xlu0 %v7561_v27, %s7166_s22 }
 0x53c   : > { %2319 = vrot.lane.b32.xlu0 %v7567_v2, %s7165_s2 }
 0x540   : > { %2317 = vrot.lane.b32.xlu0 %v7567_v2, %s7166_s22 }
 0x544   : > { %2419 = vrot.lane.b32.xlu0 %v7569_v4, %s7165_s2 }
 0x548   : > { %2417 = vrot.lane.b32.xlu0 %v7569_v4, %s7166_s22 }
 0x54c   : > { %2519 = vrot.lane.b32.xlu0 %v7575_v7, %s7165_s2 }
 0x54e   : > { %1801 = vadd.xlane.f32.xlu1 %v1800_v14 }
 0x550   : > { %2517 = vrot.lane.b32.xlu0 %v7575_v7, %s7166_s22 }
 0x55f   : > { %2267 = vrot.lane.b32.xlu1 %v7564_v62, %s7166_s22 }
 0x563   : > { %2369 = vrot.lane.b32.xlu1 %v7573_v6, %s7165_s2 }
 0x567   : > { %2367 = vrot.lane.b32.xlu1 %v7573_v6, %s7166_s22 }
 0x569   : > { %v1784_v22 = vpop.xlane.xlu1 %1783 }
 0x56a   : > { %6962 = vrcp.f32 %v1784_v22  ;;  %v1787_v28 = vpop.xlane.xlu0 %1786 }
 0x56b   : > { %2469 = vrot.lane.b32.xlu1 %v7579_v10, %s7165_s2 }
 0x56d   : > { %v2165_v40 = vpop.permute.xlu1 %2164 }
 0x56e   : > { %v1781_v33 = vpop.xlane.xlu0 %1780  ;;  %v2170_v8 = vsel %vm1832_vm4, %v2165_v40, 0 }
 0x56f   : > { %6964 = vrcp.f32 %v1781_v33  ;;  %2467 = vrot.lane.b32.xlu1 %v7579_v10, %s7166_s22 }
 0x570   : > { %6966 = vrcp.f32 %v1787_v28 }
 0x572   : > { %v1793_v34 = vpop.xlane.xlu0 %1792 }
 0x573   : > { %2569 = vrot.lane.b32.xlu1 %v7584_v11, %s7165_s2  ;;  %6968 = vrcp.f32 %v1793_v34 }
 0x576   : > { %v2117_v35 = vpop.permute.xlu0 %2116 }
 0x577   : > { %v6963_v17 = vpop.eup %6962  ;;  %2567 = vrot.lane.b32.xlu1 %v7584_v11, %s7166_s22  ;;  %v2122_v56 = vsel %vm1832_vm4, %v2117_v35, 0  ;;  %s8724_s22 = scalar_lea.vmem %s8676_s11, %s7314_s24  ;;  %s8725_s24 = sld [smem:[#allocation3_spill]] }
 0x578   : > { %v1812_v38 = vmul.f32 %v6963_v17, %v7683_v59 }
 0x57a   : > { %v1820_v26 = vpack.c.bf16 %v1812_v38, %v1812_v38 }
 0x57c   : > { %v6965_v41 = vpop.eup %6964  ;;  %6436 = vmatmul.mubr.msk.bf16.vlgmr.msra.gmra.mxu1 %vm1319_vm3, %v1820_v26 }
 0x57d   : > { %6446 = vmatpush3.bf16.msra.mxu1 %v1978_v42  ;;  %v1811_v44 = vmul.f32 %v6965_v41, %v7691_v58  ;;  %6447 = vmatprep.mubr.msk.bf16.mxu1 %vm7162_vm2, %v7161_v50  ;;  %v6967_v49 = vpop.eup %6966  ;;  %p6181_p9 = scmp.ne.s32.totalorder %s8725_s24, 1 }
 0x57e   : > { %6457 = vmatprep.subr.bf16.mxu1 %v7161_v50  ;;  %v1813_v15 = vmul.f32 %v6967_v49, %v7685_v60  ;;  %s8726_s29 = sld [smem:[#allocation18_spill]] (!%p6181_p9) }
 0x57f   : > { %v1819_v47 = vpack.c.bf16 %v1811_v44, %v1811_v44 }
 0x580   : > { %v1821_v53 = vpack.c.bf16 %v1813_v15, %v1813_v15  ;;  %v6969_v19 = vpop.eup %6968 }
 0x581   : > { %6430 = vmatmul.mubr.msk.bf16.vlgmr.msra.gmra.mxu0 %vm1319_vm3, %v1819_v47  ;;  %v1815_v46 = vmul.f32 %v6969_v19, %v7695_v37  ;;  %v2074_v37 = vsel %vm1832_vm4, %v7702_v63, 0 }
 0x582   : > { %6440 = vmatpush3.bf16.msra.mxu0 %v1930_v24  ;;  %6441 = vmatprep.mubr.msk.bf16.mxu0 %vm7162_vm2, %v7161_v50 }
 0x583   : > { %6451 = vmatprep.subr.bf16.mxu0 %v7161_v50  ;;  %v1823_v55 = vpack.c.bf16 %v1815_v46, %v1815_v46 }
 0x589   : > { %6442 = vmatmul.mubr.msk.bf16.vlgmr.msra.gmra.mxu0 %vm1319_vm3, %v1821_v53 }
 0x58a   : > { %6452 = vmatpush3.bf16.msra.mxu0 %v2026_v29  ;;  %6453 = vmatprep.mubr.msk.bf16.mxu0 %vm7162_vm2, %v7161_v50 }
 0x58b   : > { %6463 = vmatprep.subr.bf16.mxu0 %v7161_v50 }
 0x591   : > { %6454 = vmatmul.mubr.msk.bf16.vlgmr.msra.gmra.mxu0 %vm1319_vm3, %v1823_v55 }
 0x592   : > { %6464 = vmatpush3.bf16.msra.mxu0 %v2122_v56  ;;  %6465 = vmatprep.mubr.msk.bf16.mxu0 %vm7162_vm2, %v7161_v50 }
 0x593   : > { %6475 = vmatprep.subr.bf16.mxu0 %v7161_v50 }
 0x59e   : > { %v1790_v57 = vpop.xlane.xlu1 %1789 }
 0x59f   : > { %6970 = vrcp.f32 %v1790_v57 }
 0x5a2   : > { %v1796_v51 = vpop.xlane.xlu1 %1795 }
 0x5a3   : > { %6972 = vrcp.f32 %v1796_v51 }
 0x5a6   : > { %v2270_v21 = vpop.permute.xlu1 %2269 }
 0x5a7   : > { %v1799_v59 = vpop.xlane.xlu0 %1798  ;;  %v2275_v33 = vsel %vm1319_vm3, %v2270_v21, 0 }
 0x5a8   : > { %6974 = vrcp.f32 %v1799_v59 }
 0x5ab   : > { %v2220_v60 = vpop.permute.xlu0 %2219 }
 0x5ac   : > { %v6971_v39 = vpop.eup %6970  ;;  %v2225_v63 = vsel %vm1319_vm3, %v2220_v60, 0 }
 0x5ad   : > { %v1814_v54 = vmul.f32 %v6971_v39, %v7707_v13 }
 0x5af   : > { %v1822_v58 = vpack.c.bf16 %v1814_v54, %v1814_v54  ;;  %v2218_v45 = vpop.permute.xlu0 %2217 }
 0x5b0   : > { %v6973_v61 = vpop.eup %6972 }
 0x5b1   : > { %6448 = vmatmul.mubr.msk.bf16.vlgmr.msra.gmra.mxu1 %vm1319_vm3, %v1822_v58  ;;  %v1816_v43 = vmul.f32 %v6973_v61, %v7711_v16 }
 0x5b2   : > { %6458 = vmatpush3.bf16.msra.mxu1 %v2074_v37  ;;  %6459 = vmatprep.mubr.msk.bf16.mxu1 %vm7162_vm2, %v7161_v50 }
 0x5b3   : > { %6469 = vmatprep.subr.bf16.mxu1 %v7161_v50  ;;  %v2320_v1 = vpop.permute.xlu0 %2319  ;;  %v1824_v3 = vpack.c.bf16 %v1816_v43, %v1816_v43 }
 0x5b4   : > { %v2325_v12 = vsel %vm1319_vm3, %v2320_v1, 0 }
 0x5b5   : > { %v6975_v48 = vpop.eup %6974 }
 0x5b6   : > { %v1817_v0 = vmul.f32 %v6975_v48, %v7715_v20 }
 0x5b7   : > { %v2318_v9 = vpop.permute.xlu0 %2317 }
 0x5b8   : > { %v1825_v52 = vpack.c.bf16 %v1817_v0, %v1817_v0 }
 0x5b9   : > { %6460 = vmatmul.mubr.msk.bf16.vlgmr.msra.gmra.mxu1 %vm1319_vm3, %v1824_v3 }
 0x5ba   : > { %6466 = vmatmul.mubr.msk.bf16.vlgmr.msra.gmra.mxu0 %vm1319_vm3, %v1825_v52  ;;  %6470 = vmatpush3.bf16.msra.mxu1 %v2170_v8 }
 0x5bb   : > { %6476 = vmatpush3.bf16.xpose.msra.mxu0 %v2225_v63  ;;  %6477 = vmatprep.mubr.msk.bf16.mxu0 %vm7162_vm2, %v7161_v50  ;;  %v2420_v13 = vpop.permute.xlu0 %2419 }
 0x5bc   : > { %6487 = vmatprep.subr.bf16.mxu0 %v7161_v50  ;;  %6471 = vmatprep.mubr.msk.bf16.mxu1 %vm7162_vm2, %v7161_v50  ;;  %v2425_v16 = vsel %vm1319_vm3, %v2420_v13, 0 }
 0x5bd   : > { %6481 = vmatprep.subr.bf16.mxu1 %v7161_v50 }
 0x5bf   : > { %v2418_v5 = vpop.permute.xlu0 %2417 }
 0x5c2   : > { %6478 = vmatmul.mubr.msk.bf16.vlgmr.msra.gmra.mxu0 %vm1319_vm3, %v2218_v45 }
 0x5c3   : > { %6488 = vmatpush3.bf16.xpose.msra.mxu0 %v2325_v12  ;;  %6489 = vmatprep.mubr.msk.bf16.mxu0 %vm7162_vm2, %v7161_v50  ;;  %v2520_v18 = vpop.permute.xlu0 %2519 }
 0x5c4   : > { %6499 = vmatprep.subr.bf16.mxu0 %v7161_v50  ;;  %v2525_v20 = vsel %vm1319_vm3, %v2520_v18, 0 }
 0x5c7   : > { %v2518_v25 = vpop.permute.xlu0 %2517 }
 0x5ca   : > { %6490 = vmatmul.mubr.msk.bf16.vlgmr.msra.gmra.mxu0 %vm1319_vm3, %v2318_v9 }
 0x5cb   : > { %6500 = vmatpush3.bf16.xpose.msra.mxu0 %v2425_v16  ;;  %6501 = vmatprep.mubr.msk.bf16.mxu0 %vm7162_vm2, %v7161_v50 }
 0x5cc   : > { %6511 = vmatprep.subr.bf16.mxu0 %v7161_v50 }
 0x5d2   : > { %6502 = vmatmul.mubr.msk.bf16.vlgmr.msra.gmra.mxu0 %vm1319_vm3, %v2418_v5 }
 0x5d3   : > { %6512 = vmatpush3.bf16.xpose.msra.mxu0 %v2525_v20  ;;  %6513 = vmatprep.mubr.msk.bf16.mxu0 %vm7162_vm2, %v7161_v50 }
 0x5d4   : > { %6523 = vmatprep.subr.bf16.mxu0 %v7161_v50 }
 0x5d7   : > { %v1802_v23 = vpop.xlane.xlu1 %1801 }
 0x5d8   : > { %6976 = vrcp.f32 %v1802_v23 }
 0x5da   : > { %6514 = vmatmul.mubr.msk.bf16.vlgmr.msra.gmra.mxu0 %vm1319_vm3, %v2518_v25 }
 0x5db   : > { %6525 = vmatprep.mubr.msk.bf16.mxu0 %vm7162_vm2, %v7161_v50  ;;  %v2268_v30 = vpop.permute.xlu1 %2267 }
 0x5df   : > { %v2370_v22 = vpop.permute.xlu1 %2369 }
 0x5e0   : > { %v2375_v34 = vsel %vm1319_vm3, %v2370_v22, 0 }
 0x5e3   : > { %v2368_v17 = vpop.permute.xlu1 %2367 }
 0x5e5   : > { %v6977_v14 = vpop.eup %6976 }
 0x5e6   : > { %v1818_v32 = vmul.f32 %v6977_v14, %v7727_v31 }
 0x5e7   : > { %v2470_v38 = vpop.permute.xlu1 %2469 }
 0x5e8   : > { %v1826_v28 = vpack.c.bf16 %v1818_v32, %v1818_v32  ;;  %v2475_v26 = vsel %vm1319_vm3, %v2470_v38, 0 }
 0x5ea   : > { %6472 = vmatmul.mubr.msk.bf16.vlgmr.msra.gmra.mxu1 %vm1319_vm3, %v1826_v28 }
 0x5eb   : > { %6482 = vmatpush3.bf16.xpose.msra.mxu1 %v2275_v33  ;;  %6483 = vmatprep.mubr.msk.bf16.mxu1 %vm7162_vm2, %v7161_v50  ;;  %v2468_v31 = vpop.permute.xlu1 %2467 }
 0x5ec   : > { %6493 = vmatprep.subr.bf16.mxu1 %v7161_v50 }
 0x5ef   : > { %v2570_v41 = vpop.permute.xlu1 %2569 }
 0x5f0   : > { %v2575_v42 = vsel %vm1319_vm3, %v2570_v41, 0 }
 0x5f2   : > { %6484 = vmatmul.mubr.msk.bf16.vlgmr.msra.gmra.mxu1 %vm1319_vm3, %v2268_v30 }
 0x5f3   : > { %6494 = vmatpush3.bf16.xpose.msra.mxu1 %v2375_v34  ;;  %6495 = vmatprep.mubr.msk.bf16.mxu1 %vm7162_vm2, %v7161_v50  ;;  %v2568_v44 = vpop.permute.xlu1 %2567 }
 0x5f4   : > { %6505 = vmatprep.subr.bf16.mxu1 %v7161_v50 }
 0x5fa   : > { %6496 = vmatmul.mubr.msk.bf16.vlgmr.msra.gmra.mxu1 %vm1319_vm3, %v2368_v17 }
 0x5fb   : > { %6506 = vmatpush3.bf16.xpose.msra.mxu1 %v2475_v26  ;;  %6507 = vmatprep.mubr.msk.bf16.mxu1 %vm7162_vm2, %v7161_v50 }
 0x5fc   : > { %6517 = vmatprep.subr.bf16.mxu1 %v7161_v50 }
 0x602   : > { %6508 = vmatmul.mubr.msk.bf16.vlgmr.msra.gmra.mxu1 %vm1319_vm3, %v2468_v31 }
 0x603   : > { %6518 = vmatpush3.bf16.xpose.msra.mxu1 %v2575_v42  ;;  %6519 = vmatprep.mubr.msk.bf16.mxu1 %vm7162_vm2, %v7161_v50 }
 0x604   : > { %6529 = vmatprep.subr.bf16.mxu1 %v7161_v50 }
 0x60a   : > { %6520 = vmatmul.mubr.msk.bf16.vlgmr.msra.gmra.mxu1 %vm1319_vm3, %v2568_v44 }
 0x60b   : > { %6531 = vmatprep.mubr.msk.bf16.mxu1 %vm7162_vm2, %v7161_v50 }
 0x63c   : > { %v7827_v47 = vpop.f32.mrf.mxu1 }
 0x63e   : > { %v6437_v49 = vpop.f32.mrf.mxu1 }
 0x640   : > { %v1921_v24 = vpop.f32.mrf.mxu1 }
 0x641   : > { %v7829_v15 = vpop.f32.mrf.mxu0 }
 0x642   : > { %v2212_v53 = vpack.c.bf16 %v7827_v47, %v7829_v15  ;;  %v6438_v19 = vpop.f32.mrf.mxu1  ;;  %v1313_v15 = vld [vmem:[%s7343_s23 + $0x8] sm:$0xff] }
 0x643   : > { %v6431_v29 = vpop.f32.mrf.mxu0 }
 0x645   : > { %v1873_v46 = vpop.f32.mrf.mxu0 }
 0x647   : > { %v6432_v35 = vpop.f32.mrf.mxu0 }
 0x649   : > { %v7833_v55 = vpop.f32.mrf.mxu0 }
 0x64b   : > { %v6443_v56 = vpop.f32.mrf.mxu0 }
 0x64d   : > { %v1969_v40 = vpop.f32.mrf.mxu0 }
 0x64f   : > { %v6444_v57 = vpop.f32.mrf.mxu0 }
 0x651   : > { %v7835_v51 = vpop.f32.mrf.mxu0 }
 0x653   : > { %v6455_v59 = vpop.f32.mrf.mxu0 }
 0x655   : > { %v2065_v60 = vpop.f32.mrf.mxu0 }
 0x657   : > { %v6456_v39 = vpop.f32.mrf.mxu0 }
 0x671   : > { %v7837_v54 = vpop.f32.mrf.mxu1 }
 0x672   : > { %v2213_v58 = vpack.c.bf16 %v7837_v54, %v7833_v55  ;;  %v3117_v55 = vpack.c.bf16 %v1313_v15, %v1313_v15 }
 0x673   : > { %v6449_v61 = vpop.f32.mrf.mxu1 }
 0x675   : > { %v2017_v37 = vpop.f32.mrf.mxu1 }
 0x677   : > { %v6450_v45 = vpop.f32.mrf.mxu1 }
 0x679   : > { %v7841_v43 = vpop.f32.mrf.mxu1 }
 0x67a   : > { %v2214_v48 = vpack.c.bf16 %v7841_v43, %v7835_v51  ;;  %v7845_v0 = vpop.f32.mrf.mxu0  ;;  %v3131_v51 = vsel %vm1832_vm4, %v3117_v55, 0 }
 0x67b   : > { %v6461_v1 = vpop.f32.mrf.mxu1 }
 0x67c   : > { %v6467_v3 = vpop.f32.mrf.mxu0 }
 0x67d   : > { %v2113_v52 = vpop.f32.mrf.mxu1 }
 0x67e   : > { %v2161_v8 = vpop.f32.mrf.mxu0 }
 0x67f   : > { %v6462_v63 = vpop.f32.mrf.mxu1 }
 0x680   : > { %v6468_v9 = vpop.f32.mrf.mxu0 }
 0x682   : > { %v2261_v12 = vpop.f32.mrf.mxu0 }
 0x683   : > { %v2617_v13 = vmul.f32 0.35355338, %v2261_v12 }
 0x684   : > { %v6479_v5 = vpop.f32.mrf.mxu0 }
 0x685   : > { %v7848_v16 = vadd.f32 %v7648_v36, %v2617_v13 }
 0x686   : > { %v2264_v18 = vpop.f32.mrf.mxu0 }
 0x687   : > { %v2633_v20 = vsel %vm1319_vm3, %v7848_v16, -inf }
 0x688   : > { %2634 = vmax.xlane.f32.xlu0 %v2633_v20  ;;  %v6480_v21 = vpop.f32.mrf.mxu0 }
 0x68a   : > { %v2361_v23 = vpop.f32.mrf.mxu0 }
 0x68b   : > { %v2619_v25 = vmul.f32 0.35355338, %v2361_v23 }
 0x68c   : > { %v6491_v30 = vpop.f32.mrf.mxu0 }
 0x68d   : > { %v7853_v14 = vadd.f32 %v7648_v36, %v2619_v25 }
 0x68e   : > { %v2364_v32 = vpop.f32.mrf.mxu0 }
 0x68f   : > { %v2639_v22 = vsel %vm1319_vm3, %v7853_v14, -inf }
 0x690   : > { %2640 = vmax.xlane.f32.xlu0 %v2639_v22  ;;  %v6492_v28 = vpop.f32.mrf.mxu0 }
 0x692   : > { %v2461_v33 = vpop.f32.mrf.mxu0 }
 0x693   : > { %v2621_v61 = vmul.f32 0.35355338, %v2461_v33 }
 0x694   : > { %v6503_v17 = vpop.f32.mrf.mxu0 }
 0x695   : > { %v2629_v63 = vadd.f32 %v7648_v36, %v2621_v61 }
 0x696   : > { %v2464_v34 = vpop.f32.mrf.mxu0 }
 0x697   : > { %v2645_v5 = vsel %vm1319_vm3, %v2629_v63, -inf }
 0x698   : > { %v6504_v38 = vpop.f32.mrf.mxu0 }
 0x69a   : > { %v2561_v31 = vpop.f32.mrf.mxu0 }
 0x69b   : > { %v2623_v52 = vmul.f32 0.35355338, %v2561_v31 }
 0x69c   : > { %v6515_v26 = vpop.f32.mrf.mxu0 }
 0x69d   : > { %v2631_v18 = vadd.f32 %v7648_v36, %v2623_v52 }
 0x69e   : > { %v2564_v41 = vpop.f32.mrf.mxu0 }
 0x69f   : > { %v2651_v30 = vsel %vm1319_vm3, %v2631_v18, -inf }
 0x6a0   : > { %v6516_v42 = vpop.f32.mrf.mxu0 }
 0x6aa   : > { %v7857_v44 = vpop.f32.mrf.mxu1 }
 0x6ab   : > { %v2215_v49 = vpack.c.bf16 %v7857_v44, %v7845_v0 }
 0x6ac   : > { %v6473_v24 = vpop.f32.mrf.mxu1 }
 0x6ae   : > { %v2209_v19 = vpop.f32.mrf.mxu1 }
 0x6b0   : > { %v6474_v29 = vpop.f32.mrf.mxu1 }
 0x6b2   : > { %v2311_v46 = vpop.f32.mrf.mxu1 }
 0x6b3   : > { %v2618_v35 = vmul.f32 0.35355338, %v2311_v46 }
 0x6b4   : > { %v6485_v56 = vpop.f32.mrf.mxu1 }
 0x6b5   : > { %v2626_v40 = vadd.f32 %v7648_v36, %v2618_v35 }
 0x6b6   : > { %v2314_v57 = vpop.f32.mrf.mxu1 }
 0x6b7   : > { %v2636_v59 = vsel %vm1319_vm3, %v2626_v40, -inf }
 0x6b8   : > { %2637 = vmax.xlane.f32.xlu1 %v2636_v59  ;;  %v6486_v60 = vpop.f32.mrf.mxu1 }
 0x6ba   : > { %v2411_v39 = vpop.f32.mrf.mxu1 }
 0x6bb   : > { %v2620_v37 = vmul.f32 0.35355338, %v2411_v39 }
 0x6bc   : > { %v6497_v45 = vpop.f32.mrf.mxu1 }
 0x6bd   : > { %v7864_v1 = vadd.f32 %v7648_v36, %v2620_v37 }
 0x6be   : > { %v2414_v3 = vpop.f32.mrf.mxu1 }
 0x6bf   : > { %v2642_v8 = vsel %vm1319_vm3, %v7864_v1, -inf }
 0x6c0   : > { %v6498_v9 = vpop.f32.mrf.mxu1  ;;  %2643 = vmax.xlane.f32.xlu0 %v2642_v8 }
 0x6c2   : > { %v2511_v12 = vpop.f32.mrf.mxu1 }
 0x6c3   : > { %v2622_v13 = vmul.f32 0.35355338, %v2511_v12 }
 0x6c4   : > { %v6509_v20 = vpop.f32.mrf.mxu1  ;;  %2646 = vmax.xlane.f32.xlu0 %v2645_v5 }
 0x6c5   : > { %v7872_v21 = vadd.f32 %v7648_v36, %v2622_v13 }
 0x6c6   : > { %v2514_v23 = vpop.f32.mrf.mxu1 }
 0x6c7   : > { %v2648_v25 = vsel %vm1319_vm3, %v7872_v21, -inf }
 0x6c8   : > { %2649 = vmax.xlane.f32.xlu1 %v2648_v25  ;;  %v6510_v32 = vpop.f32.mrf.mxu1  ;;  %2652 = vmax.xlane.f32.xlu0 %v2651_v30 }
 0x6ca   : > { %v2611_v22 = vpop.f32.mrf.mxu1 }
 0x6cb   : > { %v2624_v34 = vmul.f32 0.35355338, %v2611_v22 }
 0x6cc   : > { %v6521_v28 = vpop.f32.mrf.mxu1 }
 0x6cd   : > { %v7884_v38 = vadd.f32 %v7648_v36, %v2624_v34 }
 0x6ce   : > { %v2614_v33 = vpop.f32.mrf.mxu1 }
 0x6cf   : > { %v2654_v31 = vsel %vm1319_vm3, %v7884_v38, -inf }
 0x6d0   : > { %v6522_v17 = vpop.f32.mrf.mxu1 }
 0x6d9   : > { %2777 = vrot.lane.b32.xlu1 %v7564_v62, %s7167_s3 }
 0x6dd   : > { %2825 = vrot.lane.b32.xlu1 %v7567_v2, %s7167_s3 }
 0x6de   : > { %2729 = vrot.lane.b32.xlu0 %v7561_v27, %s7167_s3 }
 0x701   : > { %2655 = vmax.xlane.f32.xlu1 %v2654_v31 }
 0x711   : > { %v2635_v26 = vpop.xlane.xlu0 %2634 }
 0x712   : > { %v2657_v41 = vsub.f32 %v7848_v16, %v2635_v26  ;;  %2873 = vrot.lane.b32.xlu1 %v7573_v6, %s7167_s3 }
 0x714   : > { %v2665_v42 = vmul.f32 1.442695, %v2657_v41 }
 0x716   : > { %6978 = vpow2.f32 %v2665_v42 }
 0x719   : > { %v2641_v24 = vpop.xlane.xlu0 %2640 }
 0x71a   : > { %v2659_v19 = vsub.f32 %v7853_v14, %v2641_v24 }
 0x71c   : > { %v2669_v29 = vmul.f32 1.442695, %v2659_v19 }
 0x71e   : > { %6980 = vpow2.f32 %v2669_v29 }
 0x723   : > { %v7892_v46 = vpop.eup %6978 }
 0x724   : > { %v2681_v36 = vsel %vm1319_vm3, %v7892_v46, 0.0 }
 0x725   : > { %2682 = vadd.xlane.f32.xlu0 %v2681_v36 }
 0x72b   : > { %v7896_v35 = vpop.eup %6980 }
 0x72c   : > { %v2687_v16 = vsel %vm1319_vm3, %v7896_v35, 0.0 }
 0x72d   : > { %2688 = vadd.xlane.f32.xlu0 %v2687_v16 }
 0x741   : > { %v2638_v56 = vpop.xlane.xlu1 %2637 }
 0x742   : > { %v2658_v57 = vsub.f32 %v2626_v40, %v2638_v56 }
 0x743   : > { %2921 = vrot.lane.b32.xlu0 %v7569_v4, %s7167_s3 }
 0x744   : > { %v2667_v14 = vmul.f32 1.442695, %v2658_v57 }
 0x746   : > { %6982 = vpow2.f32 %v2667_v14 }
 0x749   : > { %v2644_v59 = vpop.xlane.xlu0 %2643 }
 0x74a   : > { %v2660_v25 = vsub.f32 %v7864_v1, %v2644_v59 }
 0x74c   : > { %v2671_v30 = vmul.f32 1.442695, %v2660_v25 }
 0x74d   : > { %v2647_v60 = vpop.xlane.xlu0 %2646 }
 0x74e   : > { %v2661_v39 = vsub.f32 %v2629_v63, %v2647_v60 }
 0x750   : > { %v2673_v61 = vmul.f32 1.442695, %v2661_v39 }
 0x751   : > { %v2650_v37 = vpop.xlane.xlu1 %2649  ;;  %v2653_v45 = vpop.xlane.xlu0 %2652 }
 0x752   : > { %6984 = vpow2.f32 %v2673_v61  ;;  %v2663_v3 = vsub.f32 %v2631_v18, %v2653_v45  ;;  %v2662_v32 = vsub.f32 %v7872_v21, %v2650_v37 }
 0x753   : > { %v7902_v52 = vpop.eup %6982 }
 0x754   : > { %v2677_v8 = vmul.f32 1.442695, %v2663_v3  ;;  %v2684_v9 = vsel %vm1319_vm3, %v7902_v52, 0.0  ;;  %v2675_v22 = vmul.f32 1.442695, %v2662_v32 }
 0x755   : > { %2685 = vadd.xlane.f32.xlu1 %v2684_v9  ;;  %v2778_v40 = vpop.permute.xlu1 %2777  ;;  %v2730_v12 = vpop.permute.xlu0 %2729 }
 0x756   : > { %v2783_v13 = vsel %vm1832_vm4, %v2778_v40, 0  ;;  %v2735_v5 = vsel %vm1832_vm4, %v2730_v12, 0  ;;  %6986 = vpow2.f32 %v2677_v8 }
 0x757   : > { %6524 = vmatpush3.bf16.msra.mxu0 %v2735_v5  ;;  %6530 = vmatpush3.bf16.msra.mxu1 %v2783_v13  ;;  %6988 = vpow2.f32 %v2671_v30 }
 0x758   : > { %6535 = vmatprep.subr.bf16.mxu0 %v7161_v50  ;;  %6541 = vmatprep.subr.bf16.mxu1 %v7161_v50  ;;  %6990 = vpow2.f32 %v2675_v22 }
 0x759   : > { %v2826_v1 = vpop.permute.xlu1 %2825 }
 0x75a   : > { %v2831_v16 = vsel %vm1832_vm4, %v2826_v1, 0 }
 0x75f   : > { %v7910_v63 = vpop.eup %6984 }
 0x760   : > { %v2693_v18 = vsel %vm1319_vm3, %v7910_v63, 0.0 }
 0x762   : > { %2694 = vadd.xlane.f32.xlu0 %v2693_v18 }
 0x763   : > { %v7914_v20 = vpop.eup %6986 }
 0x764   : > { %v2699_v23 = vsel %vm1319_vm3, %v7914_v20, 0.0  ;;  %v7928_v28 = vpop.eup %6988 }
 0x765   : > { %v2690_v21 = vsel %vm1319_vm3, %v7928_v28, 0.0  ;;  %v7934_v33 = vpop.eup %6990 }
 0x766   : > { %2700 = vadd.xlane.f32.xlu0 %v2699_v23  ;;  %2969 = vrot.lane.b32.xlu1 %v7579_v10, %s7167_s3  ;;  %v2696_v26 = vsel %vm1319_vm3, %v7934_v33, 0.0 }
 0x77c   : > { %3017 = vrot.lane.b32.xlu0 %v7575_v7, %s7167_s3 }
 0x780   : > { %3280 = vrot.lane.b32.xlu0 %v7561_v27, %s7168_s9 }
 0x784   : > { %3278 = vrot.lane.b32.xlu0 %v7561_v27, %s7169_s18 }
 0x788   : > { %3380 = vrot.lane.b32.xlu0 %v7567_v2, %s7168_s9 }
 0x78a   : > { %v2656_v17 = vpop.xlane.xlu1 %2655  ;;  %2691 = vadd.xlane.f32.xlu1 %v2690_v21 }
 0x78b   : > { %v2664_v34 = vsub.f32 %v7884_v38, %v2656_v17 }
 0x78c   : > { %3378 = vrot.lane.b32.xlu0 %v7567_v2, %s7169_s18 }
 0x78d   : > { %v2679_v31 = vmul.f32 1.442695, %v2664_v34 }
 0x78e   : > { %2697 = vadd.xlane.f32.xlu1 %v2696_v26 }
 0x78f   : > { %6992 = vpow2.f32 %v2679_v31  ;;  %v1312_v31 = vld [vmem:[%s7343_s23] sm:$0xff] }
 0x790   : > { %3480 = vrot.lane.b32.xlu0 %v7569_v4, %s7168_s9 }
 0x794   : > { %3478 = vrot.lane.b32.xlu0 %v7569_v4, %s7169_s18 }
 0x798   : > { %3580 = vrot.lane.b32.xlu0 %v7575_v7, %s7168_s9 }
 0x79c   : > { %v7947_v41 = vpop.eup %6992  ;;  %3578 = vrot.lane.b32.xlu0 %v7575_v7, %s7169_s18 }
 0x79d   : > { %v2702_v38 = vsel %vm1319_vm3, %v7947_v41, 0.0 }
 0x79e   : > { %2703 = vadd.xlane.f32.xlu1 %v2702_v38 }
 0x7ae   : > { %v2683_v42 = vpop.xlane.xlu0 %2682 }
 0x7af   : > { %6994 = vrcp.f32 %v2683_v42  ;;  %3065 = vrot.lane.b32.xlu1 %v7584_v11, %s7167_s3  ;;  %v2216_v42 = vpack.c.bf16 %v1312_v31, %v1312_v31 }
 0x7b3   : > { %3330 = vrot.lane.b32.xlu1 %v7564_v62, %s7168_s9 }
 0x7b6   : > { %v2689_v24 = vpop.xlane.xlu0 %2688 }
 0x7b7   : > { %6996 = vrcp.f32 %v2689_v24  ;;  %3328 = vrot.lane.b32.xlu1 %v7564_v62, %s7169_s18 }
 0x7ba   : > { %v2922_v57 = vpop.permute.xlu0 %2921 }
 0x7bb   : > { %3430 = vrot.lane.b32.xlu1 %v7573_v6, %s7168_s9  ;;  %v2927_v59 = vsel %vm1832_vm4, %v2922_v57, 0 }
 0x7bc   : > { %v6995_v19 = vpop.eup %6994 }
 0x7bd   : > { %v2713_v29 = vmul.f32 %v6995_v19, %v7892_v46 }
 0x7bf   : > { %3428 = vrot.lane.b32.xlu1 %v7573_v6, %s7169_s18  ;;  %v2721_v36 = vpack.c.bf16 %v2713_v29, %v2713_v29 }
 0x7c1   : > { %6526 = vmatmul.mubr.msk.bf16.vlgmr.msra.gmra.mxu0 %vm1319_vm3, %v2721_v36 }
 0x7c2   : > { %6536 = vmatpush3.bf16.msra.mxu0 %v2831_v16  ;;  %6537 = vmatprep.mubr.msk.bf16.mxu0 %vm7162_vm2, %v7161_v50 }
 0x7c3   : > { %3530 = vrot.lane.b32.xlu1 %v7579_v10, %s7168_s9  ;;  %6547 = vmatprep.subr.bf16.mxu0 %v7161_v50 }
 0x7c4   : > { %v6997_v56 = vpop.eup %6996 }
 0x7c5   : > { %v2715_v46 = vmul.f32 %v6997_v56, %v7896_v35  ;;  %v2874_v35 = vpop.permute.xlu1 %2873 }
 0x7c6   : > { %v2879_v8 = vsel %vm1832_vm4, %v2874_v35, 0 }
 0x7c7   : > { %3528 = vrot.lane.b32.xlu1 %v7579_v10, %s7169_s18  ;;  %v2723_v14 = vpack.c.bf16 %v2715_v46, %v2715_v46 }
 0x7c9   : > { %6538 = vmatmul.mubr.msk.bf16.vlgmr.msra.gmra.mxu0 %vm1319_vm3, %v2723_v14 }
 0x7ca   : > { %6548 = vmatpush3.bf16.msra.mxu0 %v2927_v59  ;;  %6549 = vmatprep.mubr.msk.bf16.mxu0 %vm7162_vm2, %v7161_v50 }
 0x7cb   : > { %3630 = vrot.lane.b32.xlu1 %v7584_v11, %s7168_s9  ;;  %6559 = vmatprep.subr.bf16.mxu0 %v7161_v50 }
 0x7cf   : > { %3628 = vrot.lane.b32.xlu1 %v7584_v11, %s7169_s18 }
 0x7de   : > { %v2686_v60 = vpop.xlane.xlu1 %2685 }
 0x7df   : > { %6998 = vrcp.f32 %v2686_v60 }
 0x7e2   : > { %v2970_v25 = vpop.permute.xlu1 %2969 }
 0x7e3   : > { %v2975_v17 = vsel %vm1832_vm4, %v2970_v25, 0 }
 0x7eb   : > { %v2695_v39 = vpop.xlane.xlu0 %2694 }
 0x7ec   : > { %v6999_v61 = vpop.eup %6998  ;;  %7000 = vrcp.f32 %v2695_v39 }
 0x7ed   : > { %v2714_v37 = vmul.f32 %v6999_v61, %v7902_v52 }
 0x7ef   : > { %v2701_v45 = vpop.xlane.xlu0 %2700  ;;  %v2722_v3 = vpack.c.bf16 %v2714_v37, %v2714_v37 }
 0x7f0   : > { %7002 = vrcp.f32 %v2701_v45 }
 0x7f1   : > { %6532 = vmatmul.mubr.msk.bf16.vlgmr.msra.gmra.mxu1 %vm1319_vm3, %v2722_v3 }
 0x7f2   : > { %6542 = vmatpush3.bf16.msra.mxu1 %v2879_v8  ;;  %6543 = vmatprep.mubr.msk.bf16.mxu1 %vm7162_vm2, %v7161_v50 }
 0x7f3   : > { %6553 = vmatprep.subr.bf16.mxu1 %v7161_v50  ;;  %v3018_v12 = vpop.permute.xlu0 %3017 }
 0x7f4   : > { %v3023_v52 = vsel %vm1832_vm4, %v3018_v12, 0 }
 0x7f7   : > { %v3281_v25 = vpop.permute.xlu0 %3280 }
 0x7f9   : > { %v7001_v9 = vpop.eup %7000 }
 0x7fa   : > { %v2717_v40 = vmul.f32 %v7001_v9, %v7910_v63 }
 0x7fc   : > { %v2725_v13 = vpack.c.bf16 %v2717_v40, %v2717_v40 }
 0x7fd   : > { %v7003_v5 = vpop.eup %7002 }
 0x7fe   : > { %6550 = vmatmul.mubr.msk.bf16.vlgmr.msra.gmra.mxu0 %vm1319_vm3, %v2725_v13  ;;  %v2719_v18 = vmul.f32 %v7003_v5, %v7914_v20 }
 0x7ff   : > { %6560 = vmatpush3.bf16.msra.mxu0 %v3023_v52  ;;  %6561 = vmatprep.mubr.msk.bf16.mxu0 %vm7162_vm2, %v7161_v50 }
 0x800   : > { %v2727_v23 = vpack.c.bf16 %v2719_v18, %v2719_v18  ;;  %6847 = vmatprep.subr.msk.bf16.mxu0 %vm1832_vm4, %v3117_v55 }
 0x806   : > { %6562 = vmatmul.mubr.msk.bf16.vlgmr.msra.gmra.mxu0 %vm1319_vm3, %v2727_v23 }
 0x807   : > { %6572 = vmatpush3.bf16.msra.mxu0 %v3131_v51 }
 0x808   : > { %6591 = vmatprep.subr.bf16.mxu0 %v7161_v50 }
 0x813   : > { %v2692_v30 = vpop.xlane.xlu1 %2691 }
 0x814   : > { %7004 = vrcp.f32 %v2692_v30 }
 0x817   : > { %v2698_v63 = vpop.xlane.xlu1 %2697 }
 0x818   : > { %7006 = vrcp.f32 %v2698_v63 }
 0x821   : > { %v7005_v32 = vpop.eup %7004 }
 0x822   : > { %v2716_v22 = vmul.f32 %v7005_v32, %v7928_v28 }
 0x824   : > { %v2724_v1 = vpack.c.bf16 %v2716_v22, %v2716_v22  ;;  %v3286_v22 = vsel %vm1319_vm3, %v3281_v25, 0 }
 0x825   : > { %v7007_v21 = vpop.eup %7006 }
 0x826   : > { %6544 = vmatmul.mubr.msk.bf16.vlgmr.msra.gmra.mxu1 %vm1319_vm3, %v2724_v1  ;;  %v2718_v34 = vmul.f32 %v7007_v21, %v7934_v33  ;;  %v3211_v33 = vsel %vm1832_vm4, %v2216_v42, 0 }
 0x827   : > { %6554 = vmatpush3.bf16.msra.mxu1 %v2975_v17  ;;  %v2704_v20 = vpop.xlane.xlu1 %2703  ;;  %6555 = vmatprep.mubr.msk.bf16.mxu1 %vm7162_vm2, %v7161_v50 }
 0x828   : > { %7008 = vrcp.f32 %v2704_v20  ;;  %6565 = vmatprep.subr.bf16.mxu1 %v7161_v50  ;;  %v2726_v38 = vpack.c.bf16 %v2718_v34, %v2718_v34 }
 0x82b   : > { %v3066_v26 = vpop.permute.xlu1 %3065 }
 0x82c   : > { %v3071_v28 = vsel %vm1832_vm4, %v3066_v26, 0  ;;  %v3279_v26 = vpop.permute.xlu0 %3278 }
 0x82e   : > { %6556 = vmatmul.mubr.msk.bf16.vlgmr.msra.gmra.mxu1 %vm1319_vm3, %v2726_v38 }
 0x82f   : > { %6566 = vmatpush3.bf16.msra.mxu1 %v3071_v28  ;;  %6567 = vmatprep.mubr.msk.bf16.mxu1 %vm7162_vm2, %v7161_v50  ;;  %v3331_v36 = vpop.permute.xlu1 %3330 }
 0x830   : > { %6848 = vmatprep.subr.msk.bf16.mxu1 %vm1832_vm4, %v2216_v42  ;;  %v3336_v56 = vsel %vm1319_vm3, %v3331_v36, 0  ;;  %v3381_v38 = vpop.permute.xlu0 %3380 }
 0x833   : > { %v3329_v16 = vpop.permute.xlu1 %3328 }
 0x835   : > { %v7009_v24 = vpop.eup %7008 }
 0x836   : > { %v2720_v19 = vmul.f32 %v7009_v24, %v7947_v41 }
 0x837   : > { %v3431_v47 = vpop.permute.xlu1 %3430 }
 0x838   : > { %v2728_v29 = vpack.c.bf16 %v2720_v19, %v2720_v19  ;;  %v3436_v54 = vsel %vm1319_vm3, %v3431_v47, 0  ;;  %v3386_v47 = vsel %vm1319_vm3, %v3381_v38, 0 }
 0x83a   : > { %6568 = vmatmul.mubr.msk.bf16.vlgmr.msra.gmra.mxu1 %vm1319_vm3, %v2728_v29 }
 0x83b   : > { %6583 = vmatprep.mubr.msk.bf16.mxu1 %vm1319_vm3, %v2212_v53  ;;  %6582 = vmatpush3.bf16.msra.mxu1 %v3211_v33  ;;  %v3429_v53 = vpop.permute.xlu1 %3428  ;;  %v3379_v33 = vpop.permute.xlu0 %3378 }
 0x83c   : > { %6597 = vmatprep.subr.bf16.mxu1 %v7161_v50 }
 0x83f   : > { %v3481_v15 = vpop.permute.xlu0 %3480 }
 0x842   : > { %6584 = vmatmul.mubr.msk.bf16.vlgmr.msra.gmra.mxu1 %vm1319_vm3, %v2213_v58  ;;  %v3531_v58 = vpop.permute.xlu1 %3530 }
 0x843   : > { %6598 = vmatpush3.bf16.xpose.msra.mxu1 %v3336_v56  ;;  %6587 = vmatprep.mubr.msk.bf16.mxu1 %vm1319_vm3, %v2214_v48  ;;  %v3536_v48 = vsel %vm1319_vm3, %v3531_v58, 0 }
 0x844   : > { %6609 = vmatprep.subr.bf16.mxu1 %v7161_v50 }
 0x846   : > { %v3529_v43 = vpop.permute.xlu1 %3528 }
 0x84a   : > { %6588 = vmatmul.mubr.msk.bf16.gmra.mxu1 %vm1319_vm3, %v2215_v49  ;;  %v3631_v0 = vpop.permute.xlu1 %3630 }
 0x84b   : > { %6599 = vmatprep.mubr.msk.bf16.mxu1 %vm7162_vm2, %v7161_v50  ;;  %v3636_v44 = vsel %vm1319_vm3, %v3631_v0, 0 }
 0x84e   : > { %v3629_v49 = vpop.permute.xlu1 %3628 }
 0x852   : > { %6600 = vmatmul.mubr.msk.bf16.vlgmr.msra.gmra.mxu1 %vm1319_vm3, %v3329_v16 }
 0x853   : > { %6610 = vmatpush3.bf16.xpose.msra.mxu1 %v3436_v54  ;;  %6611 = vmatprep.mubr.msk.bf16.mxu1 %vm7162_vm2, %v7161_v50  ;;  %v3479_v54 = vpop.permute.xlu0 %3478 }
 0x854   : > { %6621 = vmatprep.subr.bf16.mxu1 %v7161_v50 }
 0x85a   : > { %6612 = vmatmul.mubr.msk.bf16.vlgmr.msra.gmra.mxu1 %vm1319_vm3, %v3429_v53 }
 0x85b   : > { %6622 = vmatpush3.bf16.xpose.msra.mxu1 %v3536_v48  ;;  %6623 = vmatprep.mubr.msk.bf16.mxu1 %vm7162_vm2, %v7161_v50 }
 0x85c   : > { %6633 = vmatprep.subr.bf16.mxu1 %v7161_v50 }
 0x862   : > { %6624 = vmatmul.mubr.msk.bf16.vlgmr.msra.gmra.mxu1 %vm1319_vm3, %v3529_v43  ;;  %v3486_v43 = vsel %vm1319_vm3, %v3481_v15, 0 }
 0x863   : > { %6634 = vmatpush3.bf16.xpose.msra.mxu1 %v3636_v44  ;;  %6635 = vmatprep.mubr.msk.bf16.mxu1 %vm7162_vm2, %v7161_v50  ;;  %v3581_v44 = vpop.permute.xlu0 %3580 }
 0x864   : > { %6645 = vmatprep.subr.bf16.mxu1 %v7161_v50 }
 0x86a   : > { %6636 = vmatmul.mubr.msk.bf16.vlgmr.msra.gmra.mxu1 %vm1319_vm3, %v3629_v49 }
 0x86b   : > { %6647 = vmatprep.mubr.msk.bf16.mxu1 %vm7162_vm2, %v7161_v50 }
 0x881   : > { %v2771_v41 = vpop.f32.mrf.mxu0 }
 0x883   : > { %v6527_v46 = vpop.f32.mrf.mxu0 }
 0x885   : > { %v2774_v57 = vpop.f32.mrf.mxu0 }
 0x886   : > { %v3586_v57 = vsel %vm1319_vm3, %v3581_v44, 0 }
 0x887   : > { %v6528_v14 = vpop.f32.mrf.mxu0 }
 0x888   : > { %v8093_v14 = vld [vmem:[%s8722_s17] ss:$0 sm:$0xff] }
 0x889   : > { %v2867_v59 = vpop.f32.mrf.mxu0 }
 0x88b   : > { %v6539_v35 = vpop.f32.mrf.mxu0 }
 0x88d   : > { %v2870_v60 = vpop.f32.mrf.mxu0 }
 0x88f   : > { %v6540_v39 = vpop.f32.mrf.mxu0 }
 0x8b1   : > { %v2819_v61 = vpop.f32.mrf.mxu1 }
 0x8b2   : > { %v3113_v37 = vpack.c.bf16 %v2819_v61, %v2771_v41 }
 0x8b3   : > { %v6533_v45 = vpop.f32.mrf.mxu1 }
 0x8b4   : > { %6573 = vmatprep.mubr.msk.bf16.mxu0 %vm1319_vm3, %v3113_v37  ;;  %v3579_v45 = vpop.permute.xlu0 %3578 }
 0x8b5   : > { %v2822_v3 = vpop.f32.mrf.mxu1 }
 0x8b7   : > { %v6534_v8 = vpop.f32.mrf.mxu1 }
 0x8be   : > { %v2963_v9 = vpop.f32.mrf.mxu0 }
 0x8c0   : > { %v6551_v40 = vpop.f32.mrf.mxu0 }
 0x8c2   : > { %v2966_v12 = vpop.f32.mrf.mxu0 }
 0x8c4   : > { %v6552_v13 = vpop.f32.mrf.mxu0 }
 0x8c6   : > { %v3059_v5 = vpop.f32.mrf.mxu0 }
 0x8c8   : > { %v6563_v52 = vpop.f32.mrf.mxu0 }
 0x8ca   : > { %v3062_v18 = vpop.f32.mrf.mxu0 }
 0x8cc   : > { %v6564_v23 = vpop.f32.mrf.mxu0 }
 0x8e6   : > { %v2915_v30 = vpop.f32.mrf.mxu1 }
 0x8e7   : > { %v3114_v63 = vpack.c.bf16 %v2915_v30, %v2867_v59 }
 0x8e8   : > { %v6545_v32 = vpop.f32.mrf.mxu1 }
 0x8e9   : > { %6574 = vmatmul.mubr.msk.bf16.vlgmr.msra.gmra.mxu0 %vm1319_vm3, %v3114_v63 }
 0x8ea   : > { %6592 = vmatpush3.bf16.xpose.msra.mxu0 %v3286_v22  ;;  %v2918_v1 = vpop.f32.mrf.mxu1 }
 0x8eb   : > { %6603 = vmatprep.subr.bf16.mxu0 %v7161_v50 }
 0x8ec   : > { %v6546_v21 = vpop.f32.mrf.mxu1 }
 0x8ee   : > { %v3011_v17 = vpop.f32.mrf.mxu1 }
 0x8ef   : > { %v3115_v20 = vpack.c.bf16 %v3011_v17, %v2963_v9 }
 0x8f0   : > { %v6557_v34 = vpop.f32.mrf.mxu1 }
 0x8f1   : > { %6577 = vmatprep.mubr.msk.bf16.mxu0 %vm1319_vm3, %v3115_v20 }
 0x8f2   : > { %v3014_v31 = vpop.f32.mrf.mxu1 }
 0x8f4   : > { %v6558_v28 = vpop.f32.mrf.mxu1 }
 0x8fa   : > { %v3107_v42 = vpop.f32.mrf.mxu1 }
 0x8fb   : > { %v3116_v24 = vpack.c.bf16 %v3107_v42, %v3059_v5 }
 0x8fc   : > { %v6569_v19 = vpop.f32.mrf.mxu1 }
 0x8fd   : > { %6578 = vmatmul.mubr.msk.bf16.gmra.mxu0 %vm1319_vm3, %v3116_v24 }
 0x8fe   : > { %v3110_v29 = vpop.f32.mrf.mxu1  ;;  %6593 = vmatprep.mubr.msk.bf16.mxu0 %vm7162_vm2, %v7161_v50 }
 0x900   : > { %v6570_v36 = vpop.f32.mrf.mxu1 }
 0x902   : > { %v8063_v16 = vpop.f32.mrf.mxu1 }
 0x904   : > { %v8065_v56 = vpop.f32.mrf.mxu1 }
 0x905   : > { %6594 = vmatmul.mubr.msk.bf16.vlgmr.msra.gmra.mxu0 %vm1319_vm3, %v3279_v26 }
 0x906   : > { %6604 = vmatpush3.bf16.xpose.msra.mxu0 %v3386_v47  ;;  %v8069_v53 = vpop.f32.mrf.mxu1  ;;  %6605 = vmatprep.mubr.msk.bf16.mxu0 %vm7162_vm2, %v7161_v50 }
 0x907   : > { %6615 = vmatprep.subr.bf16.mxu0 %v7161_v50 }
 0x908   : > { %v8074_v55 = vpop.f32.mrf.mxu1 }
 0x90a   : > { %v8076_v51 = vpop.f32.mrf.mxu1 }
 0x90c   : > { %v8078_v58 = vpop.f32.mrf.mxu1 }
 0x90d   : > { %6606 = vmatmul.mubr.msk.bf16.vlgmr.msra.gmra.mxu0 %vm1319_vm3, %v3379_v33 }
 0x90e   : > { %6616 = vmatpush3.bf16.xpose.msra.mxu0 %v3486_v43  ;;  %v8082_v48 = vpop.f32.mrf.mxu1  ;;  %6617 = vmatprep.mubr.msk.bf16.mxu0 %vm7162_vm2, %v7161_v50 }
 0x90f   : > { %6627 = vmatprep.subr.bf16.mxu0 %v7161_v50 }
 0x910   : > { %v8087_v0 = vpop.f32.mrf.mxu1 }
 0x912   : > { %v3372_v49 = vpop.f32.mrf.mxu1 }
 0x913   : > { %v3679_v41 = vmul.f32 0.35355338, %v3372_v49 }
 0x914   : > { %v6601_v46 = vpop.f32.mrf.mxu1 }
 0x915   : > { %v3687_v59 = vadd.f32 %v8093_v14, %v3679_v41  ;;  %6618 = vmatmul.mubr.msk.bf16.vlgmr.msra.gmra.mxu0 %vm1319_vm3, %v3479_v54 }
 0x916   : > { %6628 = vmatpush3.bf16.xpose.msra.mxu0 %v3586_v57  ;;  %v3375_v35 = vpop.f32.mrf.mxu1  ;;  %6629 = vmatprep.mubr.msk.bf16.mxu0 %vm7162_vm2, %v7161_v50 }
 0x917   : > { %v3697_v60 = vsel %vm1319_vm3, %v3687_v59, -inf  ;;  %6639 = vmatprep.subr.bf16.mxu0 %v7161_v50 }
 0x918   : > { %3698 = vmax.xlane.f32.xlu1 %v3697_v60  ;;  %v6602_v39 = vpop.f32.mrf.mxu1 }
 0x91a   : > { %v3472_v61 = vpop.f32.mrf.mxu1 }
 0x91b   : > { %v3681_v37 = vmul.f32 0.35355338, %v3472_v61 }
 0x91c   : > { %v6613_v3 = vpop.f32.mrf.mxu1 }
 0x91d   : > { %v3689_v8 = vadd.f32 %v8093_v14, %v3681_v37  ;;  %6630 = vmatmul.mubr.msk.bf16.vlgmr.msra.gmra.mxu0 %vm1319_vm3, %v3579_v45 }
 0x91e   : > { %v3475_v9 = vpop.f32.mrf.mxu1  ;;  %6641 = vmatprep.mubr.msk.bf16.mxu0 %vm7162_vm2, %v7161_v50 }
 0x91f   : > { %v3703_v40 = vsel %vm1319_vm3, %v3689_v8, -inf }
 0x920   : > { %v6614_v12 = vpop.f32.mrf.mxu1  ;;  %3704 = vmax.xlane.f32.xlu0 %v3703_v40 }
 0x922   : > { %v3572_v13 = vpop.f32.mrf.mxu1 }
 0x923   : > { %v3683_v5 = vmul.f32 0.35355338, %v3572_v13 }
 0x924   : > { %v6625_v52 = vpop.f32.mrf.mxu1 }
 0x925   : > { %v3691_v18 = vadd.f32 %v8093_v14, %v3683_v5 }
 0x926   : > { %v3575_v23 = vpop.f32.mrf.mxu1 }
 0x927   : > { %v3709_v25 = vsel %vm1319_vm3, %v3691_v18, -inf }
 0x928   : > { %3710 = vmax.xlane.f32.xlu1 %v3709_v25  ;;  %v6626_v30 = vpop.f32.mrf.mxu1 }
 0x92a   : > { %v3672_v63 = vpop.f32.mrf.mxu1 }
 0x92b   : > { %v3685_v32 = vmul.f32 0.35355338, %v3672_v63 }
 0x92c   : > { %v6637_v22 = vpop.f32.mrf.mxu1 }
 0x92d   : > { %v3693_v1 = vadd.f32 %v8093_v14, %v3685_v32 }
 0x92e   : > { %v3675_v21 = vpop.f32.mrf.mxu1 }
 0x92f   : > { %v3715_v17 = vsel %vm1319_vm3, %v3693_v1, -inf }
 0x930   : > { %3716 = vmax.xlane.f32.xlu1 %v3715_v17  ;;  %v6638_v20 = vpop.f32.mrf.mxu1 }
 0x9a1   : > { %v3699_v34 = vpop.xlane.xlu1 %3698 }
 0x9a2   : > { %v3719_v31 = vsub.f32 %v3687_v59, %v3699_v34 }
 0x9a4   : > { %v3728_v26 = vmul.f32 1.442695, %v3719_v31 }
 0x9a6   : > { %7010 = vpow2.f32 %v3728_v26 }
 0x9a9   : > { %v3705_v28 = vpop.xlane.xlu0 %3704  ;;  %v8110_v24 = vpop.f32.mrf.mxu0 }
 0x9aa   : > { %v3721_v38 = vsub.f32 %v3689_v8, %v3705_v28 }
 0x9ab   : > { %v8114_v36 = vpop.f32.mrf.mxu0 }
 0x9ac   : > { %v3732_v42 = vmul.f32 1.442695, %v3721_v38 }
 0x9ad   : > { %v8118_v54 = vpop.f32.mrf.mxu0 }
 0x9ae   : > { %7012 = vpow2.f32 %v3732_v42 }
 0x9af   : > { %v8122_v41 = vpop.f32.mrf.mxu0 }
 0x9b1   : > { %v3711_v19 = vpop.xlane.xlu1 %3710 }
 0x9b2   : > { %v3723_v29 = vsub.f32 %v3691_v18, %v3711_v19 }
 0x9b3   : > { %v8112_v33 = vpop.eup %7010 }
 0x9b4   : > { %v3736_v47 = vmul.f32 1.442695, %v3723_v29  ;;  %v3745_v15 = vsel %vm1319_vm3, %v8112_v33, 0.0 }
 0x9b5   : > { %3746 = vadd.xlane.f32.xlu1 %v3745_v15 }
 0x9b6   : > { %7014 = vpow2.f32 %v3736_v47 }
 0x9b9   : > { %v3717_v43 = vpop.xlane.xlu1 %3716 }
 0x9ba   : > { %v3725_v44 = vsub.f32 %v3693_v1, %v3717_v43 }
 0x9bb   : > { %v8120_v49 = vpop.eup %7012 }
 0x9bc   : > { %v3740_v46 = vmul.f32 1.442695, %v3725_v44  ;;  %v3751_v57 = vsel %vm1319_vm3, %v8120_v49, 0.0 }
 0x9bd   : > { %v8126_v59 = vpop.f32.mrf.mxu0  ;;  %3752 = vadd.xlane.f32.xlu1 %v3751_v57 }
 0x9be   : > { %7016 = vpow2.f32 %v3740_v46 }
 0x9bf   : > { %v8128_v35 = vpop.f32.mrf.mxu0 }
 0x9c1   : > { %v8130_v60 = vpop.f32.mrf.mxu0 }
 0x9c3   : > { %v8132_v39 = vpop.eup %7014  ;;  %v8134_v61 = vpop.f32.mrf.mxu0 }
 0x9c4   : > { %v3757_v37 = vsel %vm1319_vm3, %v8132_v39, 0.0 }
 0x9c5   : > { %v3322_v45 = vpop.f32.mrf.mxu0  ;;  %3758 = vadd.xlane.f32.xlu1 %v3757_v37 }
 0x9c6   : > { %v3678_v3 = vmul.f32 0.35355338, %v3322_v45 }
 0x9c7   : > { %v6595_v8 = vpop.f32.mrf.mxu0 }
 0x9c8   : > { %v3686_v9 = vadd.f32 %v8093_v14, %v3678_v3 }
 0x9c9   : > { %v3325_v40 = vpop.f32.mrf.mxu0 }
 0x9ca   : > { %v3694_v12 = vsel %vm1319_vm3, %v3686_v9, -inf }
 0x9cb   : > { %v8140_v13 = vpop.eup %7016  ;;  %3695 = vmax.xlane.f32.xlu0 %v3694_v12  ;;  %v6596_v5 = vpop.f32.mrf.mxu0 }
 0x9cc   : > { %v3763_v52 = vsel %vm1319_vm3, %v8140_v13, 0.0 }
 0x9cd   : > { %v3422_v18 = vpop.f32.mrf.mxu0  ;;  %3764 = vadd.xlane.f32.xlu1 %v3763_v52 }
 0x9ce   : > { %v3680_v23 = vmul.f32 0.35355338, %v3422_v18 }
 0x9cf   : > { %v6607_v25 = vpop.f32.mrf.mxu0 }
 0x9d0   : > { %v3688_v30 = vadd.f32 %v8093_v14, %v3680_v23 }
 0x9d1   : > { %v3425_v63 = vpop.f32.mrf.mxu0 }
 0x9d2   : > { %v3700_v32 = vsel %vm1319_vm3, %v3688_v30, -inf }
 0x9d3   : > { %3701 = vmax.xlane.f32.xlu0 %v3700_v32  ;;  %v6608_v22 = vpop.f32.mrf.mxu0 }
 0x9d5   : > { %v3522_v1 = vpop.f32.mrf.mxu0 }
 0x9d6   : > { %v3682_v21 = vmul.f32 0.35355338, %v3522_v1 }
 0x9d7   : > { %v6619_v17 = vpop.f32.mrf.mxu0 }
 0x9d8   : > { %v8147_v20 = vadd.f32 %v8093_v14, %v3682_v21 }
 0x9d9   : > { %v3525_v34 = vpop.f32.mrf.mxu0 }
 0x9da   : > { %v3706_v31 = vsel %vm1319_vm3, %v8147_v20, -inf }
 0x9db   : > { %3707 = vmax.xlane.f32.xlu0 %v3706_v31  ;;  %v6620_v26 = vpop.f32.mrf.mxu0 }
 0x9dd   : > { %v3622_v28 = vpop.f32.mrf.mxu0 }
 0x9de   : > { %v3684_v38 = vmul.f32 0.35355338, %v3622_v28  ;;  %3838 = vrot.lane.b32.xlu1 %v7564_v62, %s7170_s27 }
 0x9df   : > { %v6631_v42 = vpop.f32.mrf.mxu0 }
 0x9e0   : > { %v8154_v19 = vadd.f32 %v8093_v14, %v3684_v38 }
 0x9e1   : > { %v3625_v29 = vpop.f32.mrf.mxu0 }
 0x9e2   : > { %3886 = vrot.lane.b32.xlu1 %v7567_v2, %s7170_s27  ;;  %v3712_v47 = vsel %vm1319_vm3, %v8154_v19, -inf }
 0x9e3   : > { %3713 = vmax.xlane.f32.xlu0 %v3712_v47  ;;  %v6632_v15 = vpop.f32.mrf.mxu0 }
 0x9e6   : > { %3934 = vrot.lane.b32.xlu1 %v7573_v6, %s7170_s27 }
 0x9ea   : > { %4030 = vrot.lane.b32.xlu1 %v7579_v10, %s7170_s27 }
 0x9ee   : > { %4126 = vrot.lane.b32.xlu1 %v7584_v11, %s7170_s27 }
 0x9f2   : > { %4267 = vrot.lane.b32.xlu1 %v7561_v27, %s7171_s5 }
 0x9f6   : > { %4317 = vrot.lane.b32.xlu1 %v7564_v62, %s7171_s5 }
 0x9f9   : > { %3790 = vrot.lane.b32.xlu0 %v7561_v27, %s7170_s27 }
 0x9fa   : > { %4419 = vrot.lane.b32.xlu1 %v7573_v6, %s7172_s6 }
 0x9fe   : > { %4417 = vrot.lane.b32.xlu1 %v7573_v6, %s7171_s5 }
 0xa02   : > { %4519 = vrot.lane.b32.xlu1 %v7579_v10, %s7172_s6 }
 0xa06   : > { %4517 = vrot.lane.b32.xlu1 %v7579_v10, %s7171_s5 }
 0xa0a   : > { %4619 = vrot.lane.b32.xlu1 %v7584_v11, %s7172_s6 }
 0xa0e   : > { %4617 = vrot.lane.b32.xlu1 %v7584_v11, %s7171_s5 }
 0xa3e   : > { %v3747_v43 = vpop.xlane.xlu1 %3746 }
 0xa3f   : > { %7018 = vrcp.f32 %v3747_v43 }
 0xa46   : > { %v3753_v44 = vpop.xlane.xlu1 %3752 }
 0xa47   : > { %7020 = vrcp.f32 %v3753_v44 }
 0xa4c   : > { %v7019_v45 = vpop.eup %7018 }
 0xa4d   : > { %v3775_v40 = vmul.f32 %v7019_v45, %v8112_v33 }
 0xa4e   : > { %v3759_v46 = vpop.xlane.xlu1 %3758 }
 0xa4f   : > { %7022 = vrcp.f32 %v3759_v46  ;;  %v3783_v23 = vpack.c.bf16 %v3775_v40, %v3775_v40 }
 0xa54   : > { %v3696_v57 = vpop.xlane.xlu0 %3695  ;;  %v7021_v25 = vpop.eup %7020 }
 0xa55   : > { %v3718_v37 = vsub.f32 %v3686_v9, %v3696_v57  ;;  %v3777_v33 = vmul.f32 %v7021_v25, %v8120_v49 }
 0xa56   : > { %v3765_v3 = vpop.xlane.xlu1 %3764 }
 0xa57   : > { %v3726_v8 = vmul.f32 1.442695, %v3718_v37  ;;  %v3785_v1 = vpack.c.bf16 %v3777_v33, %v3777_v33 }
 0xa59   : > { %7024 = vpow2.f32 %v3726_v8 }
 0xa5a   : > { %v3839_v12 = vpop.permute.xlu1 %3838  ;;  %7026 = vrcp.f32 %v3765_v3 }
 0xa5b   : > { %v3844_v5 = vsel %vm1832_vm4, %v3839_v12, 0 }
 0xa5c   : > { %6646 = vmatpush3.bf16.msra.mxu1 %v3844_v5  ;;  %v3702_v52 = vpop.xlane.xlu0 %3701 }
 0xa5d   : > { %v3720_v18 = vsub.f32 %v3688_v30, %v3702_v52  ;;  %6657 = vmatprep.subr.bf16.mxu1 %v7161_v50  ;;  %v7023_v30 = vpop.eup %7022 }
 0xa5e   : > { %v8187_v63 = vpop.permute.xlu1 %3886  ;;  %v3779_v49 = vmul.f32 %v7023_v30, %v8132_v39 }
 0xa5f   : > { %v3730_v9 = vmul.f32 1.442695, %v3720_v18  ;;  %6648 = vmatmul.mubr.msk.bf16.vlgmr.msra.gmra.mxu1 %vm1319_vm3, %v3783_v23  ;;  %v3892_v25 = vsel %vm1832_vm4, %v8187_v63, 0 }
 0xa60   : > { %6659 = vmatprep.mubr.msk.bf16.mxu1 %vm7162_vm2, %v7161_v50  ;;  %v3787_v29 = vpack.c.bf16 %v3779_v49, %v3779_v49 }
 0xa61   : > { %7028 = vpow2.f32 %v3730_v9 }
 0xa62   : > { %v3935_v32 = vpop.permute.xlu1 %3934 }
 0xa63   : > { %v3940_v22 = vsel %vm1832_vm4, %v3935_v32, 0 }
 0xa64   : > { %6658 = vmatpush3.bf16.msra.mxu1 %v3940_v22  ;;  %v3708_v26 = vpop.xlane.xlu0 %3707 }
 0xa65   : > { %6669 = vmatprep.subr.bf16.mxu1 %v7161_v50 }
 0xa66   : > { %v7025_v21 = vpop.eup %7024  ;;  %v4031_v17 = vpop.permute.xlu1 %4030 }
 0xa67   : > { %v4036_v34 = vsel %vm1832_vm4, %v4031_v17, 0  ;;  %6660 = vmatmul.mubr.msk.bf16.vlgmr.msra.gmra.mxu1 %vm1319_vm3, %v3785_v1  ;;  %v3742_v31 = vsel %vm1319_vm3, %v7025_v21, 0.0  ;;  %v7027_v42 = vpop.eup %7026 }
 0xa68   : > { %6670 = vmatpush3.bf16.msra.mxu1 %v4036_v34  ;;  %3743 = vadd.xlane.f32.xlu0 %v3742_v31  ;;  %v3781_v46 = vmul.f32 %v7027_v42, %v8140_v13  ;;  %v3722_v13 = vsub.f32 %v8147_v20, %v3708_v26 }
 0xa69   : > { %6671 = vmatprep.mubr.msk.bf16.mxu1 %vm7162_vm2, %v7161_v50  ;;  %6681 = vmatprep.subr.bf16.mxu1 %v7161_v50 }
 0xa6a   : > { %v4127_v28 = vpop.permute.xlu1 %4126  ;;  %v3789_v39 = vpack.c.bf16 %v3781_v46, %v3781_v46  ;;  %v3734_v37 = vmul.f32 1.442695, %v3722_v13 }
 0xa6b   : > { %v4132_v15 = vsel %vm1832_vm4, %v4127_v28, 0 }
 0xa6c   : > { %v3714_v38 = vpop.xlane.xlu0 %3713  ;;  %7030 = vpow2.f32 %v3734_v37 }
 0xa6d   : > { %v3724_v45 = vsub.f32 %v8154_v19, %v3714_v38 }
 0xa6e   : > { %v7029_v47 = vpop.eup %7028 }
 0xa6f   : > { %6672 = vmatmul.mubr.msk.bf16.vlgmr.msra.gmra.mxu1 %vm1319_vm3, %v3787_v29  ;;  %v3748_v43 = vsel %vm1319_vm3, %v7029_v47, 0.0  ;;  %v3738_v3 = vmul.f32 1.442695, %v3724_v45 }
 0xa70   : > { %6682 = vmatpush3.bf16.msra.mxu1 %v4132_v15  ;;  %3749 = vadd.xlane.f32.xlu0 %v3748_v43  ;;  %v3791_v44 = vpop.permute.xlu0 %3790  ;;  %v4268_v15 = vpop.permute.xlu1 %4267 }
 0xa71   : > { %v3796_v57 = vsel %vm1832_vm4, %v3791_v44, 0  ;;  %6683 = vmatprep.mubr.msk.bf16.mxu1 %vm7162_vm2, %v7161_v50  ;;  %6697 = vmatprep.subr.bf16.mxu1 %v7161_v50  ;;  %7032 = vpow2.f32 %v3738_v3 }
 0xa72   : > { %6640 = vmatpush3.bf16.msra.mxu0 %v3796_v57 }
 0xa73   : > { %6651 = vmatprep.subr.bf16.mxu0 %v7161_v50 }
 0xa77   : > { %6684 = vmatmul.mubr.msk.bf16.vlgmr.msra.gmra.mxu1 %vm1319_vm3, %v3789_v39  ;;  %v4318_v39 = vpop.permute.xlu1 %4317 }
 0xa78   : > { %6699 = vmatprep.mubr.msk.bf16.mxu1 %vm7162_vm2, %v7161_v50 }
 0xa79   : > { %v8218_v8 = vpop.eup %7030 }
 0xa7a   : > { %v3754_v40 = vsel %vm1319_vm3, %v8218_v8, 0.0 }
 0xa7e   : > { %v8222_v12 = vpop.eup %7032 }
 0xa7f   : > { %v3760_v5 = vsel %vm1319_vm3, %v8222_v12, 0.0 }
 0xa86   : > { %3982 = vrot.lane.b32.xlu0 %v7569_v4, %s7170_s27 }
 0xaa5   : > { %3755 = vadd.xlane.f32.xlu0 %v3754_v40 }
 0xaa9   : > { %3761 = vadd.xlane.f32.xlu0 %v3760_v5 }
 0xabf   : > { %4078 = vrot.lane.b32.xlu0 %v7575_v7, %s7170_s27 }
 0xac3   : > { %4269 = vrot.lane.b32.xlu0 %v7561_v27, %s7172_s6 }
 0xac7   : > { %4319 = vrot.lane.b32.xlu0 %v7564_v62, %s7172_s6 }
 0xacb   : > { %4369 = vrot.lane.b32.xlu0 %v7567_v2, %s7172_s6 }
 0xacf   : > { %4367 = vrot.lane.b32.xlu0 %v7567_v2, %s7171_s5 }
 0xad3   : > { %4469 = vrot.lane.b32.xlu0 %v7569_v4, %s7172_s6 }
 0xad7   : > { %4467 = vrot.lane.b32.xlu0 %v7569_v4, %s7171_s5 }
 0xadb   : > { %4569 = vrot.lane.b32.xlu0 %v7575_v7, %s7172_s6 }
 0xadf   : > { %4567 = vrot.lane.b32.xlu0 %v7575_v7, %s7171_s5 }
 0xaf1   : > { %v3744_v20 = vpop.xlane.xlu0 %3743 }
 0xaf2   : > { %7034 = vrcp.f32 %v3744_v20 }
 0xaf9   : > { %v3750_v19 = vpop.xlane.xlu0 %3749 }
 0xafa   : > { %7036 = vrcp.f32 %v3750_v19 }
 0xafd   : > { %v3983_v32 = vpop.permute.xlu0 %3982 }
 0xafe   : > { %v3988_v30 = vsel %vm1832_vm4, %v3983_v32, 0  ;;  %v1314_v32 = vld [vmem:[%s7343_s23 + $0x10] sm:$0xff] }
 0xaff   : > { %v7035_v52 = vpop.eup %7034 }
 0xb00   : > { %v3774_v18 = vmul.f32 %v7035_v52, %v7025_v21  ;;  %v4420_v52 = vpop.permute.xlu1 %4419 }
 0xb02   : > { %v3782_v23 = vpack.c.bf16 %v3774_v18, %v3774_v18 }
 0xb04   : > { %6642 = vmatmul.mubr.msk.bf16.vlgmr.msra.gmra.mxu0 %vm1319_vm3, %v3782_v23 }
 0xb05   : > { %6652 = vmatpush3.bf16.msra.mxu0 %v3892_v25  ;;  %6653 = vmatprep.mubr.msk.bf16.mxu0 %vm7162_vm2, %v7161_v50 }
 0xb06   : > { %6663 = vmatprep.subr.bf16.mxu0 %v7161_v50 }
 0xb07   : > { %v7037_v9 = vpop.eup %7036 }
 0xb08   : > { %v3776_v33 = vmul.f32 %v7037_v9, %v7029_v47  ;;  %v4418_v9 = vpop.permute.xlu1 %4417 }
 0xb0a   : > { %v3784_v22 = vpack.c.bf16 %v3776_v33, %v3776_v33 }
 0xb0c   : > { %6654 = vmatmul.mubr.msk.bf16.vlgmr.msra.gmra.mxu0 %vm1319_vm3, %v3784_v22  ;;  %v4178_v22 = vpack.c.bf16 %v1314_v32, %v1314_v32 }
 0xb0d   : > { %6664 = vmatpush3.bf16.msra.mxu0 %v3988_v30  ;;  %6665 = vmatprep.mubr.msk.bf16.mxu0 %vm7162_vm2, %v7161_v50  ;;  %v4425_v30 = vsel %vm1319_vm3, %v4420_v52, 0 }
 0xb0e   : > { %6675 = vmatprep.subr.bf16.mxu0 %v7161_v50 }
 0xb1f   : > { %v8255_v63 = vpop.f32.mrf.mxu1 }
 0xb21   : > { %v6649_v1 = vpop.f32.mrf.mxu1 }
 0xb22   : > { %v4520_v1 = vpop.permute.xlu1 %4519 }
 0xb23   : > { %v3883_v21 = vpop.f32.mrf.mxu1 }
 0xb25   : > { %v6650_v17 = vpop.f32.mrf.mxu1 }
 0xb26   : > { %v4518_v21 = vpop.permute.xlu1 %4517  ;;  %v4525_v17 = vsel %vm1319_vm3, %v4520_v1, 0 }
 0xb27   : > { %v8257_v34 = vpop.f32.mrf.mxu1 }
 0xb29   : > { %v6661_v31 = vpop.f32.mrf.mxu1 }
 0xb2a   : > { %v4620_v31 = vpop.permute.xlu1 %4619 }
 0xb2b   : > { %v3979_v26 = vpop.f32.mrf.mxu1 }
 0xb2c   : > { %v4625_v26 = vsel %vm1319_vm3, %v4620_v31, 0 }
 0xb2d   : > { %v6662_v49 = vpop.f32.mrf.mxu1 }
 0xb2e   : > { %v3756_v28 = vpop.xlane.xlu0 %3755  ;;  %v4618_v49 = vpop.permute.xlu1 %4617 }
 0xb2f   : > { %7038 = vrcp.f32 %v3756_v28  ;;  %v8259_v38 = vpop.f32.mrf.mxu1 }
 0xb31   : > { %v6673_v42 = vpop.f32.mrf.mxu1 }
 0xb32   : > { %v3762_v29 = vpop.xlane.xlu0 %3761 }
 0xb33   : > { %7040 = vrcp.f32 %v3762_v29  ;;  %v4075_v47 = vpop.f32.mrf.mxu1 }
 0xb35   : > { %v6674_v43 = vpop.f32.mrf.mxu1 }
 0xb36   : > { %v4079_v44 = vpop.permute.xlu0 %4078 }
 0xb37   : > { %v8261_v46 = vpop.f32.mrf.mxu1  ;;  %v4084_v23 = vsel %vm1832_vm4, %v4079_v44, 0 }
 0xb39   : > { %v6685_v57 = vpop.f32.mrf.mxu1 }
 0xb3a   : > { %v4270_v13 = vpop.permute.xlu0 %4269 }
 0xb3b   : > { %v4275_v37 = vsel %vm1319_vm3, %v4270_v13, 0  ;;  %v4171_v45 = vpop.f32.mrf.mxu1 }
 0xb3c   : > { %v7039_v3 = vpop.eup %7038  ;;  %6698 = vmatpush3.bf16.xpose.msra.mxu1 %v4275_v37 }
 0xb3d   : > { %v6686_v40 = vpop.f32.mrf.mxu1  ;;  %v3778_v5 = vmul.f32 %v7039_v3, %v8218_v8  ;;  %6703 = vmatprep.subr.bf16.mxu1 %v7161_v50 }
 0xb3e   : > { %v4320_v18 = vpop.permute.xlu0 %4319 }
 0xb3f   : > { %v3786_v20 = vpack.c.bf16 %v3778_v5, %v3778_v5  ;;  %v4325_v25 = vsel %vm1319_vm3, %v4320_v18, 0 }
 0xb40   : > { %v7041_v19 = vpop.eup %7040 }
 0xb41   : > { %6666 = vmatmul.mubr.msk.bf16.vlgmr.msra.gmra.mxu0 %vm1319_vm3, %v3786_v20  ;;  %v3780_v8 = vmul.f32 %v7041_v19, %v8222_v12  ;;  %v4192_v12 = vsel %vm1832_vm4, %v4178_v22, 0 }
 0xb42   : > { %6676 = vmatpush3.bf16.msra.mxu0 %v4084_v23  ;;  %6677 = vmatprep.mubr.msk.bf16.mxu0 %vm7162_vm2, %v7161_v50  ;;  %v4370_v43 = vpop.permute.xlu0 %4369 }
 0xb43   : > { %6700 = vmatmul.mubr.msk.bf16.vlgmr.msra.gmra.mxu1 %vm1319_vm3, %v4268_v15  ;;  %v3788_v33 = vpack.c.bf16 %v3780_v8, %v3780_v8  ;;  %6849 = vmatprep.subr.msk.bf16.mxu0 %vm1832_vm4, %v4178_v22  ;;  %v4375_v13 = vsel %vm1319_vm3, %v4370_v43, 0 }
 0xb44   : > { %6704 = vmatpush3.bf16.xpose.msra.mxu1 %v4325_v25  ;;  %6705 = vmatprep.mubr.msk.bf16.mxu1 %vm7162_vm2, %v7161_v50 }
 0xb45   : > { %6715 = vmatprep.subr.bf16.mxu1 %v7161_v50 }
 0xb46   : > { %v4368_v52 = vpop.permute.xlu0 %4367 }
 0xb49   : > { %6678 = vmatmul.mubr.msk.bf16.vlgmr.msra.gmra.mxu0 %vm1319_vm3, %v3788_v33 }
 0xb4a   : > { %6688 = vmatpush3.bf16.msra.mxu0 %v4192_v12 }
 0xb4b   : > { %6706 = vmatmul.mubr.msk.bf16.vlgmr.msra.gmra.mxu1 %vm1319_vm3, %v4318_v39  ;;  %6709 = vmatprep.subr.bf16.mxu0 %v7161_v50 }
 0xb4c   : > { %6716 = vmatpush3.bf16.xpose.msra.mxu1 %v4425_v30  ;;  %6717 = vmatprep.mubr.msk.bf16.mxu1 %vm7162_vm2, %v7161_v50  ;;  %v4470_v30 = vpop.permute.xlu0 %4469 }
 0xb4d   : > { %6727 = vmatprep.subr.bf16.mxu1 %v7161_v50 }
 0xb53   : > { %6718 = vmatmul.mubr.msk.bf16.vlgmr.msra.gmra.mxu1 %vm1319_vm3, %v4418_v9 }
 0xb54   : > { %6728 = vmatpush3.bf16.xpose.msra.mxu1 %v4525_v17  ;;  %6729 = vmatprep.mubr.msk.bf16.mxu1 %vm7162_vm2, %v7161_v50 }
 0xb55   : > { %6739 = vmatprep.subr.bf16.mxu1 %v7161_v50 }
 0xb5b   : > { %6730 = vmatmul.mubr.msk.bf16.vlgmr.msra.gmra.mxu1 %vm1319_vm3, %v4518_v21 }
 0xb5c   : > { %6740 = vmatpush3.bf16.xpose.msra.mxu1 %v4625_v26  ;;  %6741 = vmatprep.mubr.msk.bf16.mxu1 %vm7162_vm2, %v7161_v50 }
 0xb5d   : > { %6751 = vmatprep.subr.bf16.mxu1 %v7161_v50 }
 0xb63   : > { %6742 = vmatmul.mubr.msk.bf16.vlgmr.msra.gmra.mxu1 %vm1319_vm3, %v4618_v49 }
 0xb64   : > { %6753 = vmatprep.mubr.msk.bf16.mxu1 %vm7162_vm2, %v7161_v50 }
 0xbc4   : > { %v3832_v28 = vpop.f32.mrf.mxu0 }
 0xbc5   : > { %v4174_v42 = vpack.c.bf16 %v8255_v63, %v3832_v28  ;;  %v4468_v28 = vpop.permute.xlu0 %4467 }
 0xbc6   : > { %v6643_v29 = vpop.f32.mrf.mxu0 }
 0xbc7   : > { %6689 = vmatprep.mubr.msk.bf16.mxu0 %vm1319_vm3, %v4174_v42  ;;  %v4475_v29 = vsel %vm1319_vm3, %v4470_v30, 0  ;;  %v3248_v30 = vadd.f32 %v8065_v56, %v8114_v36 }
 0xbc8   : > { %v3835_v47 = vpop.f32.mrf.mxu0 }
 0xbca   : > { %v6644_v15 = vpop.f32.mrf.mxu0 }
 0xbcc   : > { %v3928_v44 = vpop.f32.mrf.mxu0 }
 0xbcd   : > { %v4175_v57 = vpack.c.bf16 %v8257_v34, %v3928_v44 }
 0xbce   : > { %v6655_v39 = vpop.f32.mrf.mxu0 }
 0xbcf   : > { %6690 = vmatmul.mubr.msk.bf16.vlgmr.msra.gmra.mxu0 %vm1319_vm3, %v4175_v57  ;;  %v4570_v39 = vpop.permute.xlu0 %4569 }
 0xbd0   : > { %6710 = vmatpush3.bf16.xpose.msra.mxu0 %v4375_v13  ;;  %v3931_v37 = vpop.f32.mrf.mxu0 }
 0xbd1   : > { %6721 = vmatprep.subr.bf16.mxu0 %v7161_v50 }
 0xbd2   : > { %v6656_v45 = vpop.f32.mrf.mxu0 }
 0xbd3   : > { %v4575_v45 = vsel %vm1319_vm3, %v4570_v39, 0 }
 0xc01   : > { %v4024_v63 = vpop.f32.mrf.mxu0 }
 0xc02   : > { %v4176_v3 = vpack.c.bf16 %v8259_v38, %v4024_v63 }
 0xc03   : > { %v6667_v40 = vpop.f32.mrf.mxu0  ;;  %v4311_v5 = vpop.f32.mrf.mxu1 }
 0xc04   : > { %v4667_v20 = vmul.f32 0.35355338, %v4311_v5  ;;  %6693 = vmatprep.mubr.msk.bf16.mxu0 %vm1319_vm3, %v4176_v3 }
 0xc05   : > { %v4027_v19 = vpop.f32.mrf.mxu0  ;;  %v6701_v34 = vpop.f32.mrf.mxu1 }
 0xc06   : > { %v8308_v18 = vadd.f32 %v8093_v14, %v4667_v20  ;;  %v4568_v34 = vpop.permute.xlu0 %4567 }
 0xc07   : > { %v6668_v23 = vpop.f32.mrf.mxu0  ;;  %v4314_v25 = vpop.f32.mrf.mxu1 }
 0xc08   : > { %v4683_v8 = vsel %vm1319_vm3, %v8308_v18, -inf }
 0xc09   : > { %v4120_v9 = vpop.f32.mrf.mxu0  ;;  %4684 = vmax.xlane.f32.xlu0 %v4683_v8  ;;  %v6702_v33 = vpop.f32.mrf.mxu1 }
 0xc0a   : > { %v4177_v38 = vpack.c.bf16 %v8261_v46, %v4120_v9 }
 0xc0b   : > { %v6679_v32 = vpop.f32.mrf.mxu0  ;;  %v4361_v22 = vpop.f32.mrf.mxu1 }
 0xc0c   : > { %v4668_v1 = vmul.f32 0.35355338, %v4361_v22  ;;  %6694 = vmatmul.mubr.msk.bf16.gmra.mxu0 %vm1319_vm3, %v4177_v38  ;;  %v3256_v32 = vadd.f32 %v8063_v16, %v8110_v24 }
 0xc0d   : > { %v4123_v12 = vpop.f32.mrf.mxu0  ;;  %v6707_v21 = vpop.f32.mrf.mxu1  ;;  %6711 = vmatprep.mubr.msk.bf16.mxu0 %vm7162_vm2, %v7161_v50 }
 0xc0e   : > { %v8317_v17 = vadd.f32 %v8093_v14, %v4668_v1  ;;  %v3259_v21 = vadd.f32 %v8069_v53, %v8118_v54 }
 0xc0f   : > { %v6680_v31 = vpop.f32.mrf.mxu0  ;;  %v4364_v26 = vpop.f32.mrf.mxu1 }
 0xc10   : > { %v4686_v49 = vsel %vm1319_vm3, %v8317_v17, -inf }
 0xc11   : > { %4687 = vmax.xlane.f32.xlu1 %v4686_v49  ;;  %v6708_v46 = vpop.f32.mrf.mxu1 }
 0xc13   : > { %v4461_v42 = vpop.f32.mrf.mxu1 }
 0xc14   : > { %v4670_v47 = vmul.f32 0.35355338, %v4461_v42  ;;  %6712 = vmatmul.mubr.msk.bf16.vlgmr.msra.gmra.mxu0 %vm1319_vm3, %v4368_v52 }
 0xc15   : > { %6722 = vmatpush3.bf16.xpose.msra.mxu0 %v4475_v29  ;;  %v6719_v15 = vpop.f32.mrf.mxu1  ;;  %6723 = vmatprep.mubr.msk.bf16.mxu0 %vm7162_vm2, %v7161_v50 }
 0xc16   : > { %v4678_v43 = vadd.f32 %v8093_v14, %v4670_v47  ;;  %6733 = vmatprep.subr.bf16.mxu0 %v7161_v50 }
 0xc17   : > { %v4464_v44 = vpop.f32.mrf.mxu1 }
 0xc18   : > { %v4692_v57 = vsel %vm1319_vm3, %v4678_v43, -inf }
 0xc19   : > { %4693 = vmax.xlane.f32.xlu0 %v4692_v57  ;;  %v6720_v13 = vpop.f32.mrf.mxu1 }
 0xc1b   : > { %v4561_v37 = vpop.f32.mrf.mxu1 }
 0xc1c   : > { %v4672_v63 = vmul.f32 0.35355338, %v4561_v37  ;;  %6724 = vmatmul.mubr.msk.bf16.vlgmr.msra.gmra.mxu0 %vm1319_vm3, %v4468_v28  ;;  %v3251_v28 = vadd.f32 %v8074_v55, %v8122_v41 }
 0xc1d   : > { %6734 = vmatpush3.bf16.xpose.msra.mxu0 %v4575_v45  ;;  %v6731_v3 = vpop.f32.mrf.mxu1  ;;  %6735 = vmatprep.mubr.msk.bf16.mxu0 %vm7162_vm2, %v7161_v50 }
 0xc1e   : > { %v4680_v40 = vadd.f32 %v8093_v14, %v4672_v63  ;;  %6745 = vmatprep.subr.bf16.mxu0 %v7161_v50 }
 0xc1f   : > { %v4564_v5 = vpop.f32.mrf.mxu1 }
 0xc20   : > { %v4698_v20 = vsel %vm1319_vm3, %v4680_v40, -inf }
 0xc21   : > { %4699 = vmax.xlane.f32.xlu1 %v4698_v20  ;;  %v6732_v19 = vpop.f32.mrf.mxu1 }
 0xc22   : > { %v3272_v19 = vadd.f32 %v8076_v51, %v8126_v59 }
 0xc23   : > { %v4661_v52 = vpop.f32.mrf.mxu1 }
 0xc24   : > { %v4674_v23 = vmul.f32 0.35355338, %v4661_v52  ;;  %6736 = vmatmul.mubr.msk.bf16.vlgmr.msra.gmra.mxu0 %vm1319_vm3, %v4568_v34  ;;  %v3264_v52 = vadd.f32 %v8078_v58, %v8128_v35 }
 0xc25   : > { %v6743_v25 = vpop.f32.mrf.mxu1  ;;  %6747 = vmatprep.mubr.msk.bf16.mxu0 %vm7162_vm2, %v7161_v50 }
 0xc26   : > { %v4682_v8 = vadd.f32 %v8093_v14, %v4674_v23 }
 0xc27   : > { %v4664_v9 = vpop.f32.mrf.mxu1 }
 0xc28   : > { %v4704_v33 = vsel %vm1319_vm3, %v4682_v8, -inf }
 0xc29   : > { %4705 = vmax.xlane.f32.xlu1 %v4704_v33  ;;  %v6744_v38 = vpop.f32.mrf.mxu1 }
 0xc2a   : > { %v3267_v38 = vadd.f32 %v8087_v0, %v8134_v61 }
 0xc8f   : > { %v6691_v22 = vpop.f32.mrf.mxu0 }
 0xc90   : > { %v8344_v1 = vadd.f32 %v6691_v22, %v3256_v32 }
 0xc91   : > { %v4228_v12 = vpop.f32.mrf.mxu0 }
 0xc92   : > { %v8348_v31 = vadd.f32 %v4228_v12, %v3248_v30  ;;  %v4685_v26 = vpop.xlane.xlu0 %4684 }
 0xc93   : > { %v4707_v49 = vsub.f32 %v8308_v18, %v4685_v26  ;;  %v6692_v46 = vpop.f32.mrf.mxu0 }
 0xc94   : > { %v8353_v16 = vadd.f32 %v6692_v46, %v3259_v21 }
 0xc95   : > { %v4715_v24 = vmul.f32 1.442695, %v4707_v49  ;;  %v4231_v42 = vpop.f32.mrf.mxu0 }
 0xc96   : > { %v8355_v56 = vadd.f32 %v4231_v42, %v3251_v28 }
 0xc97   : > { %7042 = vpow2.f32 %v4715_v24 }
 0xc9a   : > { %v4688_v36 = vpop.xlane.xlu1 %4687 }
 0xc9b   : > { %v4708_v29 = vsub.f32 %v8317_v17, %v4688_v36 }
 0xc9d   : > { %v4717_v53 = vmul.f32 1.442695, %v4708_v29 }
 0xc9f   : > { %7044 = vpow2.f32 %v4717_v53 }
 0xca2   : > { %v4694_v54 = vpop.xlane.xlu0 %4693 }
 0xca3   : > { %v4710_v47 = vsub.f32 %v4678_v43, %v4694_v54 }
 0xca4   : > { %v8358_v15 = vpop.eup %7042 }
 0xca5   : > { %v4721_v18 = vmul.f32 1.442695, %v4710_v47  ;;  %v4731_v55 = vsel %vm1319_vm3, %v8358_v15, 0.0 }
 0xca6   : > { %4732 = vadd.xlane.f32.xlu0 %v4731_v55 }
 0xca7   : > { %7046 = vpow2.f32 %v4721_v18 }
 0xcaa   : > { %v4700_v41 = vpop.xlane.xlu1 %4699 }
 0xcab   : > { %v4712_v44 = vsub.f32 %v4680_v40, %v4700_v41 }
 0xcac   : > { %v8362_v57 = vpop.eup %7044 }
 0xcad   : > { %v4725_v39 = vmul.f32 1.442695, %v4712_v44  ;;  %v4734_v17 = vsel %vm1319_vm3, %v8362_v57, 0.0 }
 0xcae   : > { %4735 = vadd.xlane.f32.xlu1 %v4734_v17 }
 0xcaf   : > { %7048 = vpow2.f32 %v4725_v39 }
 0xcb2   : > { %v4706_v13 = vpop.xlane.xlu1 %4705 }
 0xcb3   : > { %v4714_v43 = vsub.f32 %v4682_v8, %v4706_v13  ;;  %v3275_v8 = vadd.f32 %v8082_v48, %v8130_v60 }
 0xcb4   : > { %v8366_v37 = vpop.eup %7046 }
 0xcb5   : > { %v4729_v45 = vmul.f32 1.442695, %v4714_v43  ;;  %v4740_v63 = vsel %vm1319_vm3, %v8366_v37, 0.0 }
 0xcb6   : > { %4741 = vadd.xlane.f32.xlu1 %v4740_v63 }
 0xcb7   : > { %7050 = vpow2.f32 %v4729_v45 }
 0xcbc   : > { %v8370_v3 = vpop.eup %7048 }
 0xcbd   : > { %v4746_v40 = vsel %vm1319_vm3, %v8370_v3, 0.0 }
 0xcbe   : > { %4747 = vadd.xlane.f32.xlu1 %v4746_v40 }
 0xcc4   : > { %v8374_v5 = vpop.eup %7050 }
 0xcc5   : > { %v4752_v20 = vsel %vm1319_vm3, %v8374_v5, 0.0 }
 0xcc6   : > { %4753 = vadd.xlane.f32.xlu1 %v4752_v20 }
 0xccc   : > { %v6695_v34 = vpop.f32.mrf.mxu0 }
 0xccd   : > { %v8382_v23 = vadd.f32 %v6695_v34, %v3272_v19 }
 0xcce   : > { %v4244_v25 = vpop.f32.mrf.mxu0 }
 0xccf   : > { %v8386_v9 = vadd.f32 %v4244_v25, %v3264_v52 }
 0xcd0   : > { %v6696_v33 = vpop.f32.mrf.mxu0 }
 0xcd1   : > { %v8390_v32 = vadd.f32 %v6696_v33, %v3275_v8 }
 0xcd2   : > { %v4247_v22 = vpop.f32.mrf.mxu0 }
 0xcd3   : > { %v8392_v51 = vadd.f32 %v4247_v22, %v3267_v38 }
 0xcd4   : > { %v4411_v59 = vpop.f32.mrf.mxu0 }
 0xcd5   : > { %v4669_v30 = vmul.f32 0.35355338, %v4411_v59 }
 0xcd6   : > { %v6713_v58 = vpop.f32.mrf.mxu0 }
 0xcd7   : > { %v8395_v35 = vadd.f32 %v8093_v14, %v4669_v30  ;;  %4827 = vrot.lane.b32.xlu1 %v7564_v62, %s7173_s21 }
 0xcd8   : > { %v4414_v48 = vpop.f32.mrf.mxu0 }
 0xcd9   : > { %v4689_v60 = vsel %vm1319_vm3, %v8395_v35, -inf }
 0xcda   : > { %v6714_v0 = vpop.f32.mrf.mxu0  ;;  %4690 = vmax.xlane.f32.xlu0 %v4689_v60 }
 0xcdb   : > { %4875 = vrot.lane.b32.xlu1 %v7567_v2, %s7173_s21 }
 0xcdc   : > { %v4511_v61 = vpop.f32.mrf.mxu0 }
 0xcdd   : > { %v4671_v12 = vmul.f32 0.35355338, %v4511_v61 }
 0xcde   : > { %v6725_v21 = vpop.f32.mrf.mxu0 }
 0xcdf   : > { %v8404_v26 = vadd.f32 %v8093_v14, %v4671_v12  ;;  %4923 = vrot.lane.b32.xlu1 %v7573_v6, %s7173_s21 }
 0xce0   : > { %v4514_v49 = vpop.f32.mrf.mxu0 }
 0xce1   : > { %v4695_v62 = vsel %vm1319_vm3, %v8404_v26, -inf }
 0xce2   : > { %v6726_v46 = vpop.f32.mrf.mxu0  ;;  %4696 = vmax.xlane.f32.xlu0 %v4695_v62 }
 0xce3   : > { %5019 = vrot.lane.b32.xlu1 %v7579_v10, %s7173_s21 }
 0xce4   : > { %v4611_v28 = vpop.f32.mrf.mxu0 }
 0xce5   : > { %v4673_v2 = vmul.f32 0.35355338, %v4611_v28 }
 0xce6   : > { %v6737_v24 = vpop.f32.mrf.mxu0 }
 0xce7   : > { %v8413_v42 = vadd.f32 %v8093_v14, %v4673_v2  ;;  %5115 = vrot.lane.b32.xlu1 %v7584_v11, %s7173_s21 }
 0xce8   : > { %v4614_v36 = vpop.f32.mrf.mxu0 }
 0xce9   : > { %v4701_v6 = vsel %vm1319_vm3, %v8413_v42, -inf }
 0xcea   : > { %v6738_v29 = vpop.f32.mrf.mxu0  ;;  %4702 = vmax.xlane.f32.xlu0 %v4701_v6 }
 0xd00   : > { %4779 = vrot.lane.b32.xlu0 %v7561_v27, %s7173_s21 }
 0xd2f   : > { %v4733_v45 = vpop.xlane.xlu0 %4732 }
 0xd37   : > { %v4736_v53 = vpop.xlane.xlu1 %4735 }
 0xd38   : > { %7052 = vrcp.f32 %v4736_v53 }
 0xd3f   : > { %v4742_v10 = vpop.xlane.xlu1 %4741 }
 0xd40   : > { %7054 = vrcp.f32 %v4742_v10 }
 0xd45   : > { %v7053_v47 = vpop.eup %7052 }
 0xd46   : > { %v4764_v18 = vmul.f32 %v7053_v47, %v8362_v57 }
 0xd47   : > { %v4748_v54 = vpop.xlane.xlu1 %4747 }
 0xd48   : > { %7056 = vrcp.f32 %v4748_v54  ;;  %v4772_v41 = vpack.c.bf16 %v4764_v18, %v4764_v18 }
 0xd4d   : > { %v7055_v44 = vpop.eup %7054 }
 0xd4e   : > { %v4766_v27 = vmul.f32 %v7055_v44, %v8366_v37 }
 0xd4f   : > { %v4754_v14 = vpop.xlane.xlu1 %4753 }
 0xd50   : > { %7058 = vrcp.f32 %v4754_v14  ;;  %v4774_v13 = vpack.c.bf16 %v4766_v27, %v4766_v27 }
 0xd51   : > { %7060 = vrcp.f32 %v4733_v45 }
 0xd53   : > { %v4828_v11 = vpop.permute.xlu1 %4827 }
 0xd54   : > { %v4833_v55 = vsel %vm1832_vm4, %v4828_v11, 0 }
 0xd55   : > { %6752 = vmatpush3.bf16.msra.mxu1 %v4833_v55  ;;  %v7057_v43 = vpop.eup %7056 }
 0xd56   : > { %6763 = vmatprep.subr.bf16.mxu1 %v7161_v50  ;;  %v4768_v37 = vmul.f32 %v7057_v43, %v8370_v3 }
 0xd57   : > { %v4876_v39 = vpop.permute.xlu1 %4875 }
 0xd58   : > { %6754 = vmatmul.mubr.msk.bf16.vlgmr.msra.gmra.mxu1 %vm1319_vm3, %v4772_v41  ;;  %v4776_v52 = vpack.c.bf16 %v4768_v37, %v4768_v37 }
 0xd59   : > { %6765 = vmatprep.mubr.msk.bf16.mxu1 %vm7162_vm2, %v7161_v50 }
 0xd5b   : > { %v4924_v17 = vpop.permute.xlu1 %4923 }
 0xd5c   : > { %v4929_v57 = vsel %vm1832_vm4, %v4924_v17, 0 }
 0xd5d   : > { %6764 = vmatpush3.bf16.msra.mxu1 %v4929_v57  ;;  %v7059_v8 = vpop.eup %7058 }
 0xd5e   : > { %6775 = vmatprep.subr.bf16.mxu1 %v7161_v50  ;;  %v4770_v3 = vmul.f32 %v7059_v8, %v8374_v5  ;;  %v7061_v59 = vpop.eup %7060  ;;  %v4881_v5 = vsel %vm1832_vm4, %v4876_v39, 0 }
 0xd5f   : > { %v5020_v63 = vpop.permute.xlu1 %5019 }
 0xd60   : > { %v5025_v40 = vsel %vm1832_vm4, %v5020_v63, 0  ;;  %6766 = vmatmul.mubr.msk.bf16.vlgmr.msra.gmra.mxu1 %vm1319_vm3, %v4774_v13  ;;  %v4778_v38 = vpack.c.bf16 %v4770_v3, %v4770_v3 }
 0xd61   : > { %6776 = vmatpush3.bf16.msra.mxu1 %v5025_v40  ;;  %6777 = vmatprep.mubr.msk.bf16.mxu1 %vm7162_vm2, %v7161_v50 }
 0xd62   : > { %6787 = vmatprep.subr.bf16.mxu1 %v7161_v50 }
 0xd63   : > { %v4691_v20 = vpop.xlane.xlu0 %4690  ;;  %v5116_v34 = vpop.permute.xlu1 %5115 }
 0xd64   : > { %v4709_v19 = vsub.f32 %v8395_v35, %v4691_v20  ;;  %v5121_v33 = vsel %vm1832_vm4, %v5116_v34, 0  ;;  %v4763_v35 = vmul.f32 %v7061_v59, %v8358_v15 }
 0xd66   : > { %v4719_v25 = vmul.f32 1.442695, %v4709_v19  ;;  %v4771_v61 = vpack.c.bf16 %v4763_v35, %v4763_v35  ;;  %v1315_v19 = vld [vmem:[%s7343_s23 + $0x18] sm:$0xff]  ;;  %s8727_s23 = sld [smem:[#allocation19_spill]] (!%p6181_p9) }
 0xd67   : > { %v5167_v8 = vpack.c.bf16 %v1315_v19, %v1315_v19 }
 0xd68   : > { %7062 = vpow2.f32 %v4719_v25  ;;  %6778 = vmatmul.mubr.msk.bf16.vlgmr.msra.gmra.mxu1 %vm1319_vm3, %v4776_v52 }
 0xd69   : > { %6788 = vmatpush3.bf16.msra.mxu1 %v5121_v33  ;;  %6789 = vmatprep.mubr.msk.bf16.mxu1 %vm7162_vm2, %v7161_v50 }
 0xd6b   : > { %v4697_v22 = vpop.xlane.xlu0 %4696 }
 0xd6c   : > { %v4711_v15 = vsub.f32 %v8404_v26, %v4697_v22 }
 0xd6e   : > { %v4723_v12 = vmul.f32 1.442695, %v4711_v15 }
 0xd70   : > { %6790 = vmatmul.mubr.msk.bf16.vlgmr.msra.gmra.mxu1 %vm1319_vm3, %v4778_v38  ;;  %7064 = vpow2.f32 %v4723_v12 }
 0xd73   : > { %v4703_v30 = vpop.xlane.xlu0 %4702 }
 0xd74   : > { %v4713_v21 = vsub.f32 %v8413_v42, %v4703_v30  ;;  %v5181_v30 = vsel %vm1832_vm4, %v5167_v8, 0 }
 0xd75   : > { %v7063_v58 = vpop.eup %7062 }
 0xd76   : > { %v4737_v48 = vsel %vm1319_vm3, %v7063_v58, 0.0  ;;  %v4727_v49 = vmul.f32 1.442695, %v4713_v21 }
 0xd77   : > { %4738 = vadd.xlane.f32.xlu0 %v4737_v48  ;;  %v4780_v60 = vpop.permute.xlu0 %4779 }
 0xd78   : > { %v4785_v0 = vsel %vm1832_vm4, %v4780_v60, 0  ;;  %7066 = vpow2.f32 %v4727_v49 }
 0xd79   : > { %6746 = vmatpush3.bf16.msra.mxu0 %v4785_v0 }
 0xd7a   : > { %6757 = vmatprep.subr.bf16.mxu0 %v7161_v50 }
 0xd7c   : > { %6748 = vmatmul.mubr.msk.bf16.vlgmr.msra.gmra.mxu0 %vm1319_vm3, %v4771_v61 }
 0xd7d   : > { %6758 = vmatpush3.bf16.msra.mxu0 %v4881_v5  ;;  %6759 = vmatprep.mubr.msk.bf16.mxu0 %vm7162_vm2, %v7161_v50  ;;  %v7065_v62 = vpop.eup %7064 }
 0xd7e   : > { %6769 = vmatprep.subr.bf16.mxu0 %v7161_v50  ;;  %v4743_v46 = vsel %vm1319_vm3, %v7065_v62, 0.0 }
 0xd85   : > { %v7067_v28 = vpop.eup %7066 }
 0xd86   : > { %v4749_v2 = vsel %vm1319_vm3, %v7067_v28, 0.0 }
 0xd8d   : > { %4971 = vrot.lane.b32.xlu0 %v7569_v4, %s7173_s21 }
 0xdac   : > { %4744 = vadd.xlane.f32.xlu0 %v4743_v46 }
 0xdb0   : > { %4750 = vadd.xlane.f32.xlu0 %v4749_v2 }
 0xdc6   : > { %5067 = vrot.lane.b32.xlu0 %v7575_v7, %s7173_s21 }
 0xe00   : > { %v4739_v4 = vpop.xlane.xlu0 %4738 }
 0xe01   : > { %7068 = vrcp.f32 %v4739_v4 }
 0xe04   : > { %v4972_v36 = vpop.permute.xlu0 %4971 }
 0xe05   : > { %v4977_v6 = vsel %vm1832_vm4, %v4972_v36, 0 }
 0xe0e   : > { %v7069_v26 = vpop.eup %7068 }
 0xe0f   : > { %v4765_v24 = vmul.f32 %v7069_v26, %v7063_v58 }
 0xe11   : > { %v4773_v42 = vpack.c.bf16 %v4765_v24, %v4765_v24 }
 0xe13   : > { %6760 = vmatmul.mubr.msk.bf16.vlgmr.msra.gmra.mxu0 %vm1319_vm3, %v4773_v42  ;;  %v7107_v42 = vld [vmem:[#allocation2 + $0x10] sm:$0xff] }
 0xe14   : > { %6770 = vmatpush3.bf16.msra.mxu0 %v4977_v6  ;;  %6771 = vmatprep.mubr.msk.bf16.mxu0 %vm7162_vm2, %v7161_v50 }
 0xe15   : > { %6781 = vmatprep.subr.bf16.mxu0 %v7161_v50 }
 0xe18   : > { %v4869_v29 = vpop.f32.mrf.mxu1 }
 0xe1a   : > { %v6755_v53 = vpop.f32.mrf.mxu1 }
 0xe1c   : > { %v4872_v10 = vpop.f32.mrf.mxu1 }
 0xe1e   : > { %v6756_v7 = vpop.f32.mrf.mxu1 }
 0xe1f   : > { %v6162_v7 = vld [vmem:[%s8723_s0] ss:$0 sm:$0xff] }
 0xe20   : > { %v4965_v54 = vpop.f32.mrf.mxu1 }
 0xe22   : > { %v6767_v47 = vpop.f32.mrf.mxu1 }
 0xe24   : > { %v4968_v14 = vpop.f32.mrf.mxu1 }
 0xe26   : > { %v6768_v18 = vpop.f32.mrf.mxu1 }
 0xe28   : > { %v5061_v11 = vpop.f32.mrf.mxu1 }
 0xe2a   : > { %v6779_v55 = vpop.f32.mrf.mxu1 }
 0xe2c   : > { %v5064_v41 = vpop.f32.mrf.mxu1 }
 0xe2e   : > { %v6780_v44 = vpop.f32.mrf.mxu1 }
 0xe30   : > { %v5157_v39 = vpop.f32.mrf.mxu1 }
 0xe32   : > { %v6791_v27 = vpop.f32.mrf.mxu1 }
 0xe34   : > { %v5160_v17 = vpop.f32.mrf.mxu1 }
 0xe35   : > { %v4745_v57 = vpop.xlane.xlu0 %4744 }
 0xe36   : > { %7070 = vrcp.f32 %v4745_v57  ;;  %v6792_v13 = vpop.f32.mrf.mxu1 }
 0xe39   : > { %v4751_v43 = vpop.xlane.xlu0 %4750 }
 0xe3a   : > { %7072 = vrcp.f32 %v4751_v43 }
 0xe3c   : > { %v4821_v45 = vpop.f32.mrf.mxu0 }
 0xe3d   : > { %v5068_v52 = vpop.permute.xlu0 %5067  ;;  %v5163_v59 = vpack.c.bf16 %v4869_v29, %v4821_v45  ;;  %v7108_v29 = vld [vmem:[#allocation2] sm:$0xff] }
 0xe3e   : > { %v6749_v63 = vpop.f32.mrf.mxu0  ;;  %v5073_v3 = vsel %vm1832_vm4, %v5068_v52, 0 }
 0xe3f   : > { %v7111_v63 = vld [vmem:[#allocation2 + $0x30] sm:$0xff] }
 0xe40   : > { %v4824_v40 = vpop.f32.mrf.mxu0 }
 0xe42   : > { %v6750_v37 = vpop.f32.mrf.mxu0 }
 0xe43   : > { %v7071_v20 = vpop.eup %7070  ;;  %v7112_v37 = vld [vmem:[#allocation2 + $0x20] sm:$0xff] }
 0xe44   : > { %v4767_v34 = vmul.f32 %v7071_v20, %v7065_v62 }
 0xe46   : > { %v4775_v25 = vpack.c.bf16 %v4767_v34, %v4767_v34 }
 0xe47   : > { %v7073_v33 = vpop.eup %7072 }
 0xe48   : > { %6772 = vmatmul.mubr.msk.bf16.vlgmr.msra.gmra.mxu0 %vm1319_vm3, %v4775_v25  ;;  %v4769_v38 = vmul.f32 %v7073_v33, %v7067_v28  ;;  %v7113_v33 = vld [vmem:[#allocation2 + $0x38] sm:$0xff] }
 0xe49   : > { %6782 = vmatpush3.bf16.msra.mxu0 %v5073_v3  ;;  %6783 = vmatprep.mubr.msk.bf16.mxu0 %vm7162_vm2, %v7161_v50 }
 0xe4a   : > { %6850 = vmatprep.subr.msk.bf16.mxu0 %vm1832_vm4, %v5167_v8  ;;  %v4777_v22 = vpack.c.bf16 %v4769_v38, %v4769_v38 }
 0xe50   : > { %6784 = vmatmul.mubr.msk.bf16.vlgmr.msra.gmra.mxu0 %vm1319_vm3, %v4777_v22 }
 0xe51   : > { %6795 = vmatprep.mubr.msk.bf16.mxu0 %vm1319_vm3, %v5163_v59  ;;  %6794 = vmatpush3.bf16.msra.mxu0 %v5181_v30 }
 0xed3   : > { %v4917_v58 = vpop.f32.mrf.mxu0 }
 0xed4   : > { %v5164_v35 = vpack.c.bf16 %v4965_v54, %v4917_v58 }
 0xed5   : > { %v6761_v48 = vpop.f32.mrf.mxu0 }
 0xed6   : > { %6796 = vmatmul.mubr.msk.bf16.vlgmr.msra.gmra.mxu0 %vm1319_vm3, %v5164_v35 }
 0xed7   : > { %v4920_v60 = vpop.f32.mrf.mxu0 }
 0xed9   : > { %v6762_v0 = vpop.f32.mrf.mxu0 }
 0xf08   : > { %v5013_v50 = vpop.f32.mrf.mxu0 }
 0xf09   : > { %v5165_v61 = vpack.c.bf16 %v5061_v11, %v5013_v50  ;;  %v7110_v11 = vld [vmem:[#allocation2 + $0x8] sm:$0xff] }
 0xf0a   : > { %v6773_v5 = vpop.f32.mrf.mxu0 }
 0xf0b   : > { %6799 = vmatprep.mubr.msk.bf16.mxu0 %vm1319_vm3, %v5165_v61 }
 0xf0c   : > { %v5016_v15 = vpop.f32.mrf.mxu0 }
 0xf0e   : > { %v6774_v12 = vpop.f32.mrf.mxu0 }
 0xf10   : > { %v5109_v21 = vpop.f32.mrf.mxu0 }
 0xf11   : > { %v5166_v49 = vpack.c.bf16 %v5157_v39, %v5109_v21 }
 0xf12   : > { %v6785_v62 = vpop.f32.mrf.mxu0 }
 0xf13   : > { %6800 = vmatmul.mubr.msk.bf16.gmra.mxu0 %vm1319_vm3, %v5166_v49 }
 0xf14   : > { %v5112_v46 = vpop.f32.mrf.mxu0 }
 0xf16   : > { %v6786_v28 = vpop.f32.mrf.mxu0 }
 0xf96   : > { %v6797_v2 = vpop.f32.mrf.mxu0 }
 0xf97   : > { %v5250_v4 = vadd.f32 %v6797_v2, %v8344_v1 }
 0xf98   : > { %v5217_v26 = vpop.f32.mrf.mxu0 }
 0xf99   : > { %v5248_v24 = vadd.f32 %v5217_v26, %v8348_v31  ;;  %v5258_v6 = vadd.f32 %v7107_v42, %v5250_v4  ;;  %v7109_v31 = vld [vmem:[#allocation2 + $0x18] sm:$0xff]  ;;  %v6920_v42 = vld [vmem:[%s7360_s26 + $0x8] sm:$0xff]  }
 0xf9a   : > { %v6798_v36 = vpop.f32.mrf.mxu0  ;;  %6803 = vmatprep.subr.bf16.mxu1 %v6920_v42 }
 0xf9b   : > { %v5256_v53 = vadd.f32 %v7108_v29, %v5248_v24  ;;  %v5251_v10 = vadd.f32 %v6798_v36, %v8353_v16  ;;  %v8488_v14 = vadd.f32 %v6162_v7, %v5258_v6  ;;  %v6921_v6 = vld [vmem:[%s7360_s26] sm:$0xff]   ;;  %6804 = vmatpush3.bf16.msra.mxu1 %v6920_v42 }
 0xf9c   : > { %v5220_v54 = vpop.f32.mrf.mxu0  ;;  %6805 = vmatprep.subr.bf16.mxu1 %v6921_v6 }
 0xf9d   : > { %v8485_v47 = vadd.f32 %v6162_v7, %v5256_v53  ;;  %v5249_v1 = vadd.f32 %v5220_v54, %v8355_v56  ;;  %v5259_v18 = vadd.f32 %v7109_v31, %v5251_v10  ;;  %v5287_v39 = vsel %vm1065_vm1, %v8488_v14, 0.0 }
 0xf9f   : > { %v5257_v55 = vadd.f32 %v7110_v11, %v5249_v1  ;;  %v5281_v41 = vsel %vm1065_vm1, %v8485_v47, 0.0  ;;  %v8494_v44 = vadd.f32 %v6162_v7, %v5259_v18  ;;  %6806 = vmatpush3.bf16.msra.mxu1 %v6921_v6 }
 0xfa0   : > { %5282 = vadd.xlane.f32.xlu0 %v5281_v41 }
 0xfa1   : > { %v8492_v16 = vadd.f32 %v6162_v7, %v5257_v55  ;;  %v5290_v27 = vsel %vm1065_vm1, %v8494_v44, 0.0 }
 0xfa3   : > { %v5284_v56 = vsel %vm1065_vm1, %v8492_v16, 0.0 }
 0xfa4   : > { %5288 = vadd.xlane.f32.xlu0 %v5287_v39  ;;  %5285 = vadd.xlane.f32.xlu1 %v5284_v56 }
 0xfa8   : > { %5291 = vadd.xlane.f32.xlu0 %v5290_v27 }
 0xfd3   : > { %v6801_v17 = vpop.f32.mrf.mxu0 }
 0xfd4   : > { %v5254_v57 = vadd.f32 %v6801_v17, %v8382_v23  ;;  %v7114_v23 = vld [vmem:[#allocation2 + $0x28] sm:$0xff] }
 0xfd5   : > { %v5233_v13 = vpop.f32.mrf.mxu0 }
 0xfd6   : > { %v5252_v43 = vadd.f32 %v5233_v13, %v8386_v9  ;;  %v5262_v40 = vadd.f32 %v7111_v63, %v5254_v57 }
 0xfd7   : > { %v6802_v45 = vpop.f32.mrf.mxu0 }
 0xfd8   : > { %v5260_v20 = vadd.f32 %v7112_v37, %v5252_v43  ;;  %v5255_v19 = vadd.f32 %v6802_v45, %v8390_v32  ;;  %v8508_v8 = vadd.f32 %v6162_v7, %v5262_v40 }
 0xfd9   : > { %v5236_v34 = vpop.f32.mrf.mxu0 }
 0xfda   : > { %v8505_v52 = vadd.f32 %v6162_v7, %v5260_v20  ;;  %v5253_v25 = vadd.f32 %v5236_v34, %v8392_v51  ;;  %v5263_v3 = vadd.f32 %v7113_v33, %v5255_v19  ;;  %v5299_v32 = vsel %vm1065_vm1, %v8508_v8, 0.0 }
 0xfdc   : > { %v5261_v38 = vadd.f32 %v7114_v23, %v5253_v25  ;;  %v5293_v9 = vsel %vm1065_vm1, %v8505_v52, 0.0  ;;  %v8514_v59 = vadd.f32 %v6162_v7, %v5263_v3 }
 0xfdd   : > { %5294 = vadd.xlane.f32.xlu0 %v5293_v9 }
 0xfde   : > { %v8512_v22 = vadd.f32 %v6162_v7, %v5261_v38  ;;  %v5302_v30 = vsel %vm1065_vm1, %v8514_v59, 0.0 }
 0xfe0   : > { %v5296_v51 = vsel %vm1065_vm1, %v8512_v22, 0.0 }
 0xfe1   : > { %5300 = vadd.xlane.f32.xlu0 %v5299_v32  ;;  %5297 = vadd.xlane.f32.xlu1 %v5296_v51 }
 0xfe5   : > { %5303 = vadd.xlane.f32.xlu1 %v5302_v30 }
0x1029   : > { %v5283_v58 = vpop.xlane.xlu0 %5282 }
0x102a   : > { %v5305_v35 = vmul.f32 0.03125, %v5283_v58  ;;  %v6163_v58 = vld [vmem:[%s8724_s22] ss:$0 sm:$0xff] }
0x102c   : > { %v8523_v48 = vsub.f32 %v8485_v47, %v5305_v35 }
0x102d   : > { %v5289_v60 = vpop.xlane.xlu0 %5288  ;;  %v5286_v0 = vpop.xlane.xlu1 %5285 }
0x102e   : > { %v5307_v50 = vmul.f32 0.03125, %v5289_v60  ;;  %v5306_v61 = vmul.f32 0.03125, %v5286_v0  ;;  %v5321_v5 = vmul.f32 %v8523_v48, %v8523_v48 }
0x1030   : > { %v8528_v15 = vsub.f32 %v8488_v14, %v5307_v50  ;;  %v8531_v12 = vsub.f32 %v8492_v16, %v5306_v61  ;;  %v5329_v21 = vsel %vm1065_vm1, %v5321_v5, 0.0  ;;  %v6164_v5 = vld [vmem:[%s786_s7] ss:$0 sm:$0xff] }
0x1031   : > { %v5292_v49 = vpop.xlane.xlu0 %5291  ;;  %5330 = vadd.xlane.f32.xlu0 %v5329_v21 }
0x1032   : > { %v5308_v62 = vmul.f32 0.03125, %v5292_v49  ;;  %v5323_v46 = vmul.f32 %v8528_v15, %v8528_v15  ;;  %v5322_v28 = vmul.f32 %v8531_v12, %v8531_v12 }
0x1034   : > { %v8539_v2 = vsub.f32 %v8494_v44, %v5308_v62  ;;  %v5335_v4 = vsel %vm1065_vm1, %v5323_v46, 0.0  ;;  %v5332_v26 = vsel %vm1065_vm1, %v5322_v28, 0.0 }
0x1035   : > { %5336 = vadd.xlane.f32.xlu0 %v5335_v4  ;;  %5333 = vadd.xlane.f32.xlu1 %v5332_v26 }
0x1036   : > { %v5324_v24 = vmul.f32 %v8539_v2, %v8539_v2 }
0x1038   : > { %v5338_v36 = vsel %vm1065_vm1, %v5324_v24, 0.0 }
0x1039   : > { %5339 = vadd.xlane.f32.xlu1 %v5338_v36 }
0x1066   : > { %v5295_v29 = vpop.xlane.xlu0 %5294 }
0x1067   : > { %v5309_v53 = vmul.f32 0.03125, %v5295_v29 }
0x1069   : > { %v8549_v10 = vsub.f32 %v8505_v52, %v5309_v53 }
0x106a   : > { %v5301_v7 = vpop.xlane.xlu0 %5300  ;;  %v5298_v54 = vpop.xlane.xlu1 %5297 }
0x106b   : > { %v5311_v1 = vmul.f32 0.03125, %v5301_v7  ;;  %v5310_v31 = vmul.f32 0.03125, %v5298_v54  ;;  %v5325_v18 = vmul.f32 %v8549_v10, %v8549_v10 }
0x106d   : > { %v8554_v11 = vsub.f32 %v8508_v8, %v5311_v1  ;;  %v8557_v55 = vsub.f32 %v8512_v22, %v5310_v31  ;;  %v5341_v41 = vsel %vm1065_vm1, %v5325_v18, 0.0 }
0x106e   : > { %5342 = vadd.xlane.f32.xlu0 %v5341_v41  ;;  %v5304_v39 = vpop.xlane.xlu1 %5303 }
0x106f   : > { %v5312_v56 = vmul.f32 0.03125, %v5304_v39  ;;  %v5327_v27 = vmul.f32 %v8554_v11, %v8554_v11  ;;  %v5326_v17 = vmul.f32 %v8557_v55, %v8557_v55 }
0x1071   : > { %v8565_v57 = vsub.f32 %v8514_v59, %v5312_v56  ;;  %v5347_v13 = vsel %vm1065_vm1, %v5327_v27, 0.0  ;;  %v5344_v43 = vsel %vm1065_vm1, %v5326_v17, 0.0 }
0x1072   : > { %5348 = vadd.xlane.f32.xlu0 %v5347_v13  ;;  %5345 = vadd.xlane.f32.xlu1 %v5344_v43 }
0x1073   : > { %v5328_v45 = vmul.f32 %v8565_v57, %v8565_v57 }
0x1075   : > { %v5350_v63 = vsel %vm1065_vm1, %v5328_v45, 0.0 }
0x1076   : > { %5351 = vadd.xlane.f32.xlu1 %v5350_v63 }
0x10ba   : > { %v5331_v40 = vpop.xlane.xlu0 %5330 }
0x10bb   : > { %v5353_v37 = vmul.f32 0.03125, %v5331_v40 }
0x10bd   : > { %v5361_v20 = vadd.f32 1e-05, %v5353_v37 }
0x10be   : > { %v5337_v19 = vpop.xlane.xlu0 %5336  ;;  %v5334_v34 = vpop.xlane.xlu1 %5333 }
0x10bf   : > { %7074 = vrsqrt.f32 %v5361_v20  ;;  %v5355_v25 = vmul.f32 0.03125, %v5337_v19  ;;  %v5354_v33 = vmul.f32 0.03125, %v5334_v34 }
0x10c1   : > { %v5363_v3 = vadd.f32 1e-05, %v5355_v25  ;;  %v5362_v23 = vadd.f32 1e-05, %v5354_v33 }
0x10c2   : > { %v5340_v38 = vpop.xlane.xlu1 %5339 }
0x10c3   : > { %7076 = vrsqrt.f32 %v5363_v3  ;;  %v5356_v9 = vmul.f32 0.03125, %v5340_v38  ;;  %v6925_v38 = vld [vmem:[%s7374_s4 + $0x20] sm:$0xff]  }
0x10c4   : > { %7078 = vrsqrt.f32 %v5362_v23  ;;  %v6924_v23 = vld [vmem:[%s7374_s4 + $0x28] sm:$0xff]  }
0x10c5   : > { %v5364_v32 = vadd.f32 1e-05, %v5356_v9  ;;  %v6926_v9 = vld [vmem:[%s7374_s4 + $0x18] sm:$0xff]  }
0x10c7   : > { %7080 = vrsqrt.f32 %v5364_v32  ;;  %v6927_v32 = vld [vmem:[%s7374_s4 + $0x10] sm:$0xff]  }
0x10cc   : > { %v7075_v51 = vpop.eup %7074 }
0x10cd   : > { %v5377_v30 = vmul.f32 %v7075_v51, %v8523_v48  ;;  %v6928_v51 = vld [vmem:[%s7374_s4 + $0x8] sm:$0xff]  }
0x10cf   : > { %v5391_v61 = vmul.f32 %v6163_v58, %v5377_v30  ;;  %v6929_v30 = vld [vmem:[%s7374_s4] sm:$0xff]  }
0x10d0   : > { %v7077_v35 = vpop.eup %7076 }
0x10d1   : > { %v7079_v60 = vpop.eup %7078  ;;  %v5379_v0 = vmul.f32 %v7077_v35, %v8528_v15  ;;  %v5405_v46 = vadd.f32 %v6164_v5, %v5391_v61 }
0x10d2   : > { %v5378_v50 = vmul.f32 %v7079_v60, %v8531_v12 }
0x10d3   : > { %v5393_v48 = vmul.f32 %v6163_v58, %v5379_v0 }
0x10d4   : > { %v7081_v21 = vpop.eup %7080  ;;  %v5392_v49 = vmul.f32 %v6163_v58, %v5378_v50 }
0x10d5   : > { %v5380_v62 = vmul.f32 %v7081_v21, %v8539_v2  ;;  %v5407_v24 = vadd.f32 %v6164_v5, %v5393_v48 }
0x10d6   : > { %v5406_v28 = vadd.f32 %v6164_v5, %v5392_v49 }
0x10d7   : > { %v5394_v4 = vmul.f32 %v6163_v58, %v5380_v62 }
0x10d8   : > { %v5413_v26 = vpack.c.bf16 %v5406_v28, %v5405_v46 }
0x10d9   : > { %v5408_v36 = vadd.f32 %v6164_v5, %v5394_v4 }
0x10da   : > { %6807 = vmatprep.mubr.msk.bf16.mxu1 %vm1065_vm1, %v5413_v26 }
0x10db   : > { %v5414_v15 = vpack.c.bf16 %v5408_v36, %v5407_v24 }
0x10dd   : > { %6808 = vmatmul.mubr.msk.bf16.vlgmr.msra.gmra.mxu1 %vm1065_vm1, %v5414_v15 }
0x10f7   : > { %v5343_v12 = vpop.xlane.xlu0 %5342 }
0x10f8   : > { %v5357_v42 = vmul.f32 0.03125, %v5343_v12 }
0x10fa   : > { %v5365_v6 = vadd.f32 1e-05, %v5357_v42 }
0x10fb   : > { %v5349_v29 = vpop.xlane.xlu0 %5348  ;;  %v5346_v53 = vpop.xlane.xlu1 %5345 }
0x10fc   : > { %7082 = vrsqrt.f32 %v5365_v6  ;;  %v5359_v7 = vmul.f32 0.03125, %v5349_v29  ;;  %v5358_v54 = vmul.f32 0.03125, %v5346_v53 }
0x10fe   : > { %v5367_v2 = vadd.f32 1e-05, %v5359_v7  ;;  %v5366_v1 = vadd.f32 1e-05, %v5358_v54 }
0x10ff   : > { %v5352_v31 = vpop.xlane.xlu1 %5351 }
0x1100   : > { %7084 = vrsqrt.f32 %v5367_v2  ;;  %v5360_v18 = vmul.f32 0.03125, %v5352_v31 }
0x1101   : > { %7086 = vrsqrt.f32 %v5366_v1 }
0x1102   : > { %v5368_v41 = vadd.f32 1e-05, %v5360_v18 }
0x1104   : > { %7088 = vrsqrt.f32 %v5368_v41 }
0x1109   : > { %v7083_v39 = vpop.eup %7082 }
0x110a   : > { %v5381_v56 = vmul.f32 %v7083_v39, %v8549_v10 }
0x110c   : > { %v5395_v45 = vmul.f32 %v6163_v58, %v5381_v56 }
0x110d   : > { %v7085_v27 = vpop.eup %7084 }
0x110e   : > { %v7087_v17 = vpop.eup %7086  ;;  %v5383_v13 = vmul.f32 %v7085_v27, %v8554_v11  ;;  %v5409_v34 = vadd.f32 %v6164_v5, %v5395_v45 }
0x110f   : > { %v5382_v43 = vmul.f32 %v7087_v17, %v8557_v55  ;;  %v6922_v55 = vld [vmem:[%s7374_s4 + $0x38] sm:$0xff]  }
0x1110   : > { %v5397_v63 = vmul.f32 %v6163_v58, %v5383_v13  ;;  %6815 = vmatprep.subr.bf16.mxu0 %v6922_v55 }
0x1111   : > { %v7089_v40 = vpop.eup %7088  ;;  %v5396_v37 = vmul.f32 %v6163_v58, %v5382_v43  ;;  %6816 = vmatpush3.bf16.msra.mxu0 %v6922_v55 }
0x1112   : > { %v5384_v20 = vmul.f32 %v7089_v40, %v8565_v57  ;;  %v5411_v19 = vadd.f32 %v6164_v5, %v5397_v63  ;;  %v6923_v57 = vld [vmem:[%s7374_s4 + $0x30] sm:$0xff]  }
0x1113   : > { %v5410_v25 = vadd.f32 %v6164_v5, %v5396_v37  ;;  %6817 = vmatprep.subr.bf16.mxu0 %v6923_v57 }
0x1114   : > { %v5398_v10 = vmul.f32 %v6163_v58, %v5384_v20  ;;  %v8607_v58 = vld [vmem:[%s794_s28] ss:$0 sm:$0xff] }
0x1115   : > { %v5415_v33 = vpack.c.bf16 %v5410_v25, %v5409_v34  ;;  %6818 = vmatpush3.bf16.msra.mxu0 %v6923_v57 }
0x1116   : > { %v5412_v3 = vadd.f32 %v6164_v5, %v5398_v10  ;;  %6819 = vmatprep.subr.bf16.mxu0 %v6924_v23 }
0x1117   : > { %6811 = vmatprep.mubr.msk.bf16.mxu1 %vm1065_vm1, %v5415_v33 }
0x1118   : > { %v5416_v11 = vpack.c.bf16 %v5412_v3, %v5411_v19 }
0x1119   : > { %6820 = vmatpush3.bf16.msra.mxu0 %v6924_v23 }
0x111a   : > { %6812 = vmatmul.mubr.msk.bf16.gmra.mxu1 %vm1065_vm1, %v5416_v11  ;;  %6821 = vmatprep.subr.bf16.mxu0 %v6925_v38 }
0x111d   : > { %6822 = vmatpush3.bf16.msra.mxu0 %v6925_v38 }
0x111e   : > { %6823 = vmatprep.subr.bf16.mxu0 %v6926_v9 }
0x1121   : > { %6824 = vmatpush3.bf16.msra.mxu0 %v6926_v9 }
0x1122   : > { %6825 = vmatprep.subr.bf16.mxu0 %v6927_v32 }
0x1125   : > { %6826 = vmatpush3.bf16.msra.mxu0 %v6927_v32 }
0x1126   : > { %6827 = vmatprep.subr.bf16.mxu0 %v6928_v51 }
0x1129   : > { %6828 = vmatpush3.bf16.msra.mxu0 %v6928_v51 }
0x112a   : > { %6829 = vmatprep.subr.bf16.mxu0 %v6929_v30 }
0x112d   : > { %6830 = vmatpush3.bf16.msra.mxu0 %v6929_v30 }
0x119d   : > { %v6809_v35 = vpop.f32.mrf.mxu1 }
0x119e   : > { %v5495_v60 = vadd.f32 %v6809_v35, %v8607_v58 }
0x119f   : > { %v5486_v0 = vpop.f32.mrf.mxu1 }
0x11a0   : > { %v5527_v50 = vmul.f32 0.044715, %v5495_v60  ;;  %v5487_v61 = vadd.f32 %v8607_v58, %v5486_v0  ;;  %v5519_v20 = vmul.f32 0.5, %v5495_v60 }
0x11a1   : > { %v6810_v5 = vpop.f32.mrf.mxu1 }
0x11a2   : > { %v5535_v21 = vmul.f32 %v5527_v50, %v5495_v60  ;;  %v5525_v49 = vmul.f32 0.044715, %v5487_v61  ;;  %v5498_v48 = vadd.f32 %v6810_v5, %v8607_v58  ;;  %v5517_v63 = vmul.f32 0.5, %v5487_v61 }
0x11a3   : > { %v5489_v62 = vpop.f32.mrf.mxu1 }
0x11a4   : > { %v5543_v46 = vmul.f32 %v5535_v21, %v5495_v60  ;;  %v5533_v28 = vmul.f32 %v5525_v49, %v5487_v61  ;;  %v5528_v4 = vmul.f32 0.044715, %v5498_v48  ;;  %v5490_v26 = vadd.f32 %v8607_v58, %v5489_v62 }
0x11a5   : > { %v5520_v45 = vmul.f32 0.5, %v5498_v48 }
0x11a6   : > { %v5551_v24 = vadd.f32 %v5543_v46, %v5495_v60  ;;  %v5541_v36 = vmul.f32 %v5533_v28, %v5487_v61  ;;  %v5536_v15 = vmul.f32 %v5528_v4, %v5498_v48  ;;  %v5526_v12 = vmul.f32 0.044715, %v5490_v26 }
0x11a7   : > { %v5518_v40 = vmul.f32 0.5, %v5490_v26 }
0x11a8   : > { %v5559_v42 = vmul.f32 0.7978846, %v5551_v24  ;;  %v5544_v6 = vmul.f32 %v5536_v15, %v5498_v48  ;;  %v5549_v29 = vadd.f32 %v5541_v36, %v5487_v61  ;;  %v5534_v53 = vmul.f32 %v5526_v12, %v5490_v26 }
0x11aa   : > { %v5552_v7 = vadd.f32 %v5544_v6, %v5498_v48  ;;  %v5557_v54 = vmul.f32 0.7978846, %v5549_v29  ;;  %v5542_v2 = vmul.f32 %v5534_v53, %v5490_v26  ;;  %7090 = vtanh.f32 %v5559_v42 }
0x11ac   : > { %v5560_v1 = vmul.f32 0.7978846, %v5552_v7  ;;  %v5550_v31 = vadd.f32 %v5542_v2, %v5490_v26  ;;  %7092 = vtanh.f32 %v5557_v54 }
0x11ae   : > { %7094 = vtanh.f32 %v5560_v1  ;;  %v5558_v18 = vmul.f32 0.7978846, %v5550_v31 }
0x11b0   : > { %7096 = vtanh.f32 %v5558_v18 }
0x11b7   : > { %v7091_v41 = vpop.eup %7090 }
0x11b8   : > { %v5575_v43 = vadd.f32 1.0, %v7091_v41 }
0x11b9   : > { %v7093_v39 = vpop.eup %7092 }
0x11ba   : > { %v5573_v17 = vadd.f32 1.0, %v7093_v39  ;;  %v5583_v10 = vmul.f32 %v5575_v43, %v5519_v20 }
0x11bb   : > { %v7095_v56 = vpop.eup %7094 }
0x11bc   : > { %v5576_v27 = vadd.f32 1.0, %v7095_v56  ;;  %v5581_v34 = vmul.f32 %v5573_v17, %v5517_v63 }
0x11bd   : > { %v7097_v13 = vpop.eup %7096 }
0x11be   : > { %v5574_v37 = vadd.f32 1.0, %v7097_v13  ;;  %v5584_v19 = vmul.f32 %v5576_v27, %v5520_v45 }
0x11c0   : > { %v5582_v25 = vmul.f32 %v5574_v37, %v5518_v40  ;;  %v5590_v3 = vpack.c.bf16 %v5584_v19, %v5583_v10  ;;  %v6180_v40 = vld [vmem:[%s802_s20] ss:$0 sm:$0xff] }
0x11c2   : > { %v5589_v33 = vpack.c.bf16 %v5582_v25, %v5581_v34 }
0x11c4   : > { %6831 = vmatprep.mubr.bf16.mxu0 %v5589_v33 }
0x11c5   : > { %6832 = vmatmul.mubr.bf16.vlgmr.msra.gmra.mxu0 %v5590_v3 }
0x11da   : > { %v6813_v11 = vpop.f32.mrf.mxu1 }
0x11db   : > { %v5511_v55 = vadd.f32 %v6813_v11, %v8607_v58 }
0x11dc   : > { %v5502_v57 = vpop.f32.mrf.mxu1 }
0x11dd   : > { %v5531_v23 = vmul.f32 0.044715, %v5511_v55  ;;  %v5503_v38 = vadd.f32 %v8607_v58, %v5502_v57  ;;  %v5523_v39 = vmul.f32 0.5, %v5511_v55 }
0x11de   : > { %v6814_v9 = vpop.f32.mrf.mxu1 }
0x11df   : > { %v5539_v32 = vmul.f32 %v5531_v23, %v5511_v55  ;;  %v5529_v51 = vmul.f32 0.044715, %v5503_v38  ;;  %v5514_v30 = vadd.f32 %v6814_v9, %v8607_v58  ;;  %v5521_v31 = vmul.f32 0.5, %v5503_v38 }
0x11e0   : > { %v5505_v35 = vpop.f32.mrf.mxu1 }
0x11e1   : > { %v5547_v60 = vmul.f32 %v5539_v32, %v5511_v55  ;;  %v5537_v0 = vmul.f32 %v5529_v51, %v5503_v38  ;;  %v5532_v50 = vmul.f32 0.044715, %v5514_v30  ;;  %v5506_v61 = vadd.f32 %v8607_v58, %v5505_v35 }
0x11e2   : > { %v5524_v2 = vmul.f32 0.5, %v5514_v30 }
0x11e3   : > { %v5555_v5 = vadd.f32 %v5547_v60, %v5511_v55  ;;  %v5545_v21 = vmul.f32 %v5537_v0, %v5503_v38  ;;  %v5540_v49 = vmul.f32 %v5532_v50, %v5514_v30  ;;  %v5530_v48 = vmul.f32 0.044715, %v5506_v61 }
0x11e4   : > { %v5522_v18 = vmul.f32 0.5, %v5506_v61 }
0x11e5   : > { %v5548_v62 = vmul.f32 %v5540_v49, %v5514_v30  ;;  %v5538_v46 = vmul.f32 %v5530_v48, %v5506_v61  ;;  %v5553_v28 = vadd.f32 %v5545_v21, %v5503_v38  ;;  %v5563_v4 = vmul.f32 0.7978846, %v5555_v5 }
0x11e7   : > { %v5556_v26 = vadd.f32 %v5548_v62, %v5514_v30  ;;  %v5546_v24 = vmul.f32 %v5538_v46, %v5506_v61  ;;  %v5561_v36 = vmul.f32 0.7978846, %v5553_v28 }
0x11e9   : > { %v5564_v15 = vmul.f32 0.7978846, %v5556_v26  ;;  %v5554_v12 = vadd.f32 %v5546_v24, %v5506_v61  ;;  %7098 = vtanh.f32 %v5561_v36 }
0x11ea   : > { %7100 = vtanh.f32 %v5563_v4 }
0x11eb   : > { %7102 = vtanh.f32 %v5564_v15  ;;  %v5562_v42 = vmul.f32 0.7978846, %v5554_v12 }
0x11ed   : > { %7104 = vtanh.f32 %v5562_v42 }
0x11f6   : > { %v7099_v6 = vpop.eup %7098 }
0x11f7   : > { %v7101_v58 = vpop.eup %7100  ;;  %v5577_v53 = vadd.f32 1.0, %v7099_v6 }
0x11f8   : > { %v7103_v29 = vpop.eup %7102  ;;  %v5579_v1 = vadd.f32 1.0, %v7101_v58 }
0x11f9   : > { %v5580_v7 = vadd.f32 1.0, %v7103_v29  ;;  %v5585_v27 = vmul.f32 %v5577_v53, %v5521_v31 }
0x11fa   : > { %v7105_v54 = vpop.eup %7104  ;;  %v5587_v13 = vmul.f32 %v5579_v1, %v5523_v39 }
0x11fb   : > { %v5578_v41 = vadd.f32 1.0, %v7105_v54  ;;  %v5588_v56 = vmul.f32 %v5580_v7, %v5524_v2 }
0x11fd   : > { %v5586_v17 = vmul.f32 %v5578_v41, %v5522_v18  ;;  %v5592_v45 = vpack.c.bf16 %v5588_v56, %v5587_v13 }
0x11ff   : > { %v5591_v43 = vpack.c.bf16 %v5586_v17, %v5585_v27 }
0x1201   : > { %6835 = vmatprep.mubr.bf16.mxu0 %v5591_v43 }
0x1202   : > { %6836 = vmatmul.mubr.bf16.gmra.mxu0 %v5592_v45 }
0x1285   : > { %v6833_v63 = vpop.f32.mrf.mxu0 }
0x1286   : > { %v5724_v37 = vadd.f32 %v6833_v63, %v8488_v14 }
0x1287   : > { %v5691_v20 = vpop.f32.mrf.mxu0 }
0x1288   : > { %v5739_v19 = vadd.f32 %v6180_v40, %v5724_v37  ;;  %v5722_v34 = vadd.f32 %v5691_v20, %v8485_v47 }
0x1289   : > { %v6834_v25 = vpop.f32.mrf.mxu0 }
0x128a   : > { %5747 = vst.msk [vmem:[#allocation2 + $0x10] sm:$0xff] %vm1065_vm1, %v5739_v19  ;;  %v5737_v10 = vadd.f32 %v6180_v40, %v5722_v34  ;;  %v5725_v33 = vadd.f32 %v6834_v25, %v8494_v44 }
0x128b   : > { %v5694_v3 = vpop.f32.mrf.mxu0 }
0x128c   : > { %5745 = vst.msk [vmem:[#allocation2] sm:$0xff] %vm1065_vm1, %v5737_v10  ;;  %v5740_v11 = vadd.f32 %v6180_v40, %v5725_v33  ;;  %v5723_v55 = vadd.f32 %v5694_v3, %v8492_v16 }
0x128e   : > { %5748 = vst.msk [vmem:[#allocation2 + $0x18] sm:$0xff] %vm1065_vm1, %v5740_v11  ;;  %v5738_v57 = vadd.f32 %v6180_v40, %v5723_v55 }
0x1290   : > { %5746 = vst.msk [vmem:[#allocation2 + $0x8] sm:$0xff] %vm1065_vm1, %v5738_v57 }
0x12c2   : > { %v6837_v14 = vpop.f32.mrf.mxu0 }
0x12c3   : > { %v5728_v47 = vadd.f32 %v6837_v14, %v8508_v8 }
0x12c4   : > { %v5707_v23 = vpop.f32.mrf.mxu0 }
0x12c5   : > { %v5743_v38 = vadd.f32 %v6180_v40, %v5728_v47  ;;  %v5726_v9 = vadd.f32 %v5707_v23, %v8505_v52 }
0x12c6   : > { %v6838_v32 = vpop.f32.mrf.mxu0 }
0x12c7   : > { %5751 = vst.msk [vmem:[#allocation2 + $0x30] sm:$0xff] %vm1065_vm1, %v5743_v38  ;;  %v5741_v44 = vadd.f32 %v6180_v40, %v5726_v9  ;;  %v5729_v51 = vadd.f32 %v6838_v32, %v8514_v59 }
0x12c8   : > { %v5710_v30 = vpop.f32.mrf.mxu0 }
0x12c9   : > { %5749 = vst.msk [vmem:[#allocation2 + $0x20] sm:$0xff] %vm1065_vm1, %v5741_v44  ;;  %v5744_v16 = vadd.f32 %v6180_v40, %v5729_v51  ;;  %v5727_v35 = vadd.f32 %v5710_v30, %v8512_v22  ;;  %5756 = sbr.rel (%p6181_p9) target bundleno = 5028 (0x13a4), region = 104 }
0x12cb   : > { %5752 = vst.msk [vmem:[#allocation2 + $0x38] sm:$0xff] %vm1065_vm1, %v5744_v16  ;;  %v5742_v60 = vadd.f32 %v6180_v40, %v5727_v35 }
0x12cd   : > { %5750 = vst.msk [vmem:[#allocation2 + $0x28] sm:$0xff] %vm1065_vm1, %v5742_v60 }
0x12ce   : > { %v7115_v52 = vld [vmem:[%s8726_s29 + $0x8] sm:$0xff]   ;;  %v5757_v8 = vpack.c.bf16 %v5737_v10, %v5737_v10  ;;  %v5758_v59 = vpack.c.bf16 %v5738_v57, %v5738_v57  ;;  %v5759_v0 = vpack.c.bf16 %v5739_v19, %v5739_v19  ;;  %v7174_v50 = vmov 0.0   ;;  %v7116_v21 = vld [vmem:[%s8726_s29] sm:$0xff]  }
0x12cf   : > { %6839 = vmatprep.subr.bf16.mxu0 %v7174_v50  ;;  %v5760_v61 = vpack.c.bf16 %v5740_v11, %v5740_v11  ;;  %v5761_v5 = vpack.c.bf16 %v5741_v44, %v5741_v44  ;;  %v5762_v22 = vpack.c.bf16 %v5742_v60, %v5742_v60  ;;  %vm7175_vm5 = vmmov 0   ;;  %v6182_v27 = vld [vmem:[%s8727_s23] ss:$0 sm:$0xff] }
0x12d0   : > { %6840 = vmatpush3.bf16.msra.mxu0 %v7115_v52  ;;  %6843 = vmatprep.mubr.msk.bf16.mxu0 %vm7175_vm5, %v7174_v50  ;;  %v5763_v49 = vpack.c.bf16 %v5743_v38, %v5743_v38  ;;  %v5764_v48 = vpack.c.bf16 %v5744_v16, %v5744_v16  ;;  %v5784_v62 = vunpack.c.l.b16 %v5757_v8  ;;  %v5785_v46 = vunpack.c.l.b16 %v5758_v59 }
0x12d1   : > { %6841 = vmatprep.subr.bf16.mxu0 %v7174_v50  ;;  %v5786_v28 = vunpack.c.l.b16 %v5759_v0  ;;  %v5787_v4 = vunpack.c.l.b16 %v5760_v61  ;;  %v5788_v26 = vunpack.c.l.b16 %v5761_v5  ;;  %v5789_v24 = vunpack.c.l.b16 %v5762_v22 }
0x12d2   : > { %v5790_v36 = vunpack.c.l.b16 %v5763_v49  ;;  %v5791_v15 = vunpack.c.l.b16 %v5764_v48  ;;  %v5792_v12 = vrot.slane %v5784_v62, 3  ;;  %v5793_v42 = vrot.slane %v5785_v46, 2 }
0x12d3   : > { %vm5794_vm6 = vcmask 1041409   ;;  %v5796_v6 = vrot.slane %v5786_v28, 1  ;;  %vm5797_vm7 = vcmask 1042434   ;;  %vm5799_vm8 = vcmask 1043459  }
0x12d4   : > { %6842 = vmatpush3.bf16.msra.mxu0 %v7116_v21  ;;  %v5795_v58 = vsel %vm5794_vm6, %v5793_v42, %v5792_v12  ;;  %v5801_v29 = vrot.slane %v5788_v26, 7  ;;  %vm5802_vm9 = vcmask 1044484   ;;  %v5804_v53 = vrot.slane %v5789_v24, 6 }
0x12d5   : > { %v5798_v7 = vsel %vm5797_vm7, %v5796_v6, %v5795_v58  ;;  %vm5805_vm10 = vcmask 1045509   ;;  %v5807_v54 = vrot.slane %v5790_v36, 5  ;;  %vm5808_vm11 = vcmask 1046534  }
0x12d6   : > { %v5800_v2 = vsel %vm5799_vm8, %v5787_v4, %v5798_v7  ;;  %v5810_v1 = vrot.slane %v5791_v15, 4  ;;  %vm5811_vm12 = vcmask 1047559  }
0x12d7   : > { %v5803_v31 = vsel %vm5802_vm9, %v5801_v29, %v5800_v2 }
0x12d8   : > { %v5806_v18 = vsel %vm5805_vm10, %v5804_v53, %v5803_v31 }
0x12d9   : > { %v5809_v41 = vsel %vm5808_vm11, %v5807_v54, %v5806_v18 }
0x12da   : > { %v5812_v39 = vsel %vm5811_vm12, %v5810_v1, %v5809_v41 }
0x12db   : > { %v5813_v56 = vpack.c.b16 %v5812_v39, %v5812_v39 }
0x12dd   : > { %6844 = vmatmul.mubr.msk.bf16.vlgmr.msra.gmra.mxu0 %vm1065_vm1, %v5813_v56 }
0x139d   : > { %v5863_v17 = vpop.f32.mrf.mxu0 }
0x139e   : > { %v5864_v13 = vadd.f32 %v6182_v27, %v5863_v17 }
0x139f   : > { %v6845_v43 = vpop.f32.mrf.mxu0 }
0x13a0   : > { %5869 = vst [vmem:[%s7382_s25] sm:$0xff] %v5864_v13 }
0x13a1   : > { %v5866_v45 = vpop.f32.mrf.mxu0 }
0x13a3   : > { %v6846_v63 = vpop.f32.mrf.mxu0 }
0x13a4 PF: > { %s8728_s1 = sld [smem:[#allocation6_spill]] }
0x13a5   : > { %s8729_s0 = sld [smem:[#allocation4_spill]] }
0x13a6   : > { %s8730_s30 = sld [smem:[#allocation5_spill]] }
0x13a7   : > { %s8731_s20 = sld [smem:[#allocation7_spill]] }
0x13a8   : > { %s8732_s21 = sld [smem:[#allocation8_spill]] }
0x13aa   : > { %s29_s1 = sadd.s32 1, %s8728_s1  }
0x13ab   : > { %p26_p10 = scmp.ge.s32.totalorder %s29_s1, 6  }
0x13ad   :  { %28 = sbr.rel (!%p26_p10) target bundleno = 12 (0xc), region = 170 }

</bundles_post_ra>
